<compile_context>
chip_gen: v7x
topology: tpu7x:2x2x1
jax: 0.10.0
libtpu: 0.0.40
codegen_flags: <defaults>
</compile_context>

<pallas_src>
import math
import functools

import jax
import jax.numpy as jnp
from jax.experimental import pallas as pl
from jax.experimental.pallas import tpu as pltpu

NEG = -1e30          # finite mask value (avoids inf-inf / all-masked-row NaNs)
LN_EPS = 1e-5


def _cparams(*sem):
    return pltpu.CompilerParams(
        dimension_semantics=sem,
        vmem_limit_bytes=48 * 1024 * 1024,   # < v7x 64 MiB physical, > v6e default scoped
    )


def _row_tile(M, target=512):
    """Largest multiple-of-8 row tile <= target dividing M, preferring >=2 tiles."""
    if M % 8 != 0:
        return M
    cap = M if M <= 8 else M // 2            # >=2 grid steps when possible (v7x dual TC)
    t = max(8, min(target, cap))
    t -= t % 8
    t = max(t, 8)
    while t > 8 and M % t != 0:
        t -= 8
    return t if M % t == 0 else M


# --------------------------- in-kernel helpers ------------------------------

def _ln(z, g, b):
    mu = jnp.mean(z, axis=-1, keepdims=True)
    var = jnp.mean(jnp.square(z - mu), axis=-1, keepdims=True)
    return (z - mu) * jax.lax.rsqrt(var + LN_EPS) * g + b


def _mha(q, k, v, bias, wo, bo, *, nhead, scale):
    """Multi-head attention core for one batch element.

    q: [Lq, D] f32, k/v: [Lk, D] f32, bias: additive [Lq or 1, Lk] f32 (combined
    key-padding + causal), wo: [D, D] bf16, bo: [1, D] f32.  Returns [Lq, D] f32.
    Heads are written into lane slices of one [Lq, D] context and projected with
    a single full-depth dot (== concat-then-project of the reference).
    """
    Lq, D = q.shape
    Dh = D // nhead
    ctx = []
    for h in range(nhead):               # static unroll (nhead is small & static)
        sl = slice(h * Dh, (h + 1) * Dh)
        q_h = q[:, sl].astype(jnp.bfloat16)
        k_h = k[:, sl].astype(jnp.bfloat16)
        v_h = v[:, sl].astype(jnp.bfloat16)
        s = jax.lax.dot_general(
            q_h, k_h, dimension_numbers=(((1,), (1,)), ((), ())),
            preferred_element_type=jnp.float32) * scale + bias
        m = jnp.max(s, axis=-1, keepdims=True)
        p = jnp.exp(s - m)
        p = p * pl.reciprocal(jnp.sum(p, axis=-1, keepdims=True), approx=True)
        ctx.append(jnp.dot(p.astype(jnp.bfloat16), v_h,
                           preferred_element_type=jnp.float32))        # [Lq, Dh]
    ctx = jnp.concatenate(ctx, axis=-1)                                # [Lq, D]
    return jnp.dot(ctx.astype(jnp.bfloat16), wo,
                   preferred_element_type=jnp.float32) + bo


# ----------------------------- Pallas kernels ------------------------------

def _encoder_stack_kernel(x_ref, kpm_ref,
                          wqkv_ref, bqkv_ref, wo_ref, bo_ref, g1_ref, bt1_ref,
                          w1_ref, b1_ref, w2_ref, b2_ref, g2_ref, bt2_ref,
                          gf_ref, bf_ref,
                          o_ref, act_ref, *, nhead, scale):
    """Full encoder stack for one batch element; grid=(B, nlayers), layers inner.

    The activation stays resident in the f32 VMEM scratch `act_ref` across all
    layers; the bf16 memory is written to HBM only on the last layer.
    """
    layer = pl.program_id(1)

    @pl.when(layer == 0)
    def _():
        act_ref[...] = x_ref[0]                       # load stream input once

    x = act_ref[...]                                  # [Ls, D] f32
    D = x.shape[-1]
    bias = kpm_ref[0]                                 # [1, Ls] additive key-pad mask

    # ---- self-attention (fused QKV) + residual + LN1 ----
    qkv = jnp.dot(x.astype(jnp.bfloat16), wqkv_ref[0],
                  preferred_element_type=jnp.float32) + bqkv_ref[0]
    attn = _mha(qkv[:, :D], qkv[:, D:2 * D], qkv[:, 2 * D:], bias,
                wo_ref[0], bo_ref[0], nhead=nhead, scale=scale)
    z = _ln(x + attn, g1_ref[0], bt1_ref[0])

    # ---- FFN (linear1 + ReLU + linear2) + residual + LN2 ----
    h = jnp.maximum(jnp.dot(z.astype(jnp.bfloat16), w1_ref[0],
                            preferred_element_type=jnp.float32) + b1_ref[0], 0.0)
    y = jnp.dot(h.astype(jnp.bfloat16), w2_ref[0],
                preferred_element_type=jnp.float32) + b2_ref[0]
    z = _ln(z + y, g2_ref[0], bt2_ref[0])
    act_ref[...] = z

    # ---- final encoder LayerNorm, emitted once per batch element (bf16) ----
    @pl.when(layer == pl.num_programs(1) - 1)
    def _():
        o_ref[0] = _ln(z, gf_ref[...], bf_ref[...]).astype(o_ref.dtype)


def _decoder_stack_kernel(x_ref, mem_ref, tkpm_ref, mkpm_ref,
                          sa_wqkv_ref, sa_bqkv_ref, sa_wo_ref, sa_bo_ref, g1_ref, bt1_ref,
                          ca_wq_ref, ca_bq_ref, ca_wkv_ref, ca_bkv_ref, ca_wo_ref, ca_bo_ref,
                          g2_ref, bt2_ref,
                          w1_ref, b1_ref, w2_ref, b2_ref, g3_ref, bt3_ref,
                          gf_ref, bf_ref,
                          o_ref, act_ref, *, nhead, scale):
    """Full decoder stack (self-attn + cross-attn + FFN per layer) for one batch."""
    layer = pl.program_id(1)

    @pl.when(layer == 0)
    def _():
        act_ref[...] = x_ref[0]

    x = act_ref[...]                                   # [Lt, D] f32
    Lt, D = x.shape
    mem = mem_ref[0]                                   # [Ls, D] bf16 (encoder memory)

    # combined additive biases, built once and shared by every head
    row = jax.lax.broadcasted_iota(jnp.int32, (Lt, Lt), 0)
    col = jax.lax.broadcasted_iota(jnp.int32, (Lt, Lt), 1)
    self_bias = jnp.where(col > row, NEG, 0.0).astype(jnp.float32) + tkpm_ref[0]
    mem_bias = mkpm_ref[0]                             # [1, Ls]

    # ---- masked causal self-attention (fused QKV) + residual + LN1 ----
    qkv = jnp.dot(x.astype(jnp.bfloat16), sa_wqkv_ref[0],
                  preferred_element_type=jnp.float32) + sa_bqkv_ref[0]
    attn = _mha(qkv[:, :D], qkv[:, D:2 * D], qkv[:, 2 * D:], self_bias,
                sa_wo_ref[0], sa_bo_ref[0], nhead=nhead, scale=scale)
    z = _ln(x + attn, g1_ref[0], bt1_ref[0])

    # ---- cross-attention over encoder memory (fused KV) + residual + LN2 ----
    q_c = jnp.dot(z.astype(jnp.bfloat16), ca_wq_ref[0],
                  preferred_element_type=jnp.float32) + ca_bq_ref[0]
    kv_c = jnp.dot(mem, ca_wkv_ref[0],
                   preferred_element_type=jnp.float32) + ca_bkv_ref[0]
    attn = _mha(q_c, kv_c[:, :D], kv_c[:, D:], mem_bias,
                ca_wo_ref[0], ca_bo_ref[0], nhead=nhead, scale=scale)
    z = _ln(z + attn, g2_ref[0], bt2_ref[0])

    # ---- FFN + residual + LN3 ----
    h = jnp.maximum(jnp.dot(z.astype(jnp.bfloat16), w1_ref[0],
                            preferred_element_type=jnp.float32) + b1_ref[0], 0.0)
    y = jnp.dot(h.astype(jnp.bfloat16), w2_ref[0],
                preferred_element_type=jnp.float32) + b2_ref[0]
    z = _ln(z + y, g3_ref[0], bt3_ref[0])
    act_ref[...] = z

    # ---- final decoder LayerNorm, emitted once per batch element (bf16) ----
    @pl.when(layer == pl.num_programs(1) - 1)
    def _():
        o_ref[0] = _ln(z, gf_ref[...], bf_ref[...]).astype(o_ref.dtype)


def _proj_kernel(x_ref, w_ref, b_ref, o_ref):
    o_ref[...] = jnp.dot(x_ref[...].astype(jnp.bfloat16), w_ref[...],
                         preferred_element_type=jnp.float32) + b_ref[...]


# ----------------------------- Pallas wrappers ------------------------------

_ENC_W = ('wqkv', 'bqkv', 'wo', 'bo', 'ln1_g', 'ln1_b',
          'w1', 'b1', 'w2', 'b2', 'ln2_g', 'ln2_b')
_DEC_W = ('sa_wqkv', 'sa_bqkv', 'sa_wo', 'sa_bo', 'ln1_g', 'ln1_b',
          'ca_wq', 'ca_bq', 'ca_wkv', 'ca_bkv', 'ca_wo', 'ca_bo', 'ln2_g', 'ln2_b',
          'w1', 'b1', 'w2', 'b2', 'ln3_g', 'ln3_b')


def _layer_spec(arr):
    """Stacked [nlayers, ...] weight, indexed by the (inner) layer grid axis."""
    nd = arr.ndim - 1
    return pl.BlockSpec((1,) + arr.shape[1:], lambda b, l: (l,) + (0,) * nd)


def _const_spec(arr):
    nd = arr.ndim
    return pl.BlockSpec(arr.shape, lambda b, l: (0,) * nd)


def pallas_encoder_stack(x, kpm, enc_w, final_ln, nhead):
    B, Ls, D = x.shape
    nl = enc_w['wqkv'].shape[0]
    scale = float(D // nhead) ** -0.5
    weights = [enc_w[n] for n in _ENC_W]
    return pl.pallas_call(
        functools.partial(_encoder_stack_kernel, nhead=nhead, scale=scale),
        grid=(B, nl),
        in_specs=([pl.BlockSpec((1, Ls, D), lambda b, l: (b, 0, 0)),
                   pl.BlockSpec((1, 1, Ls), lambda b, l: (b, 0, 0))]
                  + [_layer_spec(w) for w in weights]
                  + [_const_spec(final_ln['g']), _const_spec(final_ln['b'])]),
        out_specs=pl.BlockSpec((1, Ls, D), lambda b, l: (b, 0, 0)),
        out_shape=jax.ShapeDtypeStruct((B, Ls, D), jnp.bfloat16),
        scratch_shapes=[pltpu.VMEM((Ls, D), jnp.float32)],
        compiler_params=_cparams("parallel", "arbitrary"),
    )(x, kpm, *weights, final_ln['g'], final_ln['b'])


def pallas_decoder_stack(x, mem, tkpm, mkpm, dec_w, final_ln, nhead):
    B, Lt, D = x.shape
    Ls = mem.shape[1]
    nl = dec_w['sa_wqkv'].shape[0]
    scale = float(D // nhead) ** -0.5
    weights = [dec_w[n] for n in _DEC_W]
    return pl.pallas_call(
        functools.partial(_decoder_stack_kernel, nhead=nhead, scale=scale),
        grid=(B, nl),
        in_specs=([pl.BlockSpec((1, Lt, D), lambda b, l: (b, 0, 0)),
                   pl.BlockSpec((1, Ls, D), lambda b, l: (b, 0, 0)),
                   pl.BlockSpec((1, 1, Lt), lambda b, l: (b, 0, 0)),
                   pl.BlockSpec((1, 1, Ls), lambda b, l: (b, 0, 0))]
                  + [_layer_spec(w) for w in weights]
                  + [_const_spec(final_ln['g']), _const_spec(final_ln['b'])]),
        out_specs=pl.BlockSpec((1, Lt, D), lambda b, l: (b, 0, 0)),
        out_shape=jax.ShapeDtypeStruct((B, Lt, D), jnp.bfloat16),
        scratch_shapes=[pltpu.VMEM((Lt, D), jnp.float32)],
        compiler_params=_cparams("parallel", "arbitrary"),
    )(x, mem, tkpm, mkpm, *weights, final_ln['g'], final_ln['b'])


def pallas_vocab_proj(x2d, w_pad, b_pad):
    M, D = x2d.shape
    Vp = w_pad.shape[1]
    tm = _row_tile(M)
    tn = 256 if Vp % 256 == 0 else (128 if Vp % 128 == 0 else Vp)
    return pl.pallas_call(
        _proj_kernel,
        grid=(M // tm, Vp // tn),
        in_specs=[pl.BlockSpec((tm, D), lambda i, j: (i, 0)),
                  pl.BlockSpec((D, tn), lambda i, j: (0, j)),
                  pl.BlockSpec((1, tn), lambda i, j: (0, j))],
        out_specs=pl.BlockSpec((tm, tn), lambda i, j: (i, j)),
        out_shape=jax.ShapeDtypeStruct((M, Vp), jnp.float32),
        compiler_params=_cparams("parallel", "parallel"),
    )(x2d, w_pad, b_pad)


# ----------------------------- model forward -------------------------------

@functools.partial(jax.jit, static_argnames=("d_model", "nhead", "pad_idx", "vocab_trg"))
def transformer_forward(params, en_input, de_input, *, d_model, nhead, pad_idx, vocab_trg):
    B, Ls = en_input.shape
    _, Lt = de_input.shape
    sqrt_d = math.sqrt(d_model)

    # embedding gather + scale + PositionalEncoding in XLA (pure glue; PE is
    # indexed by the batch dim, exactly like the reference which applies the
    # seq-first PE module to batch-first tensors).  Requires B <= max_len.
    pe_b = params['pe'][:B]                                      # [B, 1, D]
    x_en = params['src_embedding'][en_input] * sqrt_d + pe_b     # [B, Ls, D] f32
    x_de = params['trg_embedding'][de_input] * sqrt_d + pe_b     # [B, Lt, D] f32
    # TODO(synk): dropout (PositionalEncoding and transformer layers) treated as identity.

    # tiny additive key-padding masks [B, 1, L] (0 / -1e30); the causal mask is
    # built inside the decoder kernel and folded into the same bias.
    src_kpm = jnp.where(en_input == pad_idx, NEG, 0.0).astype(jnp.float32)[:, None, :]
    tgt_kpm = jnp.where(de_input == pad_idx, NEG, 0.0).astype(jnp.float32)[:, None, :]

    # one pallas_call per stack; activations stay in VMEM across all layers
    mem = pallas_encoder_stack(x_en, src_kpm, params['enc'], params['enc_norm'], nhead)
    out = pallas_decoder_stack(x_de, mem, tgt_kpm, src_kpm, params['dec'],
                               params['dec_norm'], nhead)        # [B, Lt, D] bf16

    # lane/MXU-dense vocab projection (V padded to a multiple of 256)
    logits = pallas_vocab_proj(out.reshape(B * Lt, d_model),
                               params['proj_w'], params['proj_b'])
    return logits[:, :vocab_trg].reshape(B, Lt, vocab_trg)        # [B, Lt, V]


# ----------------------------- parameter init -------------------------------

def make_positional_encoding(max_len, d_model):
    position = jnp.arange(max_len, dtype=jnp.float32)[:, None]
    div_term = jnp.exp(jnp.arange(0, d_model, 2, dtype=jnp.float32)
                       * (-math.log(10000.0) / d_model))
    pe = jnp.zeros((max_len, d_model), jnp.float32)
    pe = pe.at[:, 0::2].set(jnp.sin(position * div_term))
    pe = pe.at[:, 1::2].set(jnp.cos(position * div_term))
    return pe[:, None, :]  # [max_len, 1, d_model]


def init_params(key, d_model, nhead, nlayers, dim_ff, vocab_src, vocab_trg, max_len=64):
    keys = iter(jax.random.split(key, 4096))
    D, F, nl = d_model, dim_ff, nlayers

    def nrm(shape, std=0.02, dtype=jnp.float32):
        return (std * jax.random.normal(next(keys), shape, jnp.float32)).astype(dtype)

    def stack(make):
        return jnp.stack([make() for _ in range(nl)])

    ones = lambda: jnp.ones((1, D), jnp.float32)
    zeros = lambda: jnp.zeros((1, D), jnp.float32)

    # per-layer weights stacked along a leading layer axis (MXU-ready [K, N])
    enc = dict(
        wqkv=stack(lambda: nrm((D, 3 * D), dtype=jnp.bfloat16)),
        bqkv=stack(lambda: nrm((1, 3 * D))),
        wo=stack(lambda: nrm((D, D), dtype=jnp.bfloat16)),
        bo=stack(lambda: nrm((1, D))),
        ln1_g=stack(ones), ln1_b=stack(zeros),
        w1=stack(lambda: nrm((D, F), dtype=jnp.bfloat16)),
        b1=stack(lambda: nrm((1, F))),
        w2=stack(lambda: nrm((F, D), dtype=jnp.bfloat16)),
        b2=stack(lambda: nrm((1, D))),
        ln2_g=stack(ones), ln2_b=stack(zeros),
    )
    dec = dict(
        sa_wqkv=stack(lambda: nrm((D, 3 * D), dtype=jnp.bfloat16)),
        sa_bqkv=stack(lambda: nrm((1, 3 * D))),
        sa_wo=stack(lambda: nrm((D, D), dtype=jnp.bfloat16)),
        sa_bo=stack(lambda: nrm((1, D))),
        ln1_g=stack(ones), ln1_b=stack(zeros),
        ca_wq=stack(lambda: nrm((D, D), dtype=jnp.bfloat16)),
        ca_bq=stack(lambda: nrm((1, D))),
        ca_wkv=stack(lambda: nrm((D, 2 * D), dtype=jnp.bfloat16)),
        ca_bkv=stack(lambda: nrm((1, 2 * D))),
        ca_wo=stack(lambda: nrm((D, D), dtype=jnp.bfloat16)),
        ca_bo=stack(lambda: nrm((1, D))),
        ln2_g=stack(ones), ln2_b=stack(zeros),
        w1=stack(lambda: nrm((D, F), dtype=jnp.bfloat16)),
        b1=stack(lambda: nrm((1, F))),
        w2=stack(lambda: nrm((F, D), dtype=jnp.bfloat16)),
        b2=stack(lambda: nrm((1, D))),
        ln3_g=stack(ones), ln3_b=stack(zeros),
    )

    def ln():
        return dict(g=jnp.ones((1, D), jnp.float32), b=jnp.zeros((1, D), jnp.float32))

    # vocab projection padded to a lane/MXU-dense multiple of 256
    Vp = ((vocab_trg + 255) // 256) * 256
    proj_w = jnp.zeros((D, Vp), jnp.bfloat16).at[:, :vocab_trg].set(
        nrm((D, vocab_trg), dtype=jnp.bfloat16))
    proj_b = jnp.zeros((1, Vp), jnp.float32).at[:, :vocab_trg].set(nrm((1, vocab_trg)))

    return dict(
        src_embedding=nrm((vocab_src, D), std=1.0),
        trg_embedding=nrm((vocab_trg, D), std=1.0),
        pe=make_positional_encoding(max_len, D),
        enc=enc, dec=dec, enc_norm=ln(), dec_norm=ln(),
        proj_w=proj_w, proj_b=proj_b,
    )


# ---------------------------------- main -------------------------------------

if __name__ == "__main__":
    B, LS, LT = 2, 8, 8
    D_MODEL, NHEAD, NLAYERS = 32, 4, 2
    V_SRC, V_TRG = 40, 48
    PAD = 0
    DIM_FF = D_MODEL   # dim_feedforward == embedding_dim in the reference module

    root = jax.random.PRNGKey(0)
    k_params, k_en, k_de = jax.random.split(root, 3)

    params = init_params(k_params, D_MODEL, NHEAD, NLAYERS, DIM_FF, V_SRC, V_TRG)

    en_input = jax.random.randint(k_en, (B, LS), 1, V_SRC, dtype=jnp.int32)
    de_input = jax.random.randint(k_de, (B, LT), 1, V_TRG, dtype=jnp.int32)
    # introduce some padding tokens to exercise the key-padding masks
    en_input = en_input.at[:, -1].set(PAD)
    de_input = de_input.at[:, -1].set(PAD)

    logits = transformer_forward(params, en_input, de_input,
                                 d_model=D_MODEL, nhead=NHEAD,
                                 pad_idx=PAD, vocab_trg=V_TRG)
    logits = jax.block_until_ready(logits)

    assert logits.shape == (B, LT, V_TRG), logits.shape
    assert bool(jnp.all(jnp.isfinite(logits)))
    print("KERNEL_OK")
</pallas_src>

<mosaic_0001>
module attributes {stable_mosaic.version = 11 : i64} {
  func.func @_proj_kernel(%arg0: i32, %arg1: i32, %arg2: memref<8x32xbf16, #tpu.memory_space<vmem>>, %arg3: memref<32x256xbf16, #tpu.memory_space<vmem>>, %arg4: memref<1x256xf32, #tpu.memory_space<vmem>>, %arg5: memref<8x256xf32, #tpu.memory_space<vmem>>) attributes {dimension_semantics = [#tpu.dimension_semantics<parallel>, #tpu.dimension_semantics<parallel>], iteration_bounds = array<i64: 2, 1>, scalar_prefetch = 0 : i64, scratch_operands = 0 : i64, tpu.core_type = #tpu.core_type<tc>, window_params = [{transform_indices = @transform_0, window_bounds = array<i64: 8, 32>}, {transform_indices = @transform_1, window_bounds = array<i64: 32, 256>}, {transform_indices = @transform_2, window_bounds = array<i64: 1, 256>}, {transform_indices = @transform_3, window_bounds = array<i64: 8, 256>}]} {
    %c0 = arith.constant 0 : index
    %c0_0 = arith.constant 0 : index
    %0 = vector.load %arg2[%c0, %c0_0] : memref<8x32xbf16, #tpu.memory_space<vmem>>, vector<8x32xbf16>
    %c0_1 = arith.constant 0 : index
    %c0_2 = arith.constant 0 : index
    %1 = vector.load %arg3[%c0_1, %c0_2] : memref<32x256xbf16, #tpu.memory_space<vmem>>, vector<32x256xbf16>
    %cst = arith.constant dense<0.000000e+00> : vector<8x256xf32>
    %2 = tpu.matmul %0, %1, %cst {dimension_numbers = #tpu.dot_dimension_numbers<[1], [0], [0], [1], [0, 0, 1, 1], [], []>} : vector<8x32xbf16>, vector<32x256xbf16>, vector<8x256xf32> -> vector<8x256xf32>
    %c0_3 = arith.constant 0 : index
    %c0_4 = arith.constant 0 : index
    %3 = vector.load %arg4[%c0_3, %c0_4] : memref<1x256xf32, #tpu.memory_space<vmem>>, vector<1x256xf32>
    %4 = vector.broadcast %3 : vector<1x256xf32> to vector<8x256xf32>
    %5 = arith.addf %2, %4 : vector<8x256xf32>
    %c0_5 = arith.constant 0 : index
    %c0_6 = arith.constant 0 : index
    %6 = vector.load %arg5[%c0_5, %c0_6] : memref<8x256xf32, #tpu.memory_space<vmem>>, vector<8x256xf32>
    tpu.vector_store %arg5[%c0_5, %c0_6], %5 {strides = array<i32>} : memref<8x256xf32, #tpu.memory_space<vmem>>, vector<8x256xf32>,
    return
  }
  func.func @transform_0(%arg0: i32, %arg1: i32) -> (i32, i32) {
    %c0_i32 = arith.constant 0 : i32
    %c0_i32_0 = arith.constant 0 : i32
    return %arg0, %c0_i32 : i32, i32
  }
  func.func @transform_1(%arg0: i32, %arg1: i32) -> (i32, i32) {
    %c0_i32 = arith.constant 0 : i32
    %c0_i32_0 = arith.constant 0 : i32
    return %c0_i32, %arg1 : i32, i32
  }
  func.func @transform_2(%arg0: i32, %arg1: i32) -> (i32, i32) {
    %c0_i32 = arith.constant 0 : i32
    %c0_i32_0 = arith.constant 0 : i32
    return %c0_i32, %arg1 : i32, i32
  }
  func.func @transform_3(%arg0: i32, %arg1: i32) -> (i32, i32) {
    %c0_i32 = arith.constant 0 : i32
    return %arg0, %arg1 : i32, i32
  }
}

module attributes {stable_mosaic.version = 11 : i64} {
  func.func @_encoder_stack_kernel(%arg0: i32, %arg1: i32, %arg2: memref<1x8x32xf32, #tpu.memory_space<vmem>>, %arg3: memref<1x1x8xf32, #tpu.memory_space<vmem>>, %arg4: memref<1x32x96xbf16, #tpu.memory_space<vmem>>, %arg5: memref<1x1x96xf32, #tpu.memory_space<vmem>>, %arg6: memref<1x32x32xbf16, #tpu.memory_space<vmem>>, %arg7: memref<1x1x32xf32, #tpu.memory_space<vmem>>, %arg8: memref<1x1x32xf32, #tpu.memory_space<vmem>>, %arg9: memref<1x1x32xf32, #tpu.memory_space<vmem>>, %arg10: memref<1x32x32xbf16, #tpu.memory_space<vmem>>, %arg11: memref<1x1x32xf32, #tpu.memory_space<vmem>>, %arg12: memref<1x32x32xbf16, #tpu.memory_space<vmem>>, %arg13: memref<1x1x32xf32, #tpu.memory_space<vmem>>, %arg14: memref<1x1x32xf32, #tpu.memory_space<vmem>>, %arg15: memref<1x1x32xf32, #tpu.memory_space<vmem>>, %arg16: memref<1x32xf32, #tpu.memory_space<vmem>>, %arg17: memref<1x32xf32, #tpu.memory_space<vmem>>, %arg18: memref<1x8x32xbf16, #tpu.memory_space<vmem>>, %arg19: memref<8x32xf32, #tpu.memory_space<vmem>>) attributes {dimension_semantics = [#tpu.dimension_semantics<parallel>, #tpu.dimension_semantics<arbitrary>], iteration_bounds = array<i64: 2, 2>, scalar_prefetch = 0 : i64, scratch_operands = 1 : i64, tpu.core_type = #tpu.core_type<tc>, window_params = [{transform_indices = @transform_0, window_bounds = array<i64: 1, 8, 32>}, {transform_indices = @transform_1, window_bounds = array<i64: 1, 1, 8>}, {transform_indices = @transform_2, window_bounds = array<i64: 1, 32, 96>}, {transform_indices = @transform_3, window_bounds = array<i64: 1, 1, 96>}, {transform_indices = @transform_4, window_bounds = array<i64: 1, 32, 32>}, {transform_indices = @transform_5, window_bounds = array<i64: 1, 1, 32>}, {transform_indices = @transform_6, window_bounds = array<i64: 1, 1, 32>}, {transform_indices = @transform_7, window_bounds = array<i64: 1, 1, 32>}, {transform_indices = @transform_8, window_bounds = array<i64: 1, 32, 32>}, {transform_indices = @transform_9, window_bounds = array<i64: 1, 1, 32>}, {transform_indices = @transform_10, window_bounds = array<i64: 1, 32, 32>}, {transform_indices = @transform_11, window_bounds = array<i64: 1, 1, 32>}, {transform_indices = @transform_12, window_bounds = array<i64: 1, 1, 32>}, {transform_indices = @transform_13, window_bounds = array<i64: 1, 1, 32>}, {pipeline_mode = #tpu.pipeline_mode<synchronous>, transform_indices = @transform_14, window_bounds = array<i64: 1, 32>}, {pipeline_mode = #tpu.pipeline_mode<synchronous>, transform_indices = @transform_15, window_bounds = array<i64: 1, 32>}, {transform_indices = @transform_16, window_bounds = array<i64: 1, 8, 32>}]} {
    %c0_i32 = arith.constant 0 : i32
    %0 = arith.cmpi eq, %arg1, %c0_i32 : i32
    %1 = arith.extui %0 : i1 to i32
    %c0_i32_0 = arith.constant 0 : i32
    %2 = arith.cmpi ne, %1, %c0_i32_0 : i32
    scf.if %2 {
      %c0_78 = arith.constant 0 : index
      %c0_79 = arith.constant 0 : index
      %c0_80 = arith.constant 0 : index
      %194 = vector.load %arg2[%c0_78, %c0_79, %c0_80] : memref<1x8x32xf32, #tpu.memory_space<vmem>>, vector<1x8x32xf32>
      %195 = vector.shape_cast %194 : vector<1x8x32xf32> to vector<8x32xf32>
      %c0_81 = arith.constant 0 : index
      %c0_82 = arith.constant 0 : index
      %196 = vector.load %arg19[%c0_81, %c0_82] : memref<8x32xf32, #tpu.memory_space<vmem>>, vector<8x32xf32>
      tpu.vector_store %arg19[%c0_81, %c0_82], %195 {strides = array<i32>} : memref<8x32xf32, #tpu.memory_space<vmem>>, vector<8x32xf32>,
    } else {
    }
    %c0 = arith.constant 0 : index
    %c0_1 = arith.constant 0 : index
    %3 = vector.load %arg19[%c0, %c0_1] : memref<8x32xf32, #tpu.memory_space<vmem>>, vector<8x32xf32>
    %c0_2 = arith.constant 0 : index
    %c0_3 = arith.constant 0 : index
    %c0_4 = arith.constant 0 : index
    %4 = vector.load %arg3[%c0_2, %c0_3, %c0_4] : memref<1x1x8xf32, #tpu.memory_space<vmem>>, vector<1x1x8xf32>
    %5 = vector.shape_cast %4 : vector<1x1x8xf32> to vector<1x8xf32>
    %6 = arith.truncf %3 : vector<8x32xf32> to vector<8x32xbf16>
    %c0_5 = arith.constant 0 : index
    %c0_6 = arith.constant 0 : index
    %c0_7 = arith.constant 0 : index
    %7 = vector.load %arg4[%c0_5, %c0_6, %c0_7] : memref<1x32x96xbf16, #tpu.memory_space<vmem>>, vector<1x32x96xbf16>
    %8 = vector.shape_cast %7 : vector<1x32x96xbf16> to vector<32x96xbf16>
    %cst = arith.constant dense<0.000000e+00> : vector<8x96xf32>
    %9 = tpu.matmul %6, %8, %cst {dimension_numbers = #tpu.dot_dimension_numbers<[1], [0], [0], [1], [0, 0, 1, 1], [], []>} : vector<8x32xbf16>, vector<32x96xbf16>, vector<8x96xf32> -> vector<8x96xf32>
    %c0_8 = arith.constant 0 : index
    %c0_9 = arith.constant 0 : index
    %c0_10 = arith.constant 0 : index
    %10 = vector.load %arg5[%c0_8, %c0_9, %c0_10] : memref<1x1x96xf32, #tpu.memory_space<vmem>>, vector<1x1x96xf32>
    %11 = vector.shape_cast %10 : vector<1x1x96xf32> to vector<1x96xf32>
    %12 = vector.broadcast %11 : vector<1x96xf32> to vector<8x96xf32>
    %13 = arith.addf %9, %12 : vector<8x96xf32>
    %14 = vector.extract_strided_slice %13 {offsets = [0, 0], sizes = [8, 32], strides = [1, 1]} : vector<8x96xf32> to vector<8x32xf32>
    %15 = vector.extract_strided_slice %13 {offsets = [0, 32], sizes = [8, 32], strides = [1, 1]} : vector<8x96xf32> to vector<8x32xf32>
    %16 = vector.extract_strided_slice %13 {offsets = [0, 64], sizes = [8, 32], strides = [1, 1]} : vector<8x96xf32> to vector<8x32xf32>
    %c0_11 = arith.constant 0 : index
    %c0_12 = arith.constant 0 : index
    %c0_13 = arith.constant 0 : index
    %17 = vector.load %arg6[%c0_11, %c0_12, %c0_13] : memref<1x32x32xbf16, #tpu.memory_space<vmem>>, vector<1x32x32xbf16>
    %18 = vector.shape_cast %17 : vector<1x32x32xbf16> to vector<32x32xbf16>
    %c0_14 = arith.constant 0 : index
    %c0_15 = arith.constant 0 : index
    %c0_16 = arith.constant 0 : index
    %19 = vector.load %arg7[%c0_14, %c0_15, %c0_16] : memref<1x1x32xf32, #tpu.memory_space<vmem>>, vector<1x1x32xf32>
    %20 = vector.shape_cast %19 : vector<1x1x32xf32> to vector<1x32xf32>
    %21 = vector.extract_strided_slice %14 {offsets = [0, 0], sizes = [8, 8], strides = [1, 1]} : vector<8x32xf32> to vector<8x8xf32>
    %22 = arith.truncf %21 : vector<8x8xf32> to vector<8x8xbf16>
    %23 = vector.extract_strided_slice %15 {offsets = [0, 0], sizes = [8, 8], strides = [1, 1]} : vector<8x32xf32> to vector<8x8xf32>
    %24 = arith.truncf %23 : vector<8x8xf32> to vector<8x8xbf16>
    %25 = vector.extract_strided_slice %16 {offsets = [0, 0], sizes = [8, 8], strides = [1, 1]} : vector<8x32xf32> to vector<8x8xf32>
    %26 = arith.truncf %25 : vector<8x8xf32> to vector<8x8xbf16>
    %cst_17 = arith.constant dense<0.000000e+00> : vector<8x8xf32>
    %27 = tpu.matmul %22, %24, %cst_17 {dimension_numbers = #tpu.dot_dimension_numbers<[1], [1], [0], [0], [0, 0, 1, 0], [], []>} : vector<8x8xbf16>, vector<8x8xbf16>, vector<8x8xf32> -> vector<8x8xf32>
    %cst_18 = arith.constant 0.353553385 : f32
    %28 = vector.broadcast %cst_18 : f32 to vector<8x8xf32>
    %29 = arith.mulf %27, %28 : vector<8x8xf32>
    %30 = vector.broadcast %5 : vector<1x8xf32> to vector<8x8xf32>
    %31 = arith.addf %29, %30 : vector<8x8xf32>
    %cst_19 = arith.constant dense<0xFF800000> : vector<8xf32>
    %32 = vector.multi_reduction <maximumf>, %31, %cst_19 [1] : vector<8x8xf32> to vector<8xf32>
    %33 = vector.shape_cast %32 : vector<8xf32> to vector<8x1xf32>
    %34 = vector.broadcast %33 : vector<8x1xf32> to vector<8x8xf32>
    %35 = arith.subf %31, %34 : vector<8x8xf32>
    %36 = math.exp %35 : vector<8x8xf32>
    %cst_20 = arith.constant dense<0.000000e+00> : vector<8xf32>
    %37 = vector.multi_reduction <add>, %36, %cst_20 [1] : vector<8x8xf32> to vector<8xf32>
    %38 = vector.shape_cast %37 : vector<8xf32> to vector<8x1xf32>
    %39 = tpu.reciprocal %38 {approx = true} : vector<8x1xf32> -> vector<8x1xf32>
    %40 = vector.broadcast %39 : vector<8x1xf32> to vector<8x8xf32>
    %41 = arith.mulf %36, %40 : vector<8x8xf32>
    %42 = arith.truncf %41 : vector<8x8xf32> to vector<8x8xbf16>
    %cst_21 = arith.constant dense<0.000000e+00> : vector<8x8xf32>
    %43 = tpu.matmul %42, %26, %cst_21 {dimension_numbers = #tpu.dot_dimension_numbers<[1], [0], [0], [1], [0, 0, 1, 1], [], []>} : vector<8x8xbf16>, vector<8x8xbf16>, vector<8x8xf32> -> vector<8x8xf32>
    %44 = vector.extract_strided_slice %14 {offsets = [0, 8], sizes = [8, 8], strides = [1, 1]} : vector<8x32xf32> to vector<8x8xf32>
    %45 = arith.truncf %44 : vector<8x8xf32> to vector<8x8xbf16>
    %46 = vector.extract_strided_slice %15 {offsets = [0, 8], sizes = [8, 8], strides = [1, 1]} : vector<8x32xf32> to vector<8x8xf32>
    %47 = arith.truncf %46 : vector<8x8xf32> to vector<8x8xbf16>
    %48 = vector.extract_strided_slice %16 {offsets = [0, 8], sizes = [8, 8], strides = [1, 1]} : vector<8x32xf32> to vector<8x8xf32>
    %49 = arith.truncf %48 : vector<8x8xf32> to vector<8x8xbf16>
    %cst_22 = arith.constant dense<0.000000e+00> : vector<8x8xf32>
    %50 = tpu.matmul %45, %47, %cst_22 {dimension_numbers = #tpu.dot_dimension_numbers<[1], [1], [0], [0], [0, 0, 1, 0], [], []>} : vector<8x8xbf16>, vector<8x8xbf16>, vector<8x8xf32> -> vector<8x8xf32>
    %cst_23 = arith.constant 0.353553385 : f32
    %51 = vector.broadcast %cst_23 : f32 to vector<8x8xf32>
    %52 = arith.mulf %50, %51 : vector<8x8xf32>
    %53 = vector.broadcast %5 : vector<1x8xf32> to vector<8x8xf32>
    %54 = arith.addf %52, %53 : vector<8x8xf32>
    %cst_24 = arith.constant dense<0xFF800000> : vector<8xf32>
    %55 = vector.multi_reduction <maximumf>, %54, %cst_24 [1] : vector<8x8xf32> to vector<8xf32>
    %56 = vector.shape_cast %55 : vector<8xf32> to vector<8x1xf32>
    %57 = vector.broadcast %56 : vector<8x1xf32> to vector<8x8xf32>
    %58 = arith.subf %54, %57 : vector<8x8xf32>
    %59 = math.exp %58 : vector<8x8xf32>
    %cst_25 = arith.constant dense<0.000000e+00> : vector<8xf32>
    %60 = vector.multi_reduction <add>, %59, %cst_25 [1] : vector<8x8xf32> to vector<8xf32>
    %61 = vector.shape_cast %60 : vector<8xf32> to vector<8x1xf32>
    %62 = tpu.reciprocal %61 {approx = true} : vector<8x1xf32> -> vector<8x1xf32>
    %63 = vector.broadcast %62 : vector<8x1xf32> to vector<8x8xf32>
    %64 = arith.mulf %59, %63 : vector<8x8xf32>
    %65 = arith.truncf %64 : vector<8x8xf32> to vector<8x8xbf16>
    %cst_26 = arith.constant dense<0.000000e+00> : vector<8x8xf32>
    %66 = tpu.matmul %65, %49, %cst_26 {dimension_numbers = #tpu.dot_dimension_numbers<[1], [0], [0], [1], [0, 0, 1, 1], [], []>} : vector<8x8xbf16>, vector<8x8xbf16>, vector<8x8xf32> -> vector<8x8xf32>
    %67 = vector.extract_strided_slice %14 {offsets = [0, 16], sizes = [8, 8], strides = [1, 1]} : vector<8x32xf32> to vector<8x8xf32>
    %68 = arith.truncf %67 : vector<8x8xf32> to vector<8x8xbf16>
    %69 = vector.extract_strided_slice %15 {offsets = [0, 16], sizes = [8, 8], strides = [1, 1]} : vector<8x32xf32> to vector<8x8xf32>
    %70 = arith.truncf %69 : vector<8x8xf32> to vector<8x8xbf16>
    %71 = vector.extract_strided_slice %16 {offsets = [0, 16], sizes = [8, 8], strides = [1, 1]} : vector<8x32xf32> to vector<8x8xf32>
    %72 = arith.truncf %71 : vector<8x8xf32> to vector<8x8xbf16>
    %cst_27 = arith.constant dense<0.000000e+00> : vector<8x8xf32>
    %73 = tpu.matmul %68, %70, %cst_27 {dimension_numbers = #tpu.dot_dimension_numbers<[1], [1], [0], [0], [0, 0, 1, 0], [], []>} : vector<8x8xbf16>, vector<8x8xbf16>, vector<8x8xf32> -> vector<8x8xf32>
    %cst_28 = arith.constant 0.353553385 : f32
    %74 = vector.broadcast %cst_28 : f32 to vector<8x8xf32>
    %75 = arith.mulf %73, %74 : vector<8x8xf32>
    %76 = vector.broadcast %5 : vector<1x8xf32> to vector<8x8xf32>
    %77 = arith.addf %75, %76 : vector<8x8xf32>
    %cst_29 = arith.constant dense<0xFF800000> : vector<8xf32>
    %78 = vector.multi_reduction <maximumf>, %77, %cst_29 [1] : vector<8x8xf32> to vector<8xf32>
    %79 = vector.shape_cast %78 : vector<8xf32> to vector<8x1xf32>
    %80 = vector.broadcast %79 : vector<8x1xf32> to vector<8x8xf32>
    %81 = arith.subf %77, %80 : vector<8x8xf32>
    %82 = math.exp %81 : vector<8x8xf32>
    %cst_30 = arith.constant dense<0.000000e+00> : vector<8xf32>
    %83 = vector.multi_reduction <add>, %82, %cst_30 [1] : vector<8x8xf32> to vector<8xf32>
    %84 = vector.shape_cast %83 : vector<8xf32> to vector<8x1xf32>
    %85 = tpu.reciprocal %84 {approx = true} : vector<8x1xf32> -> vector<8x1xf32>
    %86 = vector.broadcast %85 : vector<8x1xf32> to vector<8x8xf32>
    %87 = arith.mulf %82, %86 : vector<8x8xf32>
    %88 = arith.truncf %87 : vector<8x8xf32> to vector<8x8xbf16>
    %cst_31 = arith.constant dense<0.000000e+00> : vector<8x8xf32>
    %89 = tpu.matmul %88, %72, %cst_31 {dimension_numbers = #tpu.dot_dimension_numbers<[1], [0], [0], [1], [0, 0, 1, 1], [], []>} : vector<8x8xbf16>, vector<8x8xbf16>, vector<8x8xf32> -> vector<8x8xf32>
    %90 = vector.extract_strided_slice %14 {offsets = [0, 24], sizes = [8, 8], strides = [1, 1]} : vector<8x32xf32> to vector<8x8xf32>
    %91 = arith.truncf %90 : vector<8x8xf32> to vector<8x8xbf16>
    %92 = vector.extract_strided_slice %15 {offsets = [0, 24], sizes = [8, 8], strides = [1, 1]} : vector<8x32xf32> to vector<8x8xf32>
    %93 = arith.truncf %92 : vector<8x8xf32> to vector<8x8xbf16>
    %94 = vector.extract_strided_slice %16 {offsets = [0, 24], sizes = [8, 8], strides = [1, 1]} : vector<8x32xf32> to vector<8x8xf32>
    %95 = arith.truncf %94 : vector<8x8xf32> to vector<8x8xbf16>
    %cst_32 = arith.constant dense<0.000000e+00> : vector<8x8xf32>
    %96 = tpu.matmul %91, %93, %cst_32 {dimension_numbers = #tpu.dot_dimension_numbers<[1], [1], [0], [0], [0, 0, 1, 0], [], []>} : vector<8x8xbf16>, vector<8x8xbf16>, vector<8x8xf32> -> vector<8x8xf32>
    %cst_33 = arith.constant 0.353553385 : f32
    %97 = vector.broadcast %cst_33 : f32 to vector<8x8xf32>
    %98 = arith.mulf %96, %97 : vector<8x8xf32>
    %99 = vector.broadcast %5 : vector<1x8xf32> to vector<8x8xf32>
    %100 = arith.addf %98, %99 : vector<8x8xf32>
    %cst_34 = arith.constant dense<0xFF800000> : vector<8xf32>
    %101 = vector.multi_reduction <maximumf>, %100, %cst_34 [1] : vector<8x8xf32> to vector<8xf32>
    %102 = vector.shape_cast %101 : vector<8xf32> to vector<8x1xf32>
    %103 = vector.broadcast %102 : vector<8x1xf32> to vector<8x8xf32>
    %104 = arith.subf %100, %103 : vector<8x8xf32>
    %105 = math.exp %104 : vector<8x8xf32>
    %cst_35 = arith.constant dense<0.000000e+00> : vector<8xf32>
    %106 = vector.multi_reduction <add>, %105, %cst_35 [1] : vector<8x8xf32> to vector<8xf32>
    %107 = vector.shape_cast %106 : vector<8xf32> to vector<8x1xf32>
    %108 = tpu.reciprocal %107 {approx = true} : vector<8x1xf32> -> vector<8x1xf32>
    %109 = vector.broadcast %108 : vector<8x1xf32> to vector<8x8xf32>
    %110 = arith.mulf %105, %109 : vector<8x8xf32>
    %111 = arith.truncf %110 : vector<8x8xf32> to vector<8x8xbf16>
    %cst_36 = arith.constant dense<0.000000e+00> : vector<8x8xf32>
    %112 = tpu.matmul %111, %95, %cst_36 {dimension_numbers = #tpu.dot_dimension_numbers<[1], [0], [0], [1], [0, 0, 1, 1], [], []>} : vector<8x8xbf16>, vector<8x8xbf16>, vector<8x8xf32> -> vector<8x8xf32>
    %113 = tpu.concatenate %43, %66, %89, %112 in 1 : vector<8x8xf32>, vector<8x8xf32>, vector<8x8xf32>, vector<8x8xf32> -> vector<8x32xf32>
    %114 = arith.truncf %113 : vector<8x32xf32> to vector<8x32xbf16>
    %cst_37 = arith.constant dense<0.000000e+00> : vector<8x32xf32>
    %115 = tpu.matmul %114, %18, %cst_37 {dimension_numbers = #tpu.dot_dimension_numbers<[1], [0], [0], [1], [0, 0, 1, 1], [], []>} : vector<8x32xbf16>, vector<32x32xbf16>, vector<8x32xf32> -> vector<8x32xf32>
    %116 = vector.broadcast %20 : vector<1x32xf32> to vector<8x32xf32>
    %117 = arith.addf %115, %116 : vector<8x32xf32>
    %118 = arith.addf %3, %117 : vector<8x32xf32>
    %c0_38 = arith.constant 0 : index
    %c0_39 = arith.constant 0 : index
    %c0_40 = arith.constant 0 : index
    %119 = vector.load %arg8[%c0_38, %c0_39, %c0_40] : memref<1x1x32xf32, #tpu.memory_space<vmem>>, vector<1x1x32xf32>
    %120 = vector.shape_cast %119 : vector<1x1x32xf32> to vector<1x32xf32>
    %c0_41 = arith.constant 0 : index
    %c0_42 = arith.constant 0 : index
    %c0_43 = arith.constant 0 : index
    %121 = vector.load %arg9[%c0_41, %c0_42, %c0_43] : memref<1x1x32xf32, #tpu.memory_space<vmem>>, vector<1x1x32xf32>
    %122 = vector.shape_cast %121 : vector<1x1x32xf32> to vector<1x32xf32>
    %cst_44 = arith.constant dense<0.000000e+00> : vector<8xf32>
    %123 = vector.multi_reduction <add>, %118, %cst_44 [1] : vector<8x32xf32> to vector<8xf32>
    %124 = vector.shape_cast %123 : vector<8xf32> to vector<8x1xf32>
    %cst_45 = arith.constant 3.200000e+01 : f32
    %125 = vector.broadcast %cst_45 : f32 to vector<8x1xf32>
    %126 = arith.divf %124, %125 : vector<8x1xf32>
    %127 = vector.broadcast %126 : vector<8x1xf32> to vector<8x32xf32>
    %128 = arith.subf %118, %127 : vector<8x32xf32>
    %129 = arith.mulf %128, %128 : vector<8x32xf32>
    %cst_46 = arith.constant dense<0.000000e+00> : vector<8xf32>
    %130 = vector.multi_reduction <add>, %129, %cst_46 [1] : vector<8x32xf32> to vector<8xf32>
    %131 = vector.shape_cast %130 : vector<8xf32> to vector<8x1xf32>
    %cst_47 = arith.constant 3.200000e+01 : f32
    %132 = vector.broadcast %cst_47 : f32 to vector<8x1xf32>
    %133 = arith.divf %131, %132 : vector<8x1xf32>
    %134 = vector.broadcast %126 : vector<8x1xf32> to vector<8x32xf32>
    %135 = arith.subf %118, %134 : vector<8x32xf32>
    %cst_48 = arith.constant 9.99999974E-6 : f32
    %136 = vector.broadcast %cst_48 : f32 to vector<8x1xf32>
    %137 = arith.addf %133, %136 : vector<8x1xf32>
    %138 = math.rsqrt %137 : vector<8x1xf32>
    %139 = vector.broadcast %138 : vector<8x1xf32> to vector<8x32xf32>
    %140 = arith.mulf %135, %139 : vector<8x32xf32>
    %141 = vector.broadcast %120 : vector<1x32xf32> to vector<8x32xf32>
    %142 = arith.mulf %140, %141 : vector<8x32xf32>
    %143 = vector.broadcast %122 : vector<1x32xf32> to vector<8x32xf32>
    %144 = arith.addf %142, %143 : vector<8x32xf32>
    %145 = arith.truncf %144 : vector<8x32xf32> to vector<8x32xbf16>
    %c0_49 = arith.constant 0 : index
    %c0_50 = arith.constant 0 : index
    %c0_51 = arith.constant 0 : index
    %146 = vector.load %arg10[%c0_49, %c0_50, %c0_51] : memref<1x32x32xbf16, #tpu.memory_space<vmem>>, vector<1x32x32xbf16>
    %147 = vector.shape_cast %146 : vector<1x32x32xbf16> to vector<32x32xbf16>
    %cst_52 = arith.constant dense<0.000000e+00> : vector<8x32xf32>
    %148 = tpu.matmul %145, %147, %cst_52 {dimension_numbers = #tpu.dot_dimension_numbers<[1], [0], [0], [1], [0, 0, 1, 1], [], []>} : vector<8x32xbf16>, vector<32x32xbf16>, vector<8x32xf32> -> vector<8x32xf32>
    %c0_53 = arith.constant 0 : index
    %c0_54 = arith.constant 0 : index
    %c0_55 = arith.constant 0 : index
    %149 = vector.load %arg11[%c0_53, %c0_54, %c0_55] : memref<1x1x32xf32, #tpu.memory_space<vmem>>, vector<1x1x32xf32>
    %150 = vector.shape_cast %149 : vector<1x1x32xf32> to vector<1x32xf32>
    %151 = vector.broadcast %150 : vector<1x32xf32> to vector<8x32xf32>
    %152 = arith.addf %148, %151 : vector<8x32xf32>
    %cst_56 = arith.constant 0.000000e+00 : f32
    %153 = vector.broadcast %cst_56 : f32 to vector<8x32xf32>
    %154 = arith.maximumf %152, %153 : vector<8x32xf32>
    %155 = arith.truncf %154 : vector<8x32xf32> to vector<8x32xbf16>
    %c0_57 = arith.constant 0 : index
    %c0_58 = arith.constant 0 : index
    %c0_59 = arith.constant 0 : index
    %156 = vector.load %arg12[%c0_57, %c0_58, %c0_59] : memref<1x32x32xbf16, #tpu.memory_space<vmem>>, vector<1x32x32xbf16>
    %157 = vector.shape_cast %156 : vector<1x32x32xbf16> to vector<32x32xbf16>
    %cst_60 = arith.constant dense<0.000000e+00> : vector<8x32xf32>
    %158 = tpu.matmul %155, %157, %cst_60 {dimension_numbers = #tpu.dot_dimension_numbers<[1], [0], [0], [1], [0, 0, 1, 1], [], []>} : vector<8x32xbf16>, vector<32x32xbf16>, vector<8x32xf32> -> vector<8x32xf32>
    %c0_61 = arith.constant 0 : index
    %c0_62 = arith.constant 0 : index
    %c0_63 = arith.constant 0 : index
    %159 = vector.load %arg13[%c0_61, %c0_62, %c0_63] : memref<1x1x32xf32, #tpu.memory_space<vmem>>, vector<1x1x32xf32>
    %160 = vector.shape_cast %159 : vector<1x1x32xf32> to vector<1x32xf32>
    %161 = vector.broadcast %160 : vector<1x32xf32> to vector<8x32xf32>
    %162 = arith.addf %158, %161 : vector<8x32xf32>
    %163 = arith.addf %144, %162 : vector<8x32xf32>
    %c0_64 = arith.constant 0 : index
    %c0_65 = arith.constant 0 : index
    %c0_66 = arith.constant 0 : index
    %164 = vector.load %arg14[%c0_64, %c0_65, %c0_66] : memref<1x1x32xf32, #tpu.memory_space<vmem>>, vector<1x1x32xf32>
    %165 = vector.shape_cast %164 : vector<1x1x32xf32> to vector<1x32xf32>
    %c0_67 = arith.constant 0 : index
    %c0_68 = arith.constant 0 : index
    %c0_69 = arith.constant 0 : index
    %166 = vector.load %arg15[%c0_67, %c0_68, %c0_69] : memref<1x1x32xf32, #tpu.memory_space<vmem>>, vector<1x1x32xf32>
    %167 = vector.shape_cast %166 : vector<1x1x32xf32> to vector<1x32xf32>
    %cst_70 = arith.constant dense<0.000000e+00> : vector<8xf32>
    %168 = vector.multi_reduction <add>, %163, %cst_70 [1] : vector<8x32xf32> to vector<8xf32>
    %169 = vector.shape_cast %168 : vector<8xf32> to vector<8x1xf32>
    %cst_71 = arith.constant 3.200000e+01 : f32
    %170 = vector.broadcast %cst_71 : f32 to vector<8x1xf32>
    %171 = arith.divf %169, %170 : vector<8x1xf32>
    %172 = vector.broadcast %171 : vector<8x1xf32> to vector<8x32xf32>
    %173 = arith.subf %163, %172 : vector<8x32xf32>
    %174 = arith.mulf %173, %173 : vector<8x32xf32>
    %cst_72 = arith.constant dense<0.000000e+00> : vector<8xf32>
    %175 = vector.multi_reduction <add>, %174, %cst_72 [1] : vector<8x32xf32> to vector<8xf32>
    %176 = vector.shape_cast %175 : vector<8xf32> to vector<8x1xf32>
    %cst_73 = arith.constant 3.200000e+01 : f32
    %177 = vector.broadcast %cst_73 : f32 to vector<8x1xf32>
    %178 = arith.divf %176, %177 : vector<8x1xf32>
    %179 = vector.broadcast %171 : vector<8x1xf32> to vector<8x32xf32>
    %180 = arith.subf %163, %179 : vector<8x32xf32>
    %cst_74 = arith.constant 9.99999974E-6 : f32
    %181 = vector.broadcast %cst_74 : f32 to vector<8x1xf32>
    %182 = arith.addf %178, %181 : vector<8x1xf32>
    %183 = math.rsqrt %182 : vector<8x1xf32>
    %184 = vector.broadcast %183 : vector<8x1xf32> to vector<8x32xf32>
    %185 = arith.mulf %180, %184 : vector<8x32xf32>
    %186 = vector.broadcast %165 : vector<1x32xf32> to vector<8x32xf32>
    %187 = arith.mulf %185, %186 : vector<8x32xf32>
    %188 = vector.broadcast %167 : vector<1x32xf32> to vector<8x32xf32>
    %189 = arith.addf %187, %188 : vector<8x32xf32>
    %c0_75 = arith.constant 0 : index
    %c0_76 = arith.constant 0 : index
    %190 = vector.load %arg19[%c0_75, %c0_76] : memref<8x32xf32, #tpu.memory_space<vmem>>, vector<8x32xf32>
    tpu.vector_store %arg19[%c0_75, %c0_76], %189 {strides = array<i32>} : memref<8x32xf32, #tpu.memory_space<vmem>>, vector<8x32xf32>,
    %c1_i32 = arith.constant 1 : i32
    %191 = arith.cmpi eq, %arg1, %c1_i32 : i32
    %192 = arith.extui %191 : i1 to i32
    %c0_i32_77 = arith.constant 0 : i32
    %193 = arith.cmpi ne, %192, %c0_i32_77 : i32
    scf.if %193 {
      %c0_78 = arith.constant 0 : index
      %c0_79 = arith.constant 0 : index
      %194 = vector.load %arg16[%c0_78, %c0_79] : memref<1x32xf32, #tpu.memory_space<vmem>>, vector<1x32xf32>
      %c0_80 = arith.constant 0 : index
      %c0_81 = arith.constant 0 : index
      %195 = vector.load %arg17[%c0_80, %c0_81] : memref<1x32xf32, #tpu.memory_space<vmem>>, vector<1x32xf32>
      %cst_82 = arith.constant dense<0.000000e+00> : vector<8xf32>
      %196 = vector.multi_reduction <add>, %189, %cst_82 [1] : vector<8x32xf32> to vector<8xf32>
      %197 = vector.shape_cast %196 : vector<8xf32> to vector<8x1xf32>
      %cst_83 = arith.constant 3.200000e+01 : f32
      %198 = vector.broadcast %cst_83 : f32 to vector<8x1xf32>
      %199 = arith.divf %197, %198 : vector<8x1xf32>
      %200 = vector.broadcast %199 : vector<8x1xf32> to vector<8x32xf32>
      %201 = arith.subf %189, %200 : vector<8x32xf32>
      %202 = arith.mulf %201, %201 : vector<8x32xf32>
      %cst_84 = arith.constant dense<0.000000e+00> : vector<8xf32>
      %203 = vector.multi_reduction <add>, %202, %cst_84 [1] : vector<8x32xf32> to vector<8xf32>
      %204 = vector.shape_cast %203 : vector<8xf32> to vector<8x1xf32>
      %cst_85 = arith.constant 3.200000e+01 : f32
      %205 = vector.broadcast %cst_85 : f32 to vector<8x1xf32>
      %206 = arith.divf %204, %205 : vector<8x1xf32>
      %207 = vector.broadcast %199 : vector<8x1xf32> to vector<8x32xf32>
      %208 = arith.subf %189, %207 : vector<8x32xf32>
      %cst_86 = arith.constant 9.99999974E-6 : f32
      %209 = vector.broadcast %cst_86 : f32 to vector<8x1xf32>
      %210 = arith.addf %206, %209 : vector<8x1xf32>
      %211 = math.rsqrt %210 : vector<8x1xf32>
      %212 = vector.broadcast %211 : vector<8x1xf32> to vector<8x32xf32>
      %213 = arith.mulf %208, %212 : vector<8x32xf32>
      %214 = vector.broadcast %194 : vector<1x32xf32> to vector<8x32xf32>
      %215 = arith.mulf %213, %214 : vector<8x32xf32>
      %216 = vector.broadcast %195 : vector<1x32xf32> to vector<8x32xf32>
      %217 = arith.addf %215, %216 : vector<8x32xf32>
      %218 = arith.truncf %217 : vector<8x32xf32> to vector<8x32xbf16>
      %c0_87 = arith.constant 0 : index
      %c0_88 = arith.constant 0 : index
      %c0_89 = arith.constant 0 : index
      %219 = vector.load %arg18[%c0_87, %c0_88, %c0_89] : memref<1x8x32xbf16, #tpu.memory_space<vmem>>, vector<1x8x32xbf16>
      %220 = vector.shape_cast %219 : vector<1x8x32xbf16> to vector<8x32xbf16>
      %221 = vector.shape_cast %218 : vector<8x32xbf16> to vector<1x8x32xbf16>
      tpu.vector_store %arg18[%c0_87, %c0_88, %c0_89], %221 {strides = array<i32>} : memref<1x8x32xbf16, #tpu.memory_space<vmem>>, vector<1x8x32xbf16>,
    } else {
    }
    return
  }
  func.func @transform_0(%arg0: i32, %arg1: i32) -> (i32, i32, i32) {
    %c0_i32 = arith.constant 0 : i32
    %c0_i32_0 = arith.constant 0 : i32
    %c0_i32_1 = arith.constant 0 : i32
    return %arg0, %c0_i32, %c0_i32_0 : i32, i32, i32
  }
  func.func @transform_1(%arg0: i32, %arg1: i32) -> (i32, i32, i32) {
    %c0_i32 = arith.constant 0 : i32
    %c0_i32_0 = arith.constant 0 : i32
    %c0_i32_1 = arith.constant 0 : i32
    return %arg0, %c0_i32, %c0_i32_0 : i32, i32, i32
  }
  func.func @transform_2(%arg0: i32, %arg1: i32) -> (i32, i32, i32) {
    %c0_i32 = arith.constant 0 : i32
    %c0_i32_0 = arith.constant 0 : i32
    %c0_i32_1 = arith.constant 0 : i32
    return %arg1, %c0_i32, %c0_i32_0 : i32, i32, i32
  }
  func.func @transform_3(%arg0: i32, %arg1: i32) -> (i32, i32, i32) {
    %c0_i32 = arith.constant 0 : i32
    %c0_i32_0 = arith.constant 0 : i32
    %c0_i32_1 = arith.constant 0 : i32
    return %arg1, %c0_i32, %c0_i32_0 : i32, i32, i32
  }
  func.func @transform_4(%arg0: i32, %arg1: i32) -> (i32, i32, i32) {
    %c0_i32 = arith.constant 0 : i32
    %c0_i32_0 = arith.constant 0 : i32
    %c0_i32_1 = arith.constant 0 : i32
    return %arg1, %c0_i32, %c0_i32_0 : i32, i32, i32
  }
  func.func @transform_5(%arg0: i32, %arg1: i32) -> (i32, i32, i32) {
    %c0_i32 = arith.constant 0 : i32
    %c0_i32_0 = arith.constant 0 : i32
    %c0_i32_1 = arith.constant 0 : i32
    return %arg1, %c0_i32, %c0_i32_0 : i32, i32, i32
  }
  func.func @transform_6(%arg0: i32, %arg1: i32) -> (i32, i32, i32) {
    %c0_i32 = arith.constant 0 : i32
    %c0_i32_0 = arith.constant 0 : i32
    %c0_i32_1 = arith.constant 0 : i32
    return %arg1, %c0_i32, %c0_i32_0 : i32, i32, i32
  }
  func.func @transform_7(%arg0: i32, %arg1: i32) -> (i32, i32, i32) {
    %c0_i32 = arith.constant 0 : i32
    %c0_i32_0 = arith.constant 0 : i32
    %c0_i32_1 = arith.constant 0 : i32
    return %arg1, %c0_i32, %c0_i32_0 : i32, i32, i32
  }
  func.func @transform_8(%arg0: i32, %arg1: i32) -> (i32, i32, i32) {
    %c0_i32 = arith.constant 0 : i32
    %c0_i32_0 = arith.constant 0 : i32
    %c0_i32_1 = arith.constant 0 : i32
    return %arg1, %c0_i32, %c0_i32_0 : i32, i32, i32
  }
  func.func @transform_9(%arg0: i32, %arg1: i32) -> (i32, i32, i32) {
    %c0_i32 = arith.constant 0 : i32
    %c0_i32_0 = arith.constant 0 : i32
    %c0_i32_1 = arith.constant 0 : i32
    return %arg1, %c0_i32, %c0_i32_0 : i32, i32, i32
  }
  func.func @transform_10(%arg0: i32, %arg1: i32) -> (i32, i32, i32) {
    %c0_i32 = arith.constant 0 : i32
    %c0_i32_0 = arith.constant 0 : i32
    %c0_i32_1 = arith.constant 0 : i32
    return %arg1, %c0_i32, %c0_i32_0 : i32, i32, i32
  }
  func.func @transform_11(%arg0: i32, %arg1: i32) -> (i32, i32, i32) {
    %c0_i32 = arith.constant 0 : i32
    %c0_i32_0 = arith.constant 0 : i32
    %c0_i32_1 = arith.constant 0 : i32
    return %arg1, %c0_i32, %c0_i32_0 : i32, i32, i32
  }
  func.func @transform_12(%arg0: i32, %arg1: i32) -> (i32, i32, i32) {
    %c0_i32 = arith.constant 0 : i32
    %c0_i32_0 = arith.constant 0 : i32
    %c0_i32_1 = arith.constant 0 : i32
    return %arg1, %c0_i32, %c0_i32_0 : i32, i32, i32
  }
  func.func @transform_13(%arg0: i32, %arg1: i32) -> (i32, i32, i32) {
    %c0_i32 = arith.constant 0 : i32
    %c0_i32_0 = arith.constant 0 : i32
    %c0_i32_1 = arith.constant 0 : i32
    return %arg1, %c0_i32, %c0_i32_0 : i32, i32, i32
  }
  func.func @transform_14(%arg0: i32, %arg1: i32) -> (i32, i32) {
    %c0_i32 = arith.constant 0 : i32
    %c0_i32_0 = arith.constant 0 : i32
    %c0_i32_1 = arith.constant 0 : i32
    return %c0_i32, %c0_i32_0 : i32, i32
  }
  func.func @transform_15(%arg0: i32, %arg1: i32) -> (i32, i32) {
    %c0_i32 = arith.constant 0 : i32
    %c0_i32_0 = arith.constant 0 : i32
    %c0_i32_1 = arith.constant 0 : i32
    return %c0_i32, %c0_i32_0 : i32, i32
  }
  func.func @transform_16(%arg0: i32, %arg1: i32) -> (i32, i32, i32) {
    %c0_i32 = arith.constant 0 : i32
    %c0_i32_0 = arith.constant 0 : i32
    %c0_i32_1 = arith.constant 0 : i32
    return %arg0, %c0_i32, %c0_i32_0 : i32, i32, i32
  }
}

module attributes {stable_mosaic.version = 11 : i64} {
  func.func @_decoder_stack_kernel(%arg0: i32, %arg1: i32, %arg2: memref<1x8x32xf32, #tpu.memory_space<vmem>>, %arg3: memref<1x8x32xbf16, #tpu.memory_space<vmem>>, %arg4: memref<1x1x8xf32, #tpu.memory_space<vmem>>, %arg5: memref<1x1x8xf32, #tpu.memory_space<vmem>>, %arg6: memref<1x32x96xbf16, #tpu.memory_space<vmem>>, %arg7: memref<1x1x96xf32, #tpu.memory_space<vmem>>, %arg8: memref<1x32x32xbf16, #tpu.memory_space<vmem>>, %arg9: memref<1x1x32xf32, #tpu.memory_space<vmem>>, %arg10: memref<1x1x32xf32, #tpu.memory_space<vmem>>, %arg11: memref<1x1x32xf32, #tpu.memory_space<vmem>>, %arg12: memref<1x32x32xbf16, #tpu.memory_space<vmem>>, %arg13: memref<1x1x32xf32, #tpu.memory_space<vmem>>, %arg14: memref<1x32x64xbf16, #tpu.memory_space<vmem>>, %arg15: memref<1x1x64xf32, #tpu.memory_space<vmem>>, %arg16: memref<1x32x32xbf16, #tpu.memory_space<vmem>>, %arg17: memref<1x1x32xf32, #tpu.memory_space<vmem>>, %arg18: memref<1x1x32xf32, #tpu.memory_space<vmem>>, %arg19: memref<1x1x32xf32, #tpu.memory_space<vmem>>, %arg20: memref<1x32x32xbf16, #tpu.memory_space<vmem>>, %arg21: memref<1x1x32xf32, #tpu.memory_space<vmem>>, %arg22: memref<1x32x32xbf16, #tpu.memory_space<vmem>>, %arg23: memref<1x1x32xf32, #tpu.memory_space<vmem>>, %arg24: memref<1x1x32xf32, #tpu.memory_space<vmem>>, %arg25: memref<1x1x32xf32, #tpu.memory_space<vmem>>, %arg26: memref<1x32xf32, #tpu.memory_space<vmem>>, %arg27: memref<1x32xf32, #tpu.memory_space<vmem>>, %arg28: memref<1x8x32xbf16, #tpu.memory_space<vmem>>, %arg29: memref<8x32xf32, #tpu.memory_space<vmem>>) attributes {dimension_semantics = [#tpu.dimension_semantics<parallel>, #tpu.dimension_semantics<arbitrary>], iteration_bounds = array<i64: 2, 2>, scalar_prefetch = 0 : i64, scratch_operands = 1 : i64, tpu.core_type = #tpu.core_type<tc>, window_params = [{transform_indices = @transform_0, window_bounds = array<i64: 1, 8, 32>}, {transform_indices = @transform_1, window_bounds = array<i64: 1, 8, 32>}, {transform_indices = @transform_2, window_bounds = array<i64: 1, 1, 8>}, {transform_indices = @transform_3, window_bounds = array<i64: 1, 1, 8>}, {transform_indices = @transform_4, window_bounds = array<i64: 1, 32, 96>}, {transform_indices = @transform_5, window_bounds = array<i64: 1, 1, 96>}, {transform_indices = @transform_6, window_bounds = array<i64: 1, 32, 32>}, {transform_indices = @transform_7, window_bounds = array<i64: 1, 1, 32>}, {transform_indices = @transform_8, window_bounds = array<i64: 1, 1, 32>}, {transform_indices = @transform_9, window_bounds = array<i64: 1, 1, 32>}, {transform_indices = @transform_10, window_bounds = array<i64: 1, 32, 32>}, {transform_indices = @transform_11, window_bounds = array<i64: 1, 1, 32>}, {transform_indices = @transform_12, window_bounds = array<i64: 1, 32, 64>}, {transform_indices = @transform_13, window_bounds = array<i64: 1, 1, 64>}, {transform_indices = @transform_14, window_bounds = array<i64: 1, 32, 32>}, {transform_indices = @transform_15, window_bounds = array<i64: 1, 1, 32>}, {transform_indices = @transform_16, window_bounds = array<i64: 1, 1, 32>}, {transform_indices = @transform_17, window_bounds = array<i64: 1, 1, 32>}, {transform_indices = @transform_18, window_bounds = array<i64: 1, 32, 32>}, {transform_indices = @transform_19, window_bounds = array<i64: 1, 1, 32>}, {transform_indices = @transform_20, window_bounds = array<i64: 1, 32, 32>}, {transform_indices = @transform_21, window_bounds = array<i64: 1, 1, 32>}, {transform_indices = @transform_22, window_bounds = array<i64: 1, 1, 32>}, {transform_indices = @transform_23, window_bounds = array<i64: 1, 1, 32>}, {pipeline_mode = #tpu.pipeline_mode<synchronous>, transform_indices = @transform_24, window_bounds = array<i64: 1, 32>}, {pipeline_mode = #tpu.pipeline_mode<synchronous>, transform_indices = @transform_25, window_bounds = array<i64: 1, 32>}, {transform_indices = @transform_26, window_bounds = array<i64: 1, 8, 32>}]} {
    %c0_i32 = arith.constant 0 : i32
    %0 = arith.cmpi eq, %arg1, %c0_i32 : i32
    %1 = arith.extui %0 : i1 to i32
    %c0_i32_0 = arith.constant 0 : i32
    %2 = arith.cmpi ne, %1, %c0_i32_0 : i32
    scf.if %2 {
      %c0_138 = arith.constant 0 : index
      %c0_139 = arith.constant 0 : index
      %c0_140 = arith.constant 0 : index
      %347 = vector.load %arg2[%c0_138, %c0_139, %c0_140] : memref<1x8x32xf32, #tpu.memory_space<vmem>>, vector<1x8x32xf32>
      %348 = vector.shape_cast %347 : vector<1x8x32xf32> to vector<8x32xf32>
      %c0_141 = arith.constant 0 : index
      %c0_142 = arith.constant 0 : index
      %349 = vector.load %arg29[%c0_141, %c0_142] : memref<8x32xf32, #tpu.memory_space<vmem>>, vector<8x32xf32>
      tpu.vector_store %arg29[%c0_141, %c0_142], %348 {strides = array<i32>} : memref<8x32xf32, #tpu.memory_space<vmem>>, vector<8x32xf32>,
    } else {
    }
    %c0 = arith.constant 0 : index
    %c0_1 = arith.constant 0 : index
    %3 = vector.load %arg29[%c0, %c0_1] : memref<8x32xf32, #tpu.memory_space<vmem>>, vector<8x32xf32>
    %c0_2 = arith.constant 0 : index
    %c0_3 = arith.constant 0 : index
    %c0_4 = arith.constant 0 : index
    %4 = vector.load %arg3[%c0_2, %c0_3, %c0_4] : memref<1x8x32xbf16, #tpu.memory_space<vmem>>, vector<1x8x32xbf16>
    %5 = vector.shape_cast %4 : vector<1x8x32xbf16> to vector<8x32xbf16>
    %6 = tpu.iota {dimensions = array<i32: 0>} : vector<8x8xi32>
    %7 = tpu.iota {dimensions = array<i32: 1>} : vector<8x8xi32>
    %8 = arith.cmpi sgt, %7, %6 : vector<8x8xi32>
    %cst = arith.constant -1.000000e+30 : f32
    %cst_5 = arith.constant 0.000000e+00 : f32
    %9 = vector.broadcast %cst : f32 to vector<8x8xf32>
    %10 = vector.broadcast %cst_5 : f32 to vector<8x8xf32>
    %11 = arith.select %8, %9, %10 : vector<8x8xi1>, vector<8x8xf32>
    %c0_6 = arith.constant 0 : index
    %c0_7 = arith.constant 0 : index
    %c0_8 = arith.constant 0 : index
    %12 = vector.load %arg4[%c0_6, %c0_7, %c0_8] : memref<1x1x8xf32, #tpu.memory_space<vmem>>, vector<1x1x8xf32>
    %13 = vector.shape_cast %12 : vector<1x1x8xf32> to vector<1x8xf32>
    %14 = vector.broadcast %13 : vector<1x8xf32> to vector<8x8xf32>
    %15 = arith.addf %11, %14 : vector<8x8xf32>
    %c0_9 = arith.constant 0 : index
    %c0_10 = arith.constant 0 : index
    %c0_11 = arith.constant 0 : index
    %16 = vector.load %arg5[%c0_9, %c0_10, %c0_11] : memref<1x1x8xf32, #tpu.memory_space<vmem>>, vector<1x1x8xf32>
    %17 = vector.shape_cast %16 : vector<1x1x8xf32> to vector<1x8xf32>
    %18 = arith.truncf %3 : vector<8x32xf32> to vector<8x32xbf16>
    %c0_12 = arith.constant 0 : index
    %c0_13 = arith.constant 0 : index
    %c0_14 = arith.constant 0 : index
    %19 = vector.load %arg6[%c0_12, %c0_13, %c0_14] : memref<1x32x96xbf16, #tpu.memory_space<vmem>>, vector<1x32x96xbf16>
    %20 = vector.shape_cast %19 : vector<1x32x96xbf16> to vector<32x96xbf16>
    %cst_15 = arith.constant dense<0.000000e+00> : vector<8x96xf32>
    %21 = tpu.matmul %18, %20, %cst_15 {dimension_numbers = #tpu.dot_dimension_numbers<[1], [0], [0], [1], [0, 0, 1, 1], [], []>} : vector<8x32xbf16>, vector<32x96xbf16>, vector<8x96xf32> -> vector<8x96xf32>
    %c0_16 = arith.constant 0 : index
    %c0_17 = arith.constant 0 : index
    %c0_18 = arith.constant 0 : index
    %22 = vector.load %arg7[%c0_16, %c0_17, %c0_18] : memref<1x1x96xf32, #tpu.memory_space<vmem>>, vector<1x1x96xf32>
    %23 = vector.shape_cast %22 : vector<1x1x96xf32> to vector<1x96xf32>
    %24 = vector.broadcast %23 : vector<1x96xf32> to vector<8x96xf32>
    %25 = arith.addf %21, %24 : vector<8x96xf32>
    %26 = vector.extract_strided_slice %25 {offsets = [0, 0], sizes = [8, 32], strides = [1, 1]} : vector<8x96xf32> to vector<8x32xf32>
    %27 = vector.extract_strided_slice %25 {offsets = [0, 32], sizes = [8, 32], strides = [1, 1]} : vector<8x96xf32> to vector<8x32xf32>
    %28 = vector.extract_strided_slice %25 {offsets = [0, 64], sizes = [8, 32], strides = [1, 1]} : vector<8x96xf32> to vector<8x32xf32>
    %c0_19 = arith.constant 0 : index
    %c0_20 = arith.constant 0 : index
    %c0_21 = arith.constant 0 : index
    %29 = vector.load %arg8[%c0_19, %c0_20, %c0_21] : memref<1x32x32xbf16, #tpu.memory_space<vmem>>, vector<1x32x32xbf16>
    %30 = vector.shape_cast %29 : vector<1x32x32xbf16> to vector<32x32xbf16>
    %c0_22 = arith.constant 0 : index
    %c0_23 = arith.constant 0 : index
    %c0_24 = arith.constant 0 : index
    %31 = vector.load %arg9[%c0_22, %c0_23, %c0_24] : memref<1x1x32xf32, #tpu.memory_space<vmem>>, vector<1x1x32xf32>
    %32 = vector.shape_cast %31 : vector<1x1x32xf32> to vector<1x32xf32>
    %33 = vector.extract_strided_slice %26 {offsets = [0, 0], sizes = [8, 8], strides = [1, 1]} : vector<8x32xf32> to vector<8x8xf32>
    %34 = arith.truncf %33 : vector<8x8xf32> to vector<8x8xbf16>
    %35 = vector.extract_strided_slice %27 {offsets = [0, 0], sizes = [8, 8], strides = [1, 1]} : vector<8x32xf32> to vector<8x8xf32>
    %36 = arith.truncf %35 : vector<8x8xf32> to vector<8x8xbf16>
    %37 = vector.extract_strided_slice %28 {offsets = [0, 0], sizes = [8, 8], strides = [1, 1]} : vector<8x32xf32> to vector<8x8xf32>
    %38 = arith.truncf %37 : vector<8x8xf32> to vector<8x8xbf16>
    %cst_25 = arith.constant dense<0.000000e+00> : vector<8x8xf32>
    %39 = tpu.matmul %34, %36, %cst_25 {dimension_numbers = #tpu.dot_dimension_numbers<[1], [1], [0], [0], [0, 0, 1, 0], [], []>} : vector<8x8xbf16>, vector<8x8xbf16>, vector<8x8xf32> -> vector<8x8xf32>
    %cst_26 = arith.constant 0.353553385 : f32
    %40 = vector.broadcast %cst_26 : f32 to vector<8x8xf32>
    %41 = arith.mulf %39, %40 : vector<8x8xf32>
    %42 = arith.addf %41, %15 : vector<8x8xf32>
    %cst_27 = arith.constant dense<0xFF800000> : vector<8xf32>
    %43 = vector.multi_reduction <maximumf>, %42, %cst_27 [1] : vector<8x8xf32> to vector<8xf32>
    %44 = vector.shape_cast %43 : vector<8xf32> to vector<8x1xf32>
    %45 = vector.broadcast %44 : vector<8x1xf32> to vector<8x8xf32>
    %46 = arith.subf %42, %45 : vector<8x8xf32>
    %47 = math.exp %46 : vector<8x8xf32>
    %cst_28 = arith.constant dense<0.000000e+00> : vector<8xf32>
    %48 = vector.multi_reduction <add>, %47, %cst_28 [1] : vector<8x8xf32> to vector<8xf32>
    %49 = vector.shape_cast %48 : vector<8xf32> to vector<8x1xf32>
    %50 = tpu.reciprocal %49 {approx = true} : vector<8x1xf32> -> vector<8x1xf32>
    %51 = vector.broadcast %50 : vector<8x1xf32> to vector<8x8xf32>
    %52 = arith.mulf %47, %51 : vector<8x8xf32>
    %53 = arith.truncf %52 : vector<8x8xf32> to vector<8x8xbf16>
    %cst_29 = arith.constant dense<0.000000e+00> : vector<8x8xf32>
    %54 = tpu.matmul %53, %38, %cst_29 {dimension_numbers = #tpu.dot_dimension_numbers<[1], [0], [0], [1], [0, 0, 1, 1], [], []>} : vector<8x8xbf16>, vector<8x8xbf16>, vector<8x8xf32> -> vector<8x8xf32>
    %55 = vector.extract_strided_slice %26 {offsets = [0, 8], sizes = [8, 8], strides = [1, 1]} : vector<8x32xf32> to vector<8x8xf32>
    %56 = arith.truncf %55 : vector<8x8xf32> to vector<8x8xbf16>
    %57 = vector.extract_strided_slice %27 {offsets = [0, 8], sizes = [8, 8], strides = [1, 1]} : vector<8x32xf32> to vector<8x8xf32>
    %58 = arith.truncf %57 : vector<8x8xf32> to vector<8x8xbf16>
    %59 = vector.extract_strided_slice %28 {offsets = [0, 8], sizes = [8, 8], strides = [1, 1]} : vector<8x32xf32> to vector<8x8xf32>
    %60 = arith.truncf %59 : vector<8x8xf32> to vector<8x8xbf16>
    %cst_30 = arith.constant dense<0.000000e+00> : vector<8x8xf32>
    %61 = tpu.matmul %56, %58, %cst_30 {dimension_numbers = #tpu.dot_dimension_numbers<[1], [1], [0], [0], [0, 0, 1, 0], [], []>} : vector<8x8xbf16>, vector<8x8xbf16>, vector<8x8xf32> -> vector<8x8xf32>
    %cst_31 = arith.constant 0.353553385 : f32
    %62 = vector.broadcast %cst_31 : f32 to vector<8x8xf32>
    %63 = arith.mulf %61, %62 : vector<8x8xf32>
    %64 = arith.addf %63, %15 : vector<8x8xf32>
    %cst_32 = arith.constant dense<0xFF800000> : vector<8xf32>
    %65 = vector.multi_reduction <maximumf>, %64, %cst_32 [1] : vector<8x8xf32> to vector<8xf32>
    %66 = vector.shape_cast %65 : vector<8xf32> to vector<8x1xf32>
    %67 = vector.broadcast %66 : vector<8x1xf32> to vector<8x8xf32>
    %68 = arith.subf %64, %67 : vector<8x8xf32>
    %69 = math.exp %68 : vector<8x8xf32>
    %cst_33 = arith.constant dense<0.000000e+00> : vector<8xf32>
    %70 = vector.multi_reduction <add>, %69, %cst_33 [1] : vector<8x8xf32> to vector<8xf32>
    %71 = vector.shape_cast %70 : vector<8xf32> to vector<8x1xf32>
    %72 = tpu.reciprocal %71 {approx = true} : vector<8x1xf32> -> vector<8x1xf32>
    %73 = vector.broadcast %72 : vector<8x1xf32> to vector<8x8xf32>
    %74 = arith.mulf %69, %73 : vector<8x8xf32>
    %75 = arith.truncf %74 : vector<8x8xf32> to vector<8x8xbf16>
    %cst_34 = arith.constant dense<0.000000e+00> : vector<8x8xf32>
    %76 = tpu.matmul %75, %60, %cst_34 {dimension_numbers = #tpu.dot_dimension_numbers<[1], [0], [0], [1], [0, 0, 1, 1], [], []>} : vector<8x8xbf16>, vector<8x8xbf16>, vector<8x8xf32> -> vector<8x8xf32>
    %77 = vector.extract_strided_slice %26 {offsets = [0, 16], sizes = [8, 8], strides = [1, 1]} : vector<8x32xf32> to vector<8x8xf32>
    %78 = arith.truncf %77 : vector<8x8xf32> to vector<8x8xbf16>
    %79 = vector.extract_strided_slice %27 {offsets = [0, 16], sizes = [8, 8], strides = [1, 1]} : vector<8x32xf32> to vector<8x8xf32>
    %80 = arith.truncf %79 : vector<8x8xf32> to vector<8x8xbf16>
    %81 = vector.extract_strided_slice %28 {offsets = [0, 16], sizes = [8, 8], strides = [1, 1]} : vector<8x32xf32> to vector<8x8xf32>
    %82 = arith.truncf %81 : vector<8x8xf32> to vector<8x8xbf16>
    %cst_35 = arith.constant dense<0.000000e+00> : vector<8x8xf32>
    %83 = tpu.matmul %78, %80, %cst_35 {dimension_numbers = #tpu.dot_dimension_numbers<[1], [1], [0], [0], [0, 0, 1, 0], [], []>} : vector<8x8xbf16>, vector<8x8xbf16>, vector<8x8xf32> -> vector<8x8xf32>
    %cst_36 = arith.constant 0.353553385 : f32
    %84 = vector.broadcast %cst_36 : f32 to vector<8x8xf32>
    %85 = arith.mulf %83, %84 : vector<8x8xf32>
    %86 = arith.addf %85, %15 : vector<8x8xf32>
    %cst_37 = arith.constant dense<0xFF800000> : vector<8xf32>
    %87 = vector.multi_reduction <maximumf>, %86, %cst_37 [1] : vector<8x8xf32> to vector<8xf32>
    %88 = vector.shape_cast %87 : vector<8xf32> to vector<8x1xf32>
    %89 = vector.broadcast %88 : vector<8x1xf32> to vector<8x8xf32>
    %90 = arith.subf %86, %89 : vector<8x8xf32>
    %91 = math.exp %90 : vector<8x8xf32>
    %cst_38 = arith.constant dense<0.000000e+00> : vector<8xf32>
    %92 = vector.multi_reduction <add>, %91, %cst_38 [1] : vector<8x8xf32> to vector<8xf32>
    %93 = vector.shape_cast %92 : vector<8xf32> to vector<8x1xf32>
    %94 = tpu.reciprocal %93 {approx = true} : vector<8x1xf32> -> vector<8x1xf32>
    %95 = vector.broadcast %94 : vector<8x1xf32> to vector<8x8xf32>
    %96 = arith.mulf %91, %95 : vector<8x8xf32>
    %97 = arith.truncf %96 : vector<8x8xf32> to vector<8x8xbf16>
    %cst_39 = arith.constant dense<0.000000e+00> : vector<8x8xf32>
    %98 = tpu.matmul %97, %82, %cst_39 {dimension_numbers = #tpu.dot_dimension_numbers<[1], [0], [0], [1], [0, 0, 1, 1], [], []>} : vector<8x8xbf16>, vector<8x8xbf16>, vector<8x8xf32> -> vector<8x8xf32>
    %99 = vector.extract_strided_slice %26 {offsets = [0, 24], sizes = [8, 8], strides = [1, 1]} : vector<8x32xf32> to vector<8x8xf32>
    %100 = arith.truncf %99 : vector<8x8xf32> to vector<8x8xbf16>
    %101 = vector.extract_strided_slice %27 {offsets = [0, 24], sizes = [8, 8], strides = [1, 1]} : vector<8x32xf32> to vector<8x8xf32>
    %102 = arith.truncf %101 : vector<8x8xf32> to vector<8x8xbf16>
    %103 = vector.extract_strided_slice %28 {offsets = [0, 24], sizes = [8, 8], strides = [1, 1]} : vector<8x32xf32> to vector<8x8xf32>
    %104 = arith.truncf %103 : vector<8x8xf32> to vector<8x8xbf16>
    %cst_40 = arith.constant dense<0.000000e+00> : vector<8x8xf32>
    %105 = tpu.matmul %100, %102, %cst_40 {dimension_numbers = #tpu.dot_dimension_numbers<[1], [1], [0], [0], [0, 0, 1, 0], [], []>} : vector<8x8xbf16>, vector<8x8xbf16>, vector<8x8xf32> -> vector<8x8xf32>
    %cst_41 = arith.constant 0.353553385 : f32
    %106 = vector.broadcast %cst_41 : f32 to vector<8x8xf32>
    %107 = arith.mulf %105, %106 : vector<8x8xf32>
    %108 = arith.addf %107, %15 : vector<8x8xf32>
    %cst_42 = arith.constant dense<0xFF800000> : vector<8xf32>
    %109 = vector.multi_reduction <maximumf>, %108, %cst_42 [1] : vector<8x8xf32> to vector<8xf32>
    %110 = vector.shape_cast %109 : vector<8xf32> to vector<8x1xf32>
    %111 = vector.broadcast %110 : vector<8x1xf32> to vector<8x8xf32>
    %112 = arith.subf %108, %111 : vector<8x8xf32>
    %113 = math.exp %112 : vector<8x8xf32>
    %cst_43 = arith.constant dense<0.000000e+00> : vector<8xf32>
    %114 = vector.multi_reduction <add>, %113, %cst_43 [1] : vector<8x8xf32> to vector<8xf32>
    %115 = vector.shape_cast %114 : vector<8xf32> to vector<8x1xf32>
    %116 = tpu.reciprocal %115 {approx = true} : vector<8x1xf32> -> vector<8x1xf32>
    %117 = vector.broadcast %116 : vector<8x1xf32> to vector<8x8xf32>
    %118 = arith.mulf %113, %117 : vector<8x8xf32>
    %119 = arith.truncf %118 : vector<8x8xf32> to vector<8x8xbf16>
    %cst_44 = arith.constant dense<0.000000e+00> : vector<8x8xf32>
    %120 = tpu.matmul %119, %104, %cst_44 {dimension_numbers = #tpu.dot_dimension_numbers<[1], [0], [0], [1], [0, 0, 1, 1], [], []>} : vector<8x8xbf16>, vector<8x8xbf16>, vector<8x8xf32> -> vector<8x8xf32>
    %121 = tpu.concatenate %54, %76, %98, %120 in 1 : vector<8x8xf32>, vector<8x8xf32>, vector<8x8xf32>, vector<8x8xf32> -> vector<8x32xf32>
    %122 = arith.truncf %121 : vector<8x32xf32> to vector<8x32xbf16>
    %cst_45 = arith.constant dense<0.000000e+00> : vector<8x32xf32>
    %123 = tpu.matmul %122, %30, %cst_45 {dimension_numbers = #tpu.dot_dimension_numbers<[1], [0], [0], [1], [0, 0, 1, 1], [], []>} : vector<8x32xbf16>, vector<32x32xbf16>, vector<8x32xf32> -> vector<8x32xf32>
    %124 = vector.broadcast %32 : vector<1x32xf32> to vector<8x32xf32>
    %125 = arith.addf %123, %124 : vector<8x32xf32>
    %126 = arith.addf %3, %125 : vector<8x32xf32>
    %c0_46 = arith.constant 0 : index
    %c0_47 = arith.constant 0 : index
    %c0_48 = arith.constant 0 : index
    %127 = vector.load %arg10[%c0_46, %c0_47, %c0_48] : memref<1x1x32xf32, #tpu.memory_space<vmem>>, vector<1x1x32xf32>
    %128 = vector.shape_cast %127 : vector<1x1x32xf32> to vector<1x32xf32>
    %c0_49 = arith.constant 0 : index
    %c0_50 = arith.constant 0 : index
    %c0_51 = arith.constant 0 : index
    %129 = vector.load %arg11[%c0_49, %c0_50, %c0_51] : memref<1x1x32xf32, #tpu.memory_space<vmem>>, vector<1x1x32xf32>
    %130 = vector.shape_cast %129 : vector<1x1x32xf32> to vector<1x32xf32>
    %cst_52 = arith.constant dense<0.000000e+00> : vector<8xf32>
    %131 = vector.multi_reduction <add>, %126, %cst_52 [1] : vector<8x32xf32> to vector<8xf32>
    %132 = vector.shape_cast %131 : vector<8xf32> to vector<8x1xf32>
    %cst_53 = arith.constant 3.200000e+01 : f32
    %133 = vector.broadcast %cst_53 : f32 to vector<8x1xf32>
    %134 = arith.divf %132, %133 : vector<8x1xf32>
    %135 = vector.broadcast %134 : vector<8x1xf32> to vector<8x32xf32>
    %136 = arith.subf %126, %135 : vector<8x32xf32>
    %137 = arith.mulf %136, %136 : vector<8x32xf32>
    %cst_54 = arith.constant dense<0.000000e+00> : vector<8xf32>
    %138 = vector.multi_reduction <add>, %137, %cst_54 [1] : vector<8x32xf32> to vector<8xf32>
    %139 = vector.shape_cast %138 : vector<8xf32> to vector<8x1xf32>
    %cst_55 = arith.constant 3.200000e+01 : f32
    %140 = vector.broadcast %cst_55 : f32 to vector<8x1xf32>
    %141 = arith.divf %139, %140 : vector<8x1xf32>
    %142 = vector.broadcast %134 : vector<8x1xf32> to vector<8x32xf32>
    %143 = arith.subf %126, %142 : vector<8x32xf32>
    %cst_56 = arith.constant 9.99999974E-6 : f32
    %144 = vector.broadcast %cst_56 : f32 to vector<8x1xf32>
    %145 = arith.addf %141, %144 : vector<8x1xf32>
    %146 = math.rsqrt %145 : vector<8x1xf32>
    %147 = vector.broadcast %146 : vector<8x1xf32> to vector<8x32xf32>
    %148 = arith.mulf %143, %147 : vector<8x32xf32>
    %149 = vector.broadcast %128 : vector<1x32xf32> to vector<8x32xf32>
    %150 = arith.mulf %148, %149 : vector<8x32xf32>
    %151 = vector.broadcast %130 : vector<1x32xf32> to vector<8x32xf32>
    %152 = arith.addf %150, %151 : vector<8x32xf32>
    %153 = arith.truncf %152 : vector<8x32xf32> to vector<8x32xbf16>
    %c0_57 = arith.constant 0 : index
    %c0_58 = arith.constant 0 : index
    %c0_59 = arith.constant 0 : index
    %154 = vector.load %arg12[%c0_57, %c0_58, %c0_59] : memref<1x32x32xbf16, #tpu.memory_space<vmem>>, vector<1x32x32xbf16>
    %155 = vector.shape_cast %154 : vector<1x32x32xbf16> to vector<32x32xbf16>
    %cst_60 = arith.constant dense<0.000000e+00> : vector<8x32xf32>
    %156 = tpu.matmul %153, %155, %cst_60 {dimension_numbers = #tpu.dot_dimension_numbers<[1], [0], [0], [1], [0, 0, 1, 1], [], []>} : vector<8x32xbf16>, vector<32x32xbf16>, vector<8x32xf32> -> vector<8x32xf32>
    %c0_61 = arith.constant 0 : index
    %c0_62 = arith.constant 0 : index
    %c0_63 = arith.constant 0 : index
    %157 = vector.load %arg13[%c0_61, %c0_62, %c0_63] : memref<1x1x32xf32, #tpu.memory_space<vmem>>, vector<1x1x32xf32>
    %158 = vector.shape_cast %157 : vector<1x1x32xf32> to vector<1x32xf32>
    %159 = vector.broadcast %158 : vector<1x32xf32> to vector<8x32xf32>
    %160 = arith.addf %156, %159 : vector<8x32xf32>
    %c0_64 = arith.constant 0 : index
    %c0_65 = arith.constant 0 : index
    %c0_66 = arith.constant 0 : index
    %161 = vector.load %arg14[%c0_64, %c0_65, %c0_66] : memref<1x32x64xbf16, #tpu.memory_space<vmem>>, vector<1x32x64xbf16>
    %162 = vector.shape_cast %161 : vector<1x32x64xbf16> to vector<32x64xbf16>
    %cst_67 = arith.constant dense<0.000000e+00> : vector<8x64xf32>
    %163 = tpu.matmul %5, %162, %cst_67 {dimension_numbers = #tpu.dot_dimension_numbers<[1], [0], [0], [1], [0, 0, 1, 1], [], []>} : vector<8x32xbf16>, vector<32x64xbf16>, vector<8x64xf32> -> vector<8x64xf32>
    %c0_68 = arith.constant 0 : index
    %c0_69 = arith.constant 0 : index
    %c0_70 = arith.constant 0 : index
    %164 = vector.load %arg15[%c0_68, %c0_69, %c0_70] : memref<1x1x64xf32, #tpu.memory_space<vmem>>, vector<1x1x64xf32>
    %165 = vector.shape_cast %164 : vector<1x1x64xf32> to vector<1x64xf32>
    %166 = vector.broadcast %165 : vector<1x64xf32> to vector<8x64xf32>
    %167 = arith.addf %163, %166 : vector<8x64xf32>
    %168 = vector.extract_strided_slice %167 {offsets = [0, 0], sizes = [8, 32], strides = [1, 1]} : vector<8x64xf32> to vector<8x32xf32>
    %169 = vector.extract_strided_slice %167 {offsets = [0, 32], sizes = [8, 32], strides = [1, 1]} : vector<8x64xf32> to vector<8x32xf32>
    %c0_71 = arith.constant 0 : index
    %c0_72 = arith.constant 0 : index
    %c0_73 = arith.constant 0 : index
    %170 = vector.load %arg16[%c0_71, %c0_72, %c0_73] : memref<1x32x32xbf16, #tpu.memory_space<vmem>>, vector<1x32x32xbf16>
    %171 = vector.shape_cast %170 : vector<1x32x32xbf16> to vector<32x32xbf16>
    %c0_74 = arith.constant 0 : index
    %c0_75 = arith.constant 0 : index
    %c0_76 = arith.constant 0 : index
    %172 = vector.load %arg17[%c0_74, %c0_75, %c0_76] : memref<1x1x32xf32, #tpu.memory_space<vmem>>, vector<1x1x32xf32>
    %173 = vector.shape_cast %172 : vector<1x1x32xf32> to vector<1x32xf32>
    %174 = vector.extract_strided_slice %160 {offsets = [0, 0], sizes = [8, 8], strides = [1, 1]} : vector<8x32xf32> to vector<8x8xf32>
    %175 = arith.truncf %174 : vector<8x8xf32> to vector<8x8xbf16>
    %176 = vector.extract_strided_slice %168 {offsets = [0, 0], sizes = [8, 8], strides = [1, 1]} : vector<8x32xf32> to vector<8x8xf32>
    %177 = arith.truncf %176 : vector<8x8xf32> to vector<8x8xbf16>
    %178 = vector.extract_strided_slice %169 {offsets = [0, 0], sizes = [8, 8], strides = [1, 1]} : vector<8x32xf32> to vector<8x8xf32>
    %179 = arith.truncf %178 : vector<8x8xf32> to vector<8x8xbf16>
    %cst_77 = arith.constant dense<0.000000e+00> : vector<8x8xf32>
    %180 = tpu.matmul %175, %177, %cst_77 {dimension_numbers = #tpu.dot_dimension_numbers<[1], [1], [0], [0], [0, 0, 1, 0], [], []>} : vector<8x8xbf16>, vector<8x8xbf16>, vector<8x8xf32> -> vector<8x8xf32>
    %cst_78 = arith.constant 0.353553385 : f32
    %181 = vector.broadcast %cst_78 : f32 to vector<8x8xf32>
    %182 = arith.mulf %180, %181 : vector<8x8xf32>
    %183 = vector.broadcast %17 : vector<1x8xf32> to vector<8x8xf32>
    %184 = arith.addf %182, %183 : vector<8x8xf32>
    %cst_79 = arith.constant dense<0xFF800000> : vector<8xf32>
    %185 = vector.multi_reduction <maximumf>, %184, %cst_79 [1] : vector<8x8xf32> to vector<8xf32>
    %186 = vector.shape_cast %185 : vector<8xf32> to vector<8x1xf32>
    %187 = vector.broadcast %186 : vector<8x1xf32> to vector<8x8xf32>
    %188 = arith.subf %184, %187 : vector<8x8xf32>
    %189 = math.exp %188 : vector<8x8xf32>
    %cst_80 = arith.constant dense<0.000000e+00> : vector<8xf32>
    %190 = vector.multi_reduction <add>, %189, %cst_80 [1] : vector<8x8xf32> to vector<8xf32>
    %191 = vector.shape_cast %190 : vector<8xf32> to vector<8x1xf32>
    %192 = tpu.reciprocal %191 {approx = true} : vector<8x1xf32> -> vector<8x1xf32>
    %193 = vector.broadcast %192 : vector<8x1xf32> to vector<8x8xf32>
    %194 = arith.mulf %189, %193 : vector<8x8xf32>
    %195 = arith.truncf %194 : vector<8x8xf32> to vector<8x8xbf16>
    %cst_81 = arith.constant dense<0.000000e+00> : vector<8x8xf32>
    %196 = tpu.matmul %195, %179, %cst_81 {dimension_numbers = #tpu.dot_dimension_numbers<[1], [0], [0], [1], [0, 0, 1, 1], [], []>} : vector<8x8xbf16>, vector<8x8xbf16>, vector<8x8xf32> -> vector<8x8xf32>
    %197 = vector.extract_strided_slice %160 {offsets = [0, 8], sizes = [8, 8], strides = [1, 1]} : vector<8x32xf32> to vector<8x8xf32>
    %198 = arith.truncf %197 : vector<8x8xf32> to vector<8x8xbf16>
    %199 = vector.extract_strided_slice %168 {offsets = [0, 8], sizes = [8, 8], strides = [1, 1]} : vector<8x32xf32> to vector<8x8xf32>
    %200 = arith.truncf %199 : vector<8x8xf32> to vector<8x8xbf16>
    %201 = vector.extract_strided_slice %169 {offsets = [0, 8], sizes = [8, 8], strides = [1, 1]} : vector<8x32xf32> to vector<8x8xf32>
    %202 = arith.truncf %201 : vector<8x8xf32> to vector<8x8xbf16>
    %cst_82 = arith.constant dense<0.000000e+00> : vector<8x8xf32>
    %203 = tpu.matmul %198, %200, %cst_82 {dimension_numbers = #tpu.dot_dimension_numbers<[1], [1], [0], [0], [0, 0, 1, 0], [], []>} : vector<8x8xbf16>, vector<8x8xbf16>, vector<8x8xf32> -> vector<8x8xf32>
    %cst_83 = arith.constant 0.353553385 : f32
    %204 = vector.broadcast %cst_83 : f32 to vector<8x8xf32>
    %205 = arith.mulf %203, %204 : vector<8x8xf32>
    %206 = vector.broadcast %17 : vector<1x8xf32> to vector<8x8xf32>
    %207 = arith.addf %205, %206 : vector<8x8xf32>
    %cst_84 = arith.constant dense<0xFF800000> : vector<8xf32>
    %208 = vector.multi_reduction <maximumf>, %207, %cst_84 [1] : vector<8x8xf32> to vector<8xf32>
    %209 = vector.shape_cast %208 : vector<8xf32> to vector<8x1xf32>
    %210 = vector.broadcast %209 : vector<8x1xf32> to vector<8x8xf32>
    %211 = arith.subf %207, %210 : vector<8x8xf32>
    %212 = math.exp %211 : vector<8x8xf32>
    %cst_85 = arith.constant dense<0.000000e+00> : vector<8xf32>
    %213 = vector.multi_reduction <add>, %212, %cst_85 [1] : vector<8x8xf32> to vector<8xf32>
    %214 = vector.shape_cast %213 : vector<8xf32> to vector<8x1xf32>
    %215 = tpu.reciprocal %214 {approx = true} : vector<8x1xf32> -> vector<8x1xf32>
    %216 = vector.broadcast %215 : vector<8x1xf32> to vector<8x8xf32>
    %217 = arith.mulf %212, %216 : vector<8x8xf32>
    %218 = arith.truncf %217 : vector<8x8xf32> to vector<8x8xbf16>
    %cst_86 = arith.constant dense<0.000000e+00> : vector<8x8xf32>
    %219 = tpu.matmul %218, %202, %cst_86 {dimension_numbers = #tpu.dot_dimension_numbers<[1], [0], [0], [1], [0, 0, 1, 1], [], []>} : vector<8x8xbf16>, vector<8x8xbf16>, vector<8x8xf32> -> vector<8x8xf32>
    %220 = vector.extract_strided_slice %160 {offsets = [0, 16], sizes = [8, 8], strides = [1, 1]} : vector<8x32xf32> to vector<8x8xf32>
    %221 = arith.truncf %220 : vector<8x8xf32> to vector<8x8xbf16>
    %222 = vector.extract_strided_slice %168 {offsets = [0, 16], sizes = [8, 8], strides = [1, 1]} : vector<8x32xf32> to vector<8x8xf32>
    %223 = arith.truncf %222 : vector<8x8xf32> to vector<8x8xbf16>
    %224 = vector.extract_strided_slice %169 {offsets = [0, 16], sizes = [8, 8], strides = [1, 1]} : vector<8x32xf32> to vector<8x8xf32>
    %225 = arith.truncf %224 : vector<8x8xf32> to vector<8x8xbf16>
    %cst_87 = arith.constant dense<0.000000e+00> : vector<8x8xf32>
    %226 = tpu.matmul %221, %223, %cst_87 {dimension_numbers = #tpu.dot_dimension_numbers<[1], [1], [0], [0], [0, 0, 1, 0], [], []>} : vector<8x8xbf16>, vector<8x8xbf16>, vector<8x8xf32> -> vector<8x8xf32>
    %cst_88 = arith.constant 0.353553385 : f32
    %227 = vector.broadcast %cst_88 : f32 to vector<8x8xf32>
    %228 = arith.mulf %226, %227 : vector<8x8xf32>
    %229 = vector.broadcast %17 : vector<1x8xf32> to vector<8x8xf32>
    %230 = arith.addf %228, %229 : vector<8x8xf32>
    %cst_89 = arith.constant dense<0xFF800000> : vector<8xf32>
    %231 = vector.multi_reduction <maximumf>, %230, %cst_89 [1] : vector<8x8xf32> to vector<8xf32>
    %232 = vector.shape_cast %231 : vector<8xf32> to vector<8x1xf32>
    %233 = vector.broadcast %232 : vector<8x1xf32> to vector<8x8xf32>
    %234 = arith.subf %230, %233 : vector<8x8xf32>
    %235 = math.exp %234 : vector<8x8xf32>
    %cst_90 = arith.constant dense<0.000000e+00> : vector<8xf32>
    %236 = vector.multi_reduction <add>, %235, %cst_90 [1] : vector<8x8xf32> to vector<8xf32>
    %237 = vector.shape_cast %236 : vector<8xf32> to vector<8x1xf32>
    %238 = tpu.reciprocal %237 {approx = true} : vector<8x1xf32> -> vector<8x1xf32>
    %239 = vector.broadcast %238 : vector<8x1xf32> to vector<8x8xf32>
    %240 = arith.mulf %235, %239 : vector<8x8xf32>
    %241 = arith.truncf %240 : vector<8x8xf32> to vector<8x8xbf16>
    %cst_91 = arith.constant dense<0.000000e+00> : vector<8x8xf32>
    %242 = tpu.matmul %241, %225, %cst_91 {dimension_numbers = #tpu.dot_dimension_numbers<[1], [0], [0], [1], [0, 0, 1, 1], [], []>} : vector<8x8xbf16>, vector<8x8xbf16>, vector<8x8xf32> -> vector<8x8xf32>
    %243 = vector.extract_strided_slice %160 {offsets = [0, 24], sizes = [8, 8], strides = [1, 1]} : vector<8x32xf32> to vector<8x8xf32>
    %244 = arith.truncf %243 : vector<8x8xf32> to vector<8x8xbf16>
    %245 = vector.extract_strided_slice %168 {offsets = [0, 24], sizes = [8, 8], strides = [1, 1]} : vector<8x32xf32> to vector<8x8xf32>
    %246 = arith.truncf %245 : vector<8x8xf32> to vector<8x8xbf16>
    %247 = vector.extract_strided_slice %169 {offsets = [0, 24], sizes = [8, 8], strides = [1, 1]} : vector<8x32xf32> to vector<8x8xf32>
    %248 = arith.truncf %247 : vector<8x8xf32> to vector<8x8xbf16>
    %cst_92 = arith.constant dense<0.000000e+00> : vector<8x8xf32>
    %249 = tpu.matmul %244, %246, %cst_92 {dimension_numbers = #tpu.dot_dimension_numbers<[1], [1], [0], [0], [0, 0, 1, 0], [], []>} : vector<8x8xbf16>, vector<8x8xbf16>, vector<8x8xf32> -> vector<8x8xf32>
    %cst_93 = arith.constant 0.353553385 : f32
    %250 = vector.broadcast %cst_93 : f32 to vector<8x8xf32>
    %251 = arith.mulf %249, %250 : vector<8x8xf32>
    %252 = vector.broadcast %17 : vector<1x8xf32> to vector<8x8xf32>
    %253 = arith.addf %251, %252 : vector<8x8xf32>
    %cst_94 = arith.constant dense<0xFF800000> : vector<8xf32>
    %254 = vector.multi_reduction <maximumf>, %253, %cst_94 [1] : vector<8x8xf32> to vector<8xf32>
    %255 = vector.shape_cast %254 : vector<8xf32> to vector<8x1xf32>
    %256 = vector.broadcast %255 : vector<8x1xf32> to vector<8x8xf32>
    %257 = arith.subf %253, %256 : vector<8x8xf32>
    %258 = math.exp %257 : vector<8x8xf32>
    %cst_95 = arith.constant dense<0.000000e+00> : vector<8xf32>
    %259 = vector.multi_reduction <add>, %258, %cst_95 [1] : vector<8x8xf32> to vector<8xf32>
    %260 = vector.shape_cast %259 : vector<8xf32> to vector<8x1xf32>
    %261 = tpu.reciprocal %260 {approx = true} : vector<8x1xf32> -> vector<8x1xf32>
    %262 = vector.broadcast %261 : vector<8x1xf32> to vector<8x8xf32>
    %263 = arith.mulf %258, %262 : vector<8x8xf32>
    %264 = arith.truncf %263 : vector<8x8xf32> to vector<8x8xbf16>
    %cst_96 = arith.constant dense<0.000000e+00> : vector<8x8xf32>
    %265 = tpu.matmul %264, %248, %cst_96 {dimension_numbers = #tpu.dot_dimension_numbers<[1], [0], [0], [1], [0, 0, 1, 1], [], []>} : vector<8x8xbf16>, vector<8x8xbf16>, vector<8x8xf32> -> vector<8x8xf32>
    %266 = tpu.concatenate %196, %219, %242, %265 in 1 : vector<8x8xf32>, vector<8x8xf32>, vector<8x8xf32>, vector<8x8xf32> -> vector<8x32xf32>
    %267 = arith.truncf %266 : vector<8x32xf32> to vector<8x32xbf16>
    %cst_97 = arith.constant dense<0.000000e+00> : vector<8x32xf32>
    %268 = tpu.matmul %267, %171, %cst_97 {dimension_numbers = #tpu.dot_dimension_numbers<[1], [0], [0], [1], [0, 0, 1, 1], [], []>} : vector<8x32xbf16>, vector<32x32xbf16>, vector<8x32xf32> -> vector<8x32xf32>
    %269 = vector.broadcast %173 : vector<1x32xf32> to vector<8x32xf32>
    %270 = arith.addf %268, %269 : vector<8x32xf32>
    %271 = arith.addf %152, %270 : vector<8x32xf32>
    %c0_98 = arith.constant 0 : index
    %c0_99 = arith.constant 0 : index
    %c0_100 = arith.constant 0 : index
    %272 = vector.load %arg18[%c0_98, %c0_99, %c0_100] : memref<1x1x32xf32, #tpu.memory_space<vmem>>, vector<1x1x32xf32>
    %273 = vector.shape_cast %272 : vector<1x1x32xf32> to vector<1x32xf32>
    %c0_101 = arith.constant 0 : index
    %c0_102 = arith.constant 0 : index
    %c0_103 = arith.constant 0 : index
    %274 = vector.load %arg19[%c0_101, %c0_102, %c0_103] : memref<1x1x32xf32, #tpu.memory_space<vmem>>, vector<1x1x32xf32>
    %275 = vector.shape_cast %274 : vector<1x1x32xf32> to vector<1x32xf32>
    %cst_104 = arith.constant dense<0.000000e+00> : vector<8xf32>
    %276 = vector.multi_reduction <add>, %271, %cst_104 [1] : vector<8x32xf32> to vector<8xf32>
    %277 = vector.shape_cast %276 : vector<8xf32> to vector<8x1xf32>
    %cst_105 = arith.constant 3.200000e+01 : f32
    %278 = vector.broadcast %cst_105 : f32 to vector<8x1xf32>
    %279 = arith.divf %277, %278 : vector<8x1xf32>
    %280 = vector.broadcast %279 : vector<8x1xf32> to vector<8x32xf32>
    %281 = arith.subf %271, %280 : vector<8x32xf32>
    %282 = arith.mulf %281, %281 : vector<8x32xf32>
    %cst_106 = arith.constant dense<0.000000e+00> : vector<8xf32>
    %283 = vector.multi_reduction <add>, %282, %cst_106 [1] : vector<8x32xf32> to vector<8xf32>
    %284 = vector.shape_cast %283 : vector<8xf32> to vector<8x1xf32>
    %cst_107 = arith.constant 3.200000e+01 : f32
    %285 = vector.broadcast %cst_107 : f32 to vector<8x1xf32>
    %286 = arith.divf %284, %285 : vector<8x1xf32>
    %287 = vector.broadcast %279 : vector<8x1xf32> to vector<8x32xf32>
    %288 = arith.subf %271, %287 : vector<8x32xf32>
    %cst_108 = arith.constant 9.99999974E-6 : f32
    %289 = vector.broadcast %cst_108 : f32 to vector<8x1xf32>
    %290 = arith.addf %286, %289 : vector<8x1xf32>
    %291 = math.rsqrt %290 : vector<8x1xf32>
    %292 = vector.broadcast %291 : vector<8x1xf32> to vector<8x32xf32>
    %293 = arith.mulf %288, %292 : vector<8x32xf32>
    %294 = vector.broadcast %273 : vector<1x32xf32> to vector<8x32xf32>
    %295 = arith.mulf %293, %294 : vector<8x32xf32>
    %296 = vector.broadcast %275 : vector<1x32xf32> to vector<8x32xf32>
    %297 = arith.addf %295, %296 : vector<8x32xf32>
    %298 = arith.truncf %297 : vector<8x32xf32> to vector<8x32xbf16>
    %c0_109 = arith.constant 0 : index
    %c0_110 = arith.constant 0 : index
    %c0_111 = arith.constant 0 : index
    %299 = vector.load %arg20[%c0_109, %c0_110, %c0_111] : memref<1x32x32xbf16, #tpu.memory_space<vmem>>, vector<1x32x32xbf16>
    %300 = vector.shape_cast %299 : vector<1x32x32xbf16> to vector<32x32xbf16>
    %cst_112 = arith.constant dense<0.000000e+00> : vector<8x32xf32>
    %301 = tpu.matmul %298, %300, %cst_112 {dimension_numbers = #tpu.dot_dimension_numbers<[1], [0], [0], [1], [0, 0, 1, 1], [], []>} : vector<8x32xbf16>, vector<32x32xbf16>, vector<8x32xf32> -> vector<8x32xf32>
    %c0_113 = arith.constant 0 : index
    %c0_114 = arith.constant 0 : index
    %c0_115 = arith.constant 0 : index
    %302 = vector.load %arg21[%c0_113, %c0_114, %c0_115] : memref<1x1x32xf32, #tpu.memory_space<vmem>>, vector<1x1x32xf32>
    %303 = vector.shape_cast %302 : vector<1x1x32xf32> to vector<1x32xf32>
    %304 = vector.broadcast %303 : vector<1x32xf32> to vector<8x32xf32>
    %305 = arith.addf %301, %304 : vector<8x32xf32>
    %cst_116 = arith.constant 0.000000e+00 : f32
    %306 = vector.broadcast %cst_116 : f32 to vector<8x32xf32>
    %307 = arith.maximumf %305, %306 : vector<8x32xf32>
    %308 = arith.truncf %307 : vector<8x32xf32> to vector<8x32xbf16>
    %c0_117 = arith.constant 0 : index
    %c0_118 = arith.constant 0 : index
    %c0_119 = arith.constant 0 : index
    %309 = vector.load %arg22[%c0_117, %c0_118, %c0_119] : memref<1x32x32xbf16, #tpu.memory_space<vmem>>, vector<1x32x32xbf16>
    %310 = vector.shape_cast %309 : vector<1x32x32xbf16> to vector<32x32xbf16>
    %cst_120 = arith.constant dense<0.000000e+00> : vector<8x32xf32>
    %311 = tpu.matmul %308, %310, %cst_120 {dimension_numbers = #tpu.dot_dimension_numbers<[1], [0], [0], [1], [0, 0, 1, 1], [], []>} : vector<8x32xbf16>, vector<32x32xbf16>, vector<8x32xf32> -> vector<8x32xf32>
    %c0_121 = arith.constant 0 : index
    %c0_122 = arith.constant 0 : index
    %c0_123 = arith.constant 0 : index
    %312 = vector.load %arg23[%c0_121, %c0_122, %c0_123] : memref<1x1x32xf32, #tpu.memory_space<vmem>>, vector<1x1x32xf32>
    %313 = vector.shape_cast %312 : vector<1x1x32xf32> to vector<1x32xf32>
    %314 = vector.broadcast %313 : vector<1x32xf32> to vector<8x32xf32>
    %315 = arith.addf %311, %314 : vector<8x32xf32>
    %316 = arith.addf %297, %315 : vector<8x32xf32>
    %c0_124 = arith.constant 0 : index
    %c0_125 = arith.constant 0 : index
    %c0_126 = arith.constant 0 : index
    %317 = vector.load %arg24[%c0_124, %c0_125, %c0_126] : memref<1x1x32xf32, #tpu.memory_space<vmem>>, vector<1x1x32xf32>
    %318 = vector.shape_cast %317 : vector<1x1x32xf32> to vector<1x32xf32>
    %c0_127 = arith.constant 0 : index
    %c0_128 = arith.constant 0 : index
    %c0_129 = arith.constant 0 : index
    %319 = vector.load %arg25[%c0_127, %c0_128, %c0_129] : memref<1x1x32xf32, #tpu.memory_space<vmem>>, vector<1x1x32xf32>
    %320 = vector.shape_cast %319 : vector<1x1x32xf32> to vector<1x32xf32>
    %cst_130 = arith.constant dense<0.000000e+00> : vector<8xf32>
    %321 = vector.multi_reduction <add>, %316, %cst_130 [1] : vector<8x32xf32> to vector<8xf32>
    %322 = vector.shape_cast %321 : vector<8xf32> to vector<8x1xf32>
    %cst_131 = arith.constant 3.200000e+01 : f32
    %323 = vector.broadcast %cst_131 : f32 to vector<8x1xf32>
    %324 = arith.divf %322, %323 : vector<8x1xf32>
    %325 = vector.broadcast %324 : vector<8x1xf32> to vector<8x32xf32>
    %326 = arith.subf %316, %325 : vector<8x32xf32>
    %327 = arith.mulf %326, %326 : vector<8x32xf32>
    %cst_132 = arith.constant dense<0.000000e+00> : vector<8xf32>
    %328 = vector.multi_reduction <add>, %327, %cst_132 [1] : vector<8x32xf32> to vector<8xf32>
    %329 = vector.shape_cast %328 : vector<8xf32> to vector<8x1xf32>
    %cst_133 = arith.constant 3.200000e+01 : f32
    %330 = vector.broadcast %cst_133 : f32 to vector<8x1xf32>
    %331 = arith.divf %329, %330 : vector<8x1xf32>
    %332 = vector.broadcast %324 : vector<8x1xf32> to vector<8x32xf32>
    %333 = arith.subf %316, %332 : vector<8x32xf32>
    %cst_134 = arith.constant 9.99999974E-6 : f32
    %334 = vector.broadcast %cst_134 : f32 to vector<8x1xf32>
    %335 = arith.addf %331, %334 : vector<8x1xf32>
    %336 = math.rsqrt %335 : vector<8x1xf32>
    %337 = vector.broadcast %336 : vector<8x1xf32> to vector<8x32xf32>
    %338 = arith.mulf %333, %337 : vector<8x32xf32>
    %339 = vector.broadcast %318 : vector<1x32xf32> to vector<8x32xf32>
    %340 = arith.mulf %338, %339 : vector<8x32xf32>
    %341 = vector.broadcast %320 : vector<1x32xf32> to vector<8x32xf32>
    %342 = arith.addf %340, %341 : vector<8x32xf32>
    %c0_135 = arith.constant 0 : index
    %c0_136 = arith.constant 0 : index
    %343 = vector.load %arg29[%c0_135, %c0_136] : memref<8x32xf32, #tpu.memory_space<vmem>>, vector<8x32xf32>
    tpu.vector_store %arg29[%c0_135, %c0_136], %342 {strides = array<i32>} : memref<8x32xf32, #tpu.memory_space<vmem>>, vector<8x32xf32>,
    %c1_i32 = arith.constant 1 : i32
    %344 = arith.cmpi eq, %arg1, %c1_i32 : i32
    %345 = arith.extui %344 : i1 to i32
    %c0_i32_137 = arith.constant 0 : i32
    %346 = arith.cmpi ne, %345, %c0_i32_137 : i32
    scf.if %346 {
      %c0_138 = arith.constant 0 : index
      %c0_139 = arith.constant 0 : index
      %347 = vector.load %arg26[%c0_138, %c0_139] : memref<1x32xf32, #tpu.memory_space<vmem>>, vector<1x32xf32>
      %c0_140 = arith.constant 0 : index
      %c0_141 = arith.constant 0 : index
      %348 = vector.load %arg27[%c0_140, %c0_141] : memref<1x32xf32, #tpu.memory_space<vmem>>, vector<1x32xf32>
      %cst_142 = arith.constant dense<0.000000e+00> : vector<8xf32>
      %349 = vector.multi_reduction <add>, %342, %cst_142 [1] : vector<8x32xf32> to vector<8xf32>
      %350 = vector.shape_cast %349 : vector<8xf32> to vector<8x1xf32>
      %cst_143 = arith.constant 3.200000e+01 : f32
      %351 = vector.broadcast %cst_143 : f32 to vector<8x1xf32>
      %352 = arith.divf %350, %351 : vector<8x1xf32>
      %353 = vector.broadcast %352 : vector<8x1xf32> to vector<8x32xf32>
      %354 = arith.subf %342, %353 : vector<8x32xf32>
      %355 = arith.mulf %354, %354 : vector<8x32xf32>
      %cst_144 = arith.constant dense<0.000000e+00> : vector<8xf32>
      %356 = vector.multi_reduction <add>, %355, %cst_144 [1] : vector<8x32xf32> to vector<8xf32>
      %357 = vector.shape_cast %356 : vector<8xf32> to vector<8x1xf32>
      %cst_145 = arith.constant 3.200000e+01 : f32
      %358 = vector.broadcast %cst_145 : f32 to vector<8x1xf32>
      %359 = arith.divf %357, %358 : vector<8x1xf32>
      %360 = vector.broadcast %352 : vector<8x1xf32> to vector<8x32xf32>
      %361 = arith.subf %342, %360 : vector<8x32xf32>
      %cst_146 = arith.constant 9.99999974E-6 : f32
      %362 = vector.broadcast %cst_146 : f32 to vector<8x1xf32>
      %363 = arith.addf %359, %362 : vector<8x1xf32>
      %364 = math.rsqrt %363 : vector<8x1xf32>
      %365 = vector.broadcast %364 : vector<8x1xf32> to vector<8x32xf32>
      %366 = arith.mulf %361, %365 : vector<8x32xf32>
      %367 = vector.broadcast %347 : vector<1x32xf32> to vector<8x32xf32>
      %368 = arith.mulf %366, %367 : vector<8x32xf32>
      %369 = vector.broadcast %348 : vector<1x32xf32> to vector<8x32xf32>
      %370 = arith.addf %368, %369 : vector<8x32xf32>
      %371 = arith.truncf %370 : vector<8x32xf32> to vector<8x32xbf16>
      %c0_147 = arith.constant 0 : index
      %c0_148 = arith.constant 0 : index
      %c0_149 = arith.constant 0 : index
      %372 = vector.load %arg28[%c0_147, %c0_148, %c0_149] : memref<1x8x32xbf16, #tpu.memory_space<vmem>>, vector<1x8x32xbf16>
      %373 = vector.shape_cast %372 : vector<1x8x32xbf16> to vector<8x32xbf16>
      %374 = vector.shape_cast %371 : vector<8x32xbf16> to vector<1x8x32xbf16>
      tpu.vector_store %arg28[%c0_147, %c0_148, %c0_149], %374 {strides = array<i32>} : memref<1x8x32xbf16, #tpu.memory_space<vmem>>, vector<1x8x32xbf16>,
    } else {
    }
    return
  }
  func.func @transform_0(%arg0: i32, %arg1: i32) -> (i32, i32, i32) {
    %c0_i32 = arith.constant 0 : i32
    %c0_i32_0 = arith.constant 0 : i32
    %c0_i32_1 = arith.constant 0 : i32
    return %arg0, %c0_i32, %c0_i32_0 : i32, i32, i32
  }
  func.func @transform_1(%arg0: i32, %arg1: i32) -> (i32, i32, i32) {
    %c0_i32 = arith.constant 0 : i32
    %c0_i32_0 = arith.constant 0 : i32
    %c0_i32_1 = arith.constant 0 : i32
    return %arg0, %c0_i32, %c0_i32_0 : i32, i32, i32
  }
  func.func @transform_2(%arg0: i32, %arg1: i32) -> (i32, i32, i32) {
    %c0_i32 = arith.constant 0 : i32
    %c0_i32_0 = arith.constant 0 : i32
    %c0_i32_1 = arith.constant 0 : i32
    return %arg0, %c0_i32, %c0_i32_0 : i32, i32, i32
  }
  func.func @transform_3(%arg0: i32, %arg1: i32) -> (i32, i32, i32) {
    %c0_i32 = arith.constant 0 : i32
    %c0_i32_0 = arith.constant 0 : i32
    %c0_i32_1 = arith.constant 0 : i32
    return %arg0, %c0_i32, %c0_i32_0 : i32, i32, i32
  }
  func.func @transform_4(%arg0: i32, %arg1: i32) -> (i32, i32, i32) {
    %c0_i32 = arith.constant 0 : i32
    %c0_i32_0 = arith.constant 0 : i32
    %c0_i32_1 = arith.constant 0 : i32
    return %arg1, %c0_i32, %c0_i32_0 : i32, i32, i32
  }
  func.func @transform_5(%arg0: i32, %arg1: i32) -> (i32, i32, i32) {
    %c0_i32 = arith.constant 0 : i32
    %c0_i32_0 = arith.constant 0 : i32
    %c0_i32_1 = arith.constant 0 : i32
    return %arg1, %c0_i32, %c0_i32_0 : i32, i32, i32
  }
  func.func @transform_6(%arg0: i32, %arg1: i32) -> (i32, i32, i32) {
    %c0_i32 = arith.constant 0 : i32
    %c0_i32_0 = arith.constant 0 : i32
    %c0_i32_1 = arith.constant 0 : i32
    return %arg1, %c0_i32, %c0_i32_0 : i32, i32, i32
  }
  func.func @transform_7(%arg0: i32, %arg1: i32) -> (i32, i32, i32) {
    %c0_i32 = arith.constant 0 : i32
    %c0_i32_0 = arith.constant 0 : i32
    %c0_i32_1 = arith.constant 0 : i32
    return %arg1, %c0_i32, %c0_i32_0 : i32, i32, i32
  }
  func.func @transform_8(%arg0: i32, %arg1: i32) -> (i32, i32, i32) {
    %c0_i32 = arith.constant 0 : i32
    %c0_i32_0 = arith.constant 0 : i32
    %c0_i32_1 = arith.constant 0 : i32
    return %arg1, %c0_i32, %c0_i32_0 : i32, i32, i32
  }
  func.func @transform_9(%arg0: i32, %arg1: i32) -> (i32, i32, i32) {
    %c0_i32 = arith.constant 0 : i32
    %c0_i32_0 = arith.constant 0 : i32
    %c0_i32_1 = arith.constant 0 : i32
    return %arg1, %c0_i32, %c0_i32_0 : i32, i32, i32
  }
  func.func @transform_10(%arg0: i32, %arg1: i32) -> (i32, i32, i32) {
    %c0_i32 = arith.constant 0 : i32
    %c0_i32_0 = arith.constant 0 : i32
    %c0_i32_1 = arith.constant 0 : i32
    return %arg1, %c0_i32, %c0_i32_0 : i32, i32, i32
  }
  func.func @transform_11(%arg0: i32, %arg1: i32) -> (i32, i32, i32) {
    %c0_i32 = arith.constant 0 : i32
    %c0_i32_0 = arith.constant 0 : i32
    %c0_i32_1 = arith.constant 0 : i32
    return %arg1, %c0_i32, %c0_i32_0 : i32, i32, i32
  }
  func.func @transform_12(%arg0: i32, %arg1: i32) -> (i32, i32, i32) {
    %c0_i32 = arith.constant 0 : i32
    %c0_i32_0 = arith.constant 0 : i32
    %c0_i32_1 = arith.constant 0 : i32
    return %arg1, %c0_i32, %c0_i32_0 : i32, i32, i32
  }
  func.func @transform_13(%arg0: i32, %arg1: i32) -> (i32, i32, i32) {
    %c0_i32 = arith.constant 0 : i32
    %c0_i32_0 = arith.constant 0 : i32
    %c0_i32_1 = arith.constant 0 : i32
    return %arg1, %c0_i32, %c0_i32_0 : i32, i32, i32
  }
  func.func @transform_14(%arg0: i32, %arg1: i32) -> (i32, i32, i32) {
    %c0_i32 = arith.constant 0 : i32
    %c0_i32_0 = arith.constant 0 : i32
    %c0_i32_1 = arith.constant 0 : i32
    return %arg1, %c0_i32, %c0_i32_0 : i32, i32, i32
  }
  func.func @transform_15(%arg0: i32, %arg1: i32) -> (i32, i32, i32) {
    %c0_i32 = arith.constant 0 : i32
    %c0_i32_0 = arith.constant 0 : i32
    %c0_i32_1 = arith.constant 0 : i32
    return %arg1, %c0_i32, %c0_i32_0 : i32, i32, i32
  }
  func.func @transform_16(%arg0: i32, %arg1: i32) -> (i32, i32, i32) {
    %c0_i32 = arith.constant 0 : i32
    %c0_i32_0 = arith.constant 0 : i32
    %c0_i32_1 = arith.constant 0 : i32
    return %arg1, %c0_i32, %c0_i32_0 : i32, i32, i32
  }
  func.func @transform_17(%arg0: i32, %arg1: i32) -> (i32, i32, i32) {
    %c0_i32 = arith.constant 0 : i32
    %c0_i32_0 = arith.constant 0 : i32
    %c0_i32_1 = arith.constant 0 : i32
    return %arg1, %c0_i32, %c0_i32_0 : i32, i32, i32
  }
  func.func @transform_18(%arg0: i32, %arg1: i32) -> (i32, i32, i32) {
    %c0_i32 = arith.constant 0 : i32
    %c0_i32_0 = arith.constant 0 : i32
    %c0_i32_1 = arith.constant 0 : i32
    return %arg1, %c0_i32, %c0_i32_0 : i32, i32, i32
  }
  func.func @transform_19(%arg0: i32, %arg1: i32) -> (i32, i32, i32) {
    %c0_i32 = arith.constant 0 : i32
    %c0_i32_0 = arith.constant 0 : i32
    %c0_i32_1 = arith.constant 0 : i32
    return %arg1, %c0_i32, %c0_i32_0 : i32, i32, i32
  }
  func.func @transform_20(%arg0: i32, %arg1: i32) -> (i32, i32, i32) {
    %c0_i32 = arith.constant 0 : i32
    %c0_i32_0 = arith.constant 0 : i32
    %c0_i32_1 = arith.constant 0 : i32
    return %arg1, %c0_i32, %c0_i32_0 : i32, i32, i32
  }
  func.func @transform_21(%arg0: i32, %arg1: i32) -> (i32, i32, i32) {
    %c0_i32 = arith.constant 0 : i32
    %c0_i32_0 = arith.constant 0 : i32
    %c0_i32_1 = arith.constant 0 : i32
    return %arg1, %c0_i32, %c0_i32_0 : i32, i32, i32
  }
  func.func @transform_22(%arg0: i32, %arg1: i32) -> (i32, i32, i32) {
    %c0_i32 = arith.constant 0 : i32
    %c0_i32_0 = arith.constant 0 : i32
    %c0_i32_1 = arith.constant 0 : i32
    return %arg1, %c0_i32, %c0_i32_0 : i32, i32, i32
  }
  func.func @transform_23(%arg0: i32, %arg1: i32) -> (i32, i32, i32) {
    %c0_i32 = arith.constant 0 : i32
    %c0_i32_0 = arith.constant 0 : i32
    %c0_i32_1 = arith.constant 0 : i32
    return %arg1, %c0_i32, %c0_i32_0 : i32, i32, i32
  }
  func.func @transform_24(%arg0: i32, %arg1: i32) -> (i32, i32) {
    %c0_i32 = arith.constant 0 : i32
    %c0_i32_0 = arith.constant 0 : i32
    %c0_i32_1 = arith.constant 0 : i32
    return %c0_i32, %c0_i32_0 : i32, i32
  }
  func.func @transform_25(%arg0: i32, %arg1: i32) -> (i32, i32) {
    %c0_i32 = arith.constant 0 : i32
    %c0_i32_0 = arith.constant 0 : i32
    %c0_i32_1 = arith.constant 0 : i32
    return %c0_i32, %c0_i32_0 : i32, i32
  }
  func.func @transform_26(%arg0: i32, %arg1: i32) -> (i32, i32, i32) {
    %c0_i32 = arith.constant 0 : i32
    %c0_i32_0 = arith.constant 0 : i32
    %c0_i32_1 = arith.constant 0 : i32
    return %arg0, %c0_i32, %c0_i32_0 : i32, i32, i32
  }
}

</mosaic_0001>

<bundles_post_ra>
// kernel: transformer_forward.5
= control target key start
LH: loop header
LB: loop body
LE: loop exit
PB: predicated region body
PF: predicated region fallthrough
CT: control target
= control target key end

     0   :  { %s519_s12 = smov 0   ;;  %s521_s13 = smov 0   ;;  %s567_s0 = inlined_call_operand.vmem [shape: bf16[16,32], index: 0, kind: input, shape index: {}]   ;;  %s568_s1 = inlined_call_operand.vmem [shape: bf16[32,256], index: 1, kind: input, shape index: {}]   ;;  %s569_s2 = inlined_call_operand.vmem [shape: f32[1,256], index: 2, kind: input, shape index: {}]   ;;  %s570_s3 = inlined_call_operand.vmem [shape: f32[16,256], index: 3, kind: output, shape index: {}]  }
   0x1   :  { %s523_s14 = smov 0  }
   0x2 LB: > { %s25_s15 = sadd.s32 1, %s492_s13  ;;  %p431_p0 = scmp.ge.s32.totalorder %s496_s14, 1  ;;  %s496_s14 = sphi %s523_s14, %s13_s14   ;;  %s492_s13 = sphi %s521_s13, %s572_s13   ;;  %s488_s12 = sphi %s519_s12, %s571_s12  }
   0x3   : > { %p27_p1 = scmp.ge.s32.totalorder %s25_s15, 2  ;;  %p171_p2 = scmp.lt.s32.totalorder %s496_s14, 3 }
   0x5   : > { %s574_s15 = smov (%p27_p1, %s25_s15), 0  ;;  %p172_p3 = pnand %p431_p0, %p171_p2 }
   0x6   : > { %v468_v0 = vld [vmem:[%s568_s1 + $0x4] ss:$8 sps:$4 sm:$0xff] (!%p172_p3)   ;;  %p207_p4 = scmp.lt.s32.totalorder (!%p172_p3), %s488_s12, 1  ;;  %v470_v1 = vld [vmem:[%s568_s1] ss:$8 sps:$4 sm:$0xff] (!%p172_p3)   ;;  %v498_v2 = vmov (!%p172_p3), 0   ;;  %v240_v6 = vlaneseq (!%p172_p3) }
   0x7   : > { %175 = sbr.rel (%p172_p3) target bundleno = 234 (0xea), region = 32  ;;  %306 = vmatprep.mubr.bf16.mxu0 (!%p172_p3), %v498_v2  ;;  %274 = vmatprep.subr.bf16.mxu0 (!%p172_p3), %v468_v0  ;;  %v471_v3 = vld [vmem:[%s568_s1 + $0x14] ss:$8 sps:$4 sm:$0xff] (!%p172_p3)   ;;  %v473_v4 = vld [vmem:[%s568_s1 + $0x10] ss:$8 sps:$4 sm:$0xff] (!%p172_p3)   ;;  %vm270_vm0 = vcmask (!%p172_p3), 261120  }
   0x8   : > { %275 = vmatpush1.bf16.msra.mxu0 (!%p172_p3), %v470_v1  ;;  %v241_v7 = vshrl.u32 (!%p172_p3), %v240_v6, 7  ;;  %v238_v9 = vld [vmem:[%s569_s2] sm:$0x3] (!%p172_p3) }
   0x9   : > { %276 = vmatprep.subr.bf16.mxu0 (!%p172_p3), %v471_v3 }
   0xa   : > { %v242_v8 = vsub.s32 (!%p172_p3), 0, %v241_v7  ;;  %v246_v10 = vsub.s32 (!%p172_p3), 1, %v241_v7 }
   0xc   : > { %277 = vmatpush1.bf16.msra.mxu0 (!%p172_p3), %v473_v4  ;;  %v243_v11 = vrot.slane (!%p172_p3), %v238_v9, %v242_v8  ;;  %v247_v12 = vrot.slane (!%p172_p3), %v238_v9, %v246_v10 }
   0xe   : > { %s576_s12 = smov (!%p207_p4, %s488_s12), 1 }
   0xf   : > { %s432_s24 = sshll.u32 %s576_s12, 2  ;;  %s442_s30 = sshll.u32 %s576_s12, 4 }
  0x10   : > { %s210_s27 = scalar_lea.vmem %s567_s0, %s432_s24  ;;  %s230_s6 = scalar_lea.vmem %s570_s3, %s442_s30 }
  0x11   : > { %v233_v5 = vld [vmem:[%s210_s27] sm:$0xf] }
  0x12   : > { %439 = vmatmul.mubr.msk.bf16.vlgmr.msra.gmra.mrb[0].mxu0 %vm270_vm0, %v233_v5 }
  0xe5   : > { %v308_v13 = vpop.f32.mrb[0].mxu0 }
  0xe6   : > { %v309_v14 = vadd.f32 %v308_v13, %v243_v11  ;;  %v310_v15 = vpop.f32.mrb[1].mxu0 }
  0xe7   : > { %v311_v16 = vadd.f32 %v310_v15, %v247_v12  ;;  %v312_v17 = vpop.f32.mrb[2].mxu0 }
  0xe8   : > { %315 = vst [vmem:[%s230_s6] sm:$0xff] %v309_v14  ;;  %v313_v18 = vpop.f32.mrb[3].mxu0 }
  0xe9   : > { %316 = vst [vmem:[%s230_s6 + $0x8] sm:$0xff] %v311_v16 }
  0xea PF: > { %s13_s14 = sadd.s32 1, %s496_s14   ;;  %s571_s12 = smov %s492_s13 }
  0xeb   : > { %p10_p5 = scmp.ge.s32.totalorder %s13_s14, 4   ;;  %s572_s13 = smov %s574_s15 }
  0xed   :  { %12 = sbr.rel (!%p10_p5) target bundleno = 2 (0x2), region = 68 }

// kernel: transformer_forward.3
= control target key start
LH: loop header
LB: loop body
LE: loop exit
PB: predicated region body
PF: predicated region fallthrough
CT: control target
= control target key end

     0   :  { %s2168_s21 = smov 0   ;;  %s2170_s22 = smov 0   ;;  %s2441_s0 = inlined_call_operand.vmem [shape: f32[2,8,32], index: 0, kind: input, shape index: {}]   ;;  %s2442_s1 = inlined_call_operand.vmem [shape: f32[2,1,8], index: 1, kind: input, shape index: {}]   ;;  %s2443_s2 = inlined_call_operand.vmem [shape: bf16[2,32,96], index: 2, kind: input, shape index: {}]   ;;  %s2444_s3 = inlined_call_operand.vmem [shape: f32[2,1,96], index: 3, kind: input, shape index: {}]   ;;  %s2445_s4 = inlined_call_operand.vmem [shape: bf16[2,32,32], index: 4, kind: input, shape index: {}]   ;;  %s2446_s5 = inlined_call_operand.vmem [shape: f32[2,1,32], index: 5, kind: input, shape index: {}]   ;;  %s2447_s6 = inlined_call_operand.vmem [shape: f32[2,1,32], index: 6, kind: input, shape index: {}]   ;;  %s2448_s7 = inlined_call_operand.vmem [shape: f32[2,1,32], index: 7, kind: input, shape index: {}]   ;;  %s2449_s8 = inlined_call_operand.vmem [shape: bf16[2,32,32], index: 8, kind: input, shape index: {}]   ;;  %s2450_s9 = inlined_call_operand.vmem [shape: f32[2,1,32], index: 9, kind: input, shape index: {}]   ;;  %s2451_s10 = inlined_call_operand.vmem [shape: bf16[2,32,32], index: 10, kind: input, shape index: {}]   ;;  %s2452_s11 = inlined_call_operand.vmem [shape: f32[2,1,32], index: 11, kind: input, shape index: {}]   ;;  %s2453_s12 = inlined_call_operand.vmem [shape: f32[2,1,32], index: 12, kind: input, shape index: {}]   ;;  %s2454_s13 = inlined_call_operand.vmem [shape: f32[2,1,32], index: 13, kind: input, shape index: {}]   ;;  %s2455_s14 = inlined_call_operand.vmem [shape: f32[1,32], index: 14, kind: input, shape index: {}]   ;;  %s2456_s15 = inlined_call_operand.vmem [shape: f32[1,32], index: 15, kind: input, shape index: {}]   ;;  %s2457_s16 = inlined_call_operand.vmem [shape: bf16[2,8,32], index: 16, kind: output, shape index: {}]  }
   0x1   :  { %2462 = sst [smem:[#allocation9_spill]] %s2441_s0  ;;  %s2172_s23 = smov 0  }
   0x2   :  { %2463 = sst [smem:[#allocation10_spill]] %s2443_s2  ;;  %s2174_s24 = smov 0  }
   0x3   :  { %2464 = sst [smem:[#allocation11_spill]] %s2445_s4  ;;  %s2176_s25 = smov 0  }
   0x4   :  { %2465 = sst [smem:[#allocation12_spill]] %s2447_s6 }
   0x5   :  { %2466 = sst [smem:[#allocation13_spill]] %s2448_s7 }
   0x6   :  { %2467 = sst [smem:[#allocation14_spill]] %s2449_s8 }
   0x7   :  { %2468 = sst [smem:[#allocation15_spill]] %s2450_s9 }
   0x8   :  { %2469 = sst [smem:[#allocation16_spill]] %s2453_s12 }
   0x9   :  { %2470 = sst [smem:[#allocation17_spill]] %s2454_s13 }
   0xa   :  { %2471 = sst [smem:[#allocation18_spill]] %s2455_s14 }
   0xb   :  { %2472 = sst [smem:[#allocation19_spill]] %s2456_s15 }
   0xc   :  { %2473 = sst [smem:[#allocation20_spill]] %s2457_s16 }
   0xd LB: > { %2474 = sst [smem:[#allocation3_spill]] %s2049_s21  ;;  %s35_s26 = sadd.s32 1, %s2057_s23  ;;  %s2065_s25 = sphi %s2176_s25, %s26_s25   ;;  %s2061_s24 = sphi %s2174_s24, %s2509_s24   ;;  %s2057_s23 = sphi %s2172_s23, %s2508_s23   ;;  %s2053_s22 = sphi %s2170_s22, %s2507_s22   ;;  %s2049_s21 = sphi %s2168_s21, %s2506_s21  }
   0xe   : > { %2475 = sst [smem:[#allocation4_spill]] %s2057_s23  ;;  %s38_s27 = sadd.s32 1, %s2061_s24 }
   0xf   : > { %2476 = sst [smem:[#allocation5_spill]] %s2061_s24  ;;  %p36_p0 = scmp.ge.s32.totalorder %s35_s26, 2 }
  0x10   : > { %2477 = sst [smem:[#allocation6_spill]] %s2065_s25  ;;  %p1783_p1 = scmp.ge.s32.totalorder %s2065_s25, 1 }
  0x11   : > { %p585_p2 = scmp.lt.s32.totalorder %s2065_s25, 5  ;;  %s2511_s26 = smov (%p36_p0, %s35_s26), 0 }
  0x12   : > { %2478 = sst [smem:[#allocation7_spill]] %s2511_s26  ;;  %s2513_s27 = smov (!%p36_p0, %s38_s27), %s2061_s24 }
  0x13   : > { %p586_p3 = pnand %p1783_p1, %p585_p2  ;;  %p40_p4 = scmp.ge.s32.totalorder %s2513_s27, 2 }
  0x14   : > { %p680_p5 = scmp.lt.s32.totalorder (!%p586_p3), %s2053_s22, 1  ;;  %p687_p6 = scmp.lt.s32.totalorder (!%p586_p3), %s2049_s21, 1 }
  0x15   : > { %s2515_s27 = smov (%p40_p4, %s2513_s27), 0  ;;  %589 = sbr.rel (%p586_p3) target bundleno = 2917 (0xb65), region = 84 }
  0x16   : > { %2479 = sst [smem:[#allocation8_spill]] %s2515_s27  ;;  %s2480_s20 = sld [smem:[#allocation9_spill]] (!%p586_p3) }
  0x17   : > { %s2481_s2 = sld [smem:[#allocation10_spill]] (!%p586_p3)  ;;  %s2482_s4 = sld [smem:[#allocation11_spill]] (!%p586_p3) }
  0x18   : > { %s2485_s8 = sld [smem:[#allocation14_spill]] (!%p586_p3)  ;;  %s2487_s24 = sld [smem:[#allocation16_spill]] (!%p586_p3) }
  0x1c   : > { %s2517_s22 = smov (!%p680_p5, %s2053_s22), 1 }
  0x1d   : > { %s2204_s28 = scalar_select %p687_p6, %s2049_s21, 1 }
  0x1e   : > { %s1784_s29 = sshll.u32 %s2517_s22, 3  ;;  %s1793_s6 = sshll.u32 %s2517_s22, 2 }
  0x1f   : > { %s683_s27 = scalar_lea.vmem %s2480_s20, %s1784_s29  ;;  %s1829_s26 = sshll.u32 %s2204_s28, 4 }
  0x20   : > { %s691_s25 = scalar_lea.vmem %s2481_s2, %s1829_s26  ;;  %s2225_s12 = scalar_lea.vmem %s2482_s4, %s1829_s26 }
  0x21   : > { %s2242_s15 = scalar_lea.vmem %s2485_s8, %s1829_s26  ;;  %s2251_s0 = scalar_lea.vmem %s2451_s10, %s1829_s26 }
  0x22   : > { %s724_s19 = scalar_lea.vmem %s2452_s11, %s2204_s28  ;;  %s727_s17 = scalar_lea.vmem %s2487_s24, %s2204_s28 }
  0x23   : > { %s2488_s8 = sld [smem:[#allocation17_spill]]  ;;  %s2489_s21 = sld [smem:[#allocation20_spill]] }
  0x24   : > { %s2490_s4 = sld [smem:[#allocation3_spill]] }
  0x29   : > { %s730_s7 = scalar_lea.vmem %s2488_s8, %s2204_s28  ;;  %s2269_s9 = scalar_lea.vmem %s2489_s21, %s1793_s6 }
  0x2a   : > { %p1794_p7 = scmp.ne.s32.totalorder %s2490_s4, 0 }
  0x2b   : > { %v740_v0 = vld [vmem:[%s683_s27] sm:$0xff] (!%p1794_p7)  ;;  %vm741_vm0 = vcmask (!%p1794_p7), 261120  }
  0x2c   : > { %739 = sbr.rel (%p1794_p7) target bundleno = 51 (0x33), region = 88  ;;  %742 = vst.msk [vmem:[#allocation2] sm:$0xff] (!%p1794_p7), %vm741_vm0, %v740_v0 }
  0x33 PF: > { %v1997_v1 = vld [vmem:[%s691_s25] sm:$0xff]   ;;  %v2067_v2 = vmov 0.0   ;;  %v1998_v3 = vld [vmem:[%s691_s25 + $0x8] sm:$0xff]   ;;  %vm2068_vm1 = vmmov 0   ;;  %vm769_vm2 = vcmask 261120   ;;  %s2491_s21 = scalar_lea.vmem %s2444_s3, %s2204_s28  ;;  %s2069_s25 = smov 120  }
  0x34   : > { %1861 = vmatprep.subr.bf16.mxu0 %v2067_v2  ;;  %1869 = vmatprep.subr.bf16.mxu1 %v2067_v2  ;;  %v2276_v4 = vld [vmem:[#allocation2] sm:$0xff]  ;;  %s2070_s26 = smov 96   ;;  %s2071_s27 = smov 80   ;;  %vm822_vm3 = vcmask 64512   ;;  %vm894_vm4 = vcmask 1043456   ;;  %vm1287_vm5 = vcmask 130048  }
  0x35   : > { %1862 = vmatpush3.bf16.msra.mxu0 %v1997_v1  ;;  %1865 = vmatprep.mubr.msk.bf16.mxu0 %vm2068_vm1, %v2067_v2  ;;  %v745_v5 = vpack.c.bf16 %v2276_v4, %v2276_v4  ;;  %v1795_v6 = vld [vmem:[%s2491_s21] ss:$0 sm:$0xff]  ;;  %s2072_s24 = smov 88   ;;  %s2073_s30 = smov 72   ;;  %vm1289_vm6 = vcmask 195584  }
  0x36   : > { %1863 = vmatprep.subr.bf16.mxu0 %v2067_v2  ;;  %1871 = vmatprep.mubr.msk.bf16.mxu1 %vm2068_vm1, %v2067_v2  ;;  %s2074_s18 = smov 112   ;;  %s2075_s29 = smov 104  }
  0x37   : > { %s2492_s2 = scalar_lea.vmem %s2442_s1, %s2517_s22  ;;  %s2076_s22 = smov 56  }
  0x38   : > { %v1800_v25 = vld [vmem:[%s2492_s2] ss:$0 sm:$0xff]  ;;  %s2077_s14 = smov 64   ;;  %s2078_s13 = smov 40  }
  0x39   : > { %1864 = vmatpush3.bf16.msra.mxu0 %v1998_v3  ;;  %s2079_s16 = smov 48   ;;  %s2080_s4 = smov 8  }
  0x3a   : > { %1875 = vmatprep.subr.bf16.mxu0 %v2067_v2  ;;  %s2081_s6 = smov 16   ;;  %s2082_s8 = smov 24  }
  0x3b   : > { %s2496_s20 = sld [smem:[#allocation13_spill]] }
  0x3c   : > { %1866 = vmatmul.mubr.msk.bf16.vlgmr.msra.gmra.mrb[0].mxu0 %vm769_vm2, %v745_v5  ;;  %s2502_s21 = sld [smem:[#allocation3_spill]] }
  0x3d   : > { %1877 = vmatprep.mubr.msk.bf16.mxu0 %vm2068_vm1, %v2067_v2 }
  0x41   : > { %s2497_s23 = scalar_lea.vmem %s2496_s20, %s2204_s28 }
  0x42   : > { %p1824_p8 = scmp.ne.s32.totalorder %s2502_s21, 1 }
  0x43   : > { %vm1584_vm7 = vcmask (!%p1824_p8), 257024  }
 0x10f   : > { %v807_v7 = vpop.f32.mrb[0].mxu0 }
 0x110   : > { %v808_v8 = vadd.f32 %v1795_v6, %v807_v7  ;;  %v1867_v9 = vpop.f32.mrb[1].mxu0 }
 0x111   : > { %v810_v10 = vpop.f32.mrb[2].mxu0 }
 0x112   : > { %v2292_v11 = vpack.c.bf16 %v808_v8, %v808_v8  ;;  %v1868_v12 = vpop.f32.mrb[3].mxu0 }
 0x114   : > { %938 = vrot.lane.b32.xlu1 %v2292_v11, %s2069_s25  ;;  %820 = vrot.lane.b32.xlu0 %v2292_v11, %s2070_s26  ;;  %s2493_s25 = scalar_lea.vmem %s2446_s5, %s2204_s28 }
 0x118   : > { %1052 = vrot.lane.b32.xlu1 %v2292_v11, %s2071_s27  ;;  %940 = vrot.lane.b32.xlu0 %v2292_v11, %s2072_s24  ;;  %s2494_s24 = sld [smem:[#allocation12_spill]]  ;;  %s2504_s27 = sld [smem:[#allocation19_spill]] (!%p1824_p8) }
 0x11c   : > { %1164 = vrot.lane.b32.xlu1 %v2292_v11, %s2073_s30  ;;  %1050 = vrot.lane.b32.xlu0 %v2292_v11, %s2074_s18 }
 0x11e   : > { %s2495_s30 = scalar_lea.vmem %s2494_s24, %s2204_s28 }
 0x120   : > { %1162 = vrot.lane.b32.xlu0 %v2292_v11, %s2075_s29 }
 0x186   : > { %v821_v13 = vpop.permute.xlu0 %820  ;;  %v939_v16 = vpop.permute.xlu1 %938 }
 0x187   : > { %v827_v14 = vsel %vm822_vm3, %v821_v13, 0 }
 0x188   : > { %1870 = vmatpush3.bf16.xpose.msra.mxu1 %v827_v14 }
 0x189   : > { %1881 = vmatprep.subr.bf16.mxu1 %v2067_v2 }
 0x18a   : > { %v941_v15 = vpop.permute.xlu0 %940  ;;  %v1053_v18 = vpop.permute.xlu1 %1052 }
 0x18b   : > { %v946_v17 = vsel %vm822_vm3, %v941_v15, 0  ;;  %v1058_v19 = vsel %vm822_vm3, %v1053_v18, 0 }
 0x18e   : > { %v1165_v20 = vpop.permute.xlu1 %1164  ;;  %v1051_v21 = vpop.permute.xlu0 %1050 }
 0x18f   : > { %1872 = vmatmul.mubr.msk.bf16.vlgmr.msra.gmra.mrb[0].mxu1 %vm822_vm3, %v2292_v11  ;;  %v1170_v22 = vsel %vm822_vm3, %v1165_v20, 0 }
 0x190   : > { %1882 = vmatpush3.bf16.xpose.msra.mxu1 %v946_v17  ;;  %1883 = vmatprep.mubr.msk.bf16.mxu1 %vm2068_vm1, %v2067_v2 }
 0x191   : > { %1893 = vmatprep.subr.bf16.mxu1 %v2067_v2 }
 0x192   : > { %v1163_v23 = vpop.permute.xlu0 %1162 }
 0x197   : > { %1884 = vmatmul.mubr.msk.bf16.vlgmr.msra.gmra.mrb[4].mxu1 %vm822_vm3, %v939_v16 }
 0x198   : > { %1894 = vmatpush3.bf16.xpose.msra.mxu1 %v1058_v19  ;;  %1895 = vmatprep.mubr.msk.bf16.mxu1 %vm2068_vm1, %v2067_v2 }
 0x199   : > { %1905 = vmatprep.subr.bf16.mxu1 %v2067_v2 }
 0x19f   : > { %1896 = vmatmul.mubr.msk.bf16.vlgmr.msra.gmra.mrb[8].mxu1 %vm822_vm3, %v1051_v21 }
 0x1a0   : > { %1906 = vmatpush3.bf16.xpose.msra.mxu1 %v1170_v22  ;;  %1907 = vmatprep.mubr.msk.bf16.mxu1 %vm2068_vm1, %v2067_v2 }
 0x1a1   : > { %1917 = vmatprep.subr.bf16.mxu1 %v2067_v2 }
 0x1a7   : > { %1908 = vmatmul.mubr.msk.bf16.vlgmr.msra.gmra.mrb[12].mxu1 %vm822_vm3, %v1163_v23 }
 0x1a8   : > { %1921 = vmatprep.mubr.msk.bf16.mxu1 %vm2068_vm1, %v2067_v2 }
 0x262   : > { %v863_v24 = vpop.f32.mrb[0].mxu1 }
 0x263   : > { %v869_v26 = vmul.f32 0.35355338, %v863_v24  ;;  %v1873_v27 = vpop.f32.mrb[1].mxu1 }
 0x264   : > { %v866_v28 = vpop.f32.mrb[2].mxu1 }
 0x265   : > { %v1874_v29 = vpop.f32.mrb[3].mxu1  ;;  %v876_v30 = vadd.f32 %v1800_v25, %v869_v26 }
 0x267   : > { %v877_v31 = vsel %vm822_vm3, %v876_v30, -inf }
 0x268   : > { %878 = vmax.xlane.f32.xlu1 %v877_v31 }
 0x26a   : > { %v982_v32 = vpop.f32.mrb[4].mxu1 }
 0x26b   : > { %v988_v33 = vmul.f32 0.35355338, %v982_v32  ;;  %v1885_v34 = vpop.f32.mrb[5].mxu1 }
 0x26c   : > { %v985_v35 = vpop.f32.mrb[6].mxu1 }
 0x26d   : > { %v1886_v36 = vpop.f32.mrb[7].mxu1  ;;  %v989_v37 = vadd.f32 %v1800_v25, %v988_v33 }
 0x26f   : > { %v990_v38 = vsel %vm822_vm3, %v989_v37, -inf }
 0x270   : > { %991 = vmax.xlane.f32.xlu0 %v990_v38 }
 0x272   : > { %v1094_v39 = vpop.f32.mrb[8].mxu1 }
 0x273   : > { %v1100_v40 = vmul.f32 0.35355338, %v1094_v39  ;;  %v1897_v41 = vpop.f32.mrb[9].mxu1 }
 0x274   : > { %v1097_v42 = vpop.f32.mrb[10].mxu1 }
 0x275   : > { %v1898_v43 = vpop.f32.mrb[11].mxu1  ;;  %v1101_v44 = vadd.f32 %v1800_v25, %v1100_v40 }
 0x276   : > { %v1999_v43 = vld [vmem:[%s2225_s12] sm:$0xff]  }
 0x277   : > { %v1102_v45 = vsel %vm822_vm3, %v1101_v44, -inf  ;;  %1918 = vmatpush3.bf16.msra.mxu1 %v1999_v43 }
 0x278   : > { %1103 = vmax.xlane.f32.xlu0 %v1102_v45  ;;  %1919 = vmatprep.subr.bf16.mxu1 %v2067_v2 }
 0x27a   : > { %v1206_v46 = vpop.f32.mrb[12].mxu1 }
 0x27b   : > { %v1212_v47 = vmul.f32 0.35355338, %v1206_v46  ;;  %v1909_v48 = vpop.f32.mrb[13].mxu1 }
 0x27c   : > { %v1209_v49 = vpop.f32.mrb[14].mxu1 }
 0x27d   : > { %v1910_v50 = vpop.f32.mrb[15].mxu1  ;;  %v1213_v51 = vadd.f32 %v1800_v25, %v1212_v47 }
 0x27f   : > { %v1214_v52 = vsel %vm822_vm3, %v1213_v51, -inf }
 0x280   : > { %1215 = vmax.xlane.f32.xlu1 %v1214_v52 }
 0x2f5   : > { %v879_v53 = vpop.xlane.xlu1 %878 }
 0x2f6   : > { %v880_v54 = vsub.f32 %v876_v30, %v879_v53 }
 0x2f8   : > { %v881_v55 = vmul.f32 1.442695, %v880_v54 }
 0x2fa   : > { %2005 = vpow2.f32 %v881_v55 }
 0x2fd   : > { %v992_v56 = vpop.xlane.xlu0 %991 }
 0x2fe   : > { %v993_v57 = vsub.f32 %v989_v37, %v992_v56 }
 0x300   : > { %v994_v58 = vmul.f32 1.442695, %v993_v57 }
 0x302   : > { %2007 = vpow2.f32 %v994_v58 }
 0x304   : > { %v2006_v59 = vpop.eup %2005 }
 0x305   : > { %v1104_v60 = vpop.xlane.xlu0 %1103  ;;  %v883_v61 = vsel %vm822_vm3, %v2006_v59, 0.0 }
 0x306   : > { %v1105_v62 = vsub.f32 %v1101_v44, %v1104_v60  ;;  %884 = vadd.xlane.f32.xlu0 %v883_v61  ;;  %v2000_v44 = vld [vmem:[%s2225_s12 + $0x8] sm:$0xff]   ;;  %v1808_v60 = vld [vmem:[%s2493_s25] ss:$0 sm:$0xff] }
 0x307   : > { %1920 = vmatpush3.bf16.msra.mxu1 %v2000_v44 }
 0x308   : > { %v1106_v63 = vmul.f32 1.442695, %v1105_v62  ;;  %1933 = vmatprep.subr.bf16.mxu1 %v2067_v2 }
 0x30a   : > { %2009 = vpow2.f32 %v1106_v63 }
 0x30c   : > { %v2008_v0 = vpop.eup %2007 }
 0x30d   : > { %v996_v1 = vsel %vm822_vm3, %v2008_v0, 0.0  ;;  %v1216_v6 = vpop.xlane.xlu1 %1215 }
 0x30e   : > { %997 = vadd.xlane.f32.xlu1 %v996_v1  ;;  %v1217_v7 = vsub.f32 %v1213_v51, %v1216_v6 }
 0x310   : > { %v1218_v8 = vmul.f32 1.442695, %v1217_v7 }
 0x312   : > { %2011 = vpow2.f32 %v1218_v8 }
 0x314   : > { %v2010_v3 = vpop.eup %2009 }
 0x315   : > { %v1108_v5 = vsel %vm822_vm3, %v2010_v3, 0.0 }
 0x316   : > { %1109 = vadd.xlane.f32.xlu0 %v1108_v5 }
 0x31c   : > { %v2012_v9 = vpop.eup %2011 }
 0x31d   : > { %v1220_v10 = vsel %vm822_vm3, %v2012_v9, 0.0 }
 0x31f   : > { %1002 = vrot.lane.b32.xlu1 %v2292_v11, %s2076_s22  ;;  %s2498_s22 = sld [smem:[#allocation15_spill]] }
 0x32c   : > { %889 = vrot.lane.b32.xlu0 %v2292_v11, %s2077_s14  ;;  %s2499_s14 = scalar_lea.vmem %s2498_s22, %s2204_s28 }
 0x330   : > { %1226 = vrot.lane.b32.xlu0 %v2292_v11, %s2078_s13 }
 0x343   : > { %1221 = vadd.xlane.f32.xlu1 %v1220_v10 }
 0x354   : > { %1114 = vrot.lane.b32.xlu1 %v2292_v11, %s2079_s16 }
 0x393   : > { %v885_v12 = vpop.xlane.xlu0 %884 }
 0x394   : > { %2013 = vrcp.f32 %v885_v12  ;;  %v2001_v12 = vld [vmem:[%s2242_s15] sm:$0xff]  }
 0x39b   : > { %v998_v13 = vpop.xlane.xlu1 %997 }
 0x39c   : > { %2015 = vrcp.f32 %v998_v13  ;;  %v2002_v13 = vld [vmem:[%s2242_s15 + $0x8] sm:$0xff]  }
 0x39e   : > { %v2014_v14 = vpop.eup %2013 }
 0x39f   : > { %v887_v16 = vmul.f32 %v2014_v14, %v2006_v59  ;;  %v1003_v19 = vpop.permute.xlu1 %1002 }
 0x3a0   : > { %v1008_v22 = vsel %vm894_vm4, %v1003_v19, 0  ;;  %v1813_v19 = vld [vmem:[%s2497_s23] ss:$0 sm:$0xff] }
 0x3a1   : > { %v888_v20 = vpack.c.bf16 %v887_v16, %v887_v16 }
 0x3a3   : > { %v1110_v15 = vpop.xlane.xlu0 %1109 }
 0x3a4   : > { %2017 = vrcp.f32 %v1110_v15 }
 0x3a6   : > { %v2016_v21 = vpop.eup %2015 }
 0x3a7   : > { %v890_v17 = vpop.permute.xlu0 %889  ;;  %v1000_v11 = vmul.f32 %v2016_v21, %v2008_v0 }
 0x3a8   : > { %v896_v18 = vsel %vm894_vm4, %v890_v17, 0  ;;  %v1812_v17 = vld [vmem:[%s2495_s30] ss:$0 sm:$0xff] }
 0x3a9   : > { %1876 = vmatpush3.bf16.msra.mxu0 %v896_v18  ;;  %v1001_v23 = vpack.c.bf16 %v1000_v11, %v1000_v11  ;;  %v2003_v11 = vld [vmem:[%s2251_s0] sm:$0xff]  }
 0x3aa   : > { %1887 = vmatprep.subr.bf16.mxu0 %v2067_v2 }
 0x3ab   : > { %v1227_v29 = vpop.permute.xlu0 %1226 }
 0x3ac   : > { %1878 = vmatmul.mubr.msk.bf16.vlgmr.msra.gmra.mrb[4].mxu0 %vm822_vm3, %v888_v20  ;;  %v1232_v31 = vsel %vm894_vm4, %v1227_v29, 0 }
 0x3ad   : > { %1888 = vmatpush3.bf16.msra.mxu0 %v1008_v22  ;;  %1889 = vmatprep.mubr.msk.bf16.mxu0 %vm2068_vm1, %v2067_v2 }
 0x3ae   : > { %1899 = vmatprep.subr.bf16.mxu0 %v2067_v2  ;;  %v2018_v24 = vpop.eup %2017 }
 0x3af   : > { %v1112_v26 = vmul.f32 %v2018_v24, %v2010_v3  ;;  %v1814_v24 = vld [vmem:[%s2499_s14] ss:$0 sm:$0xff] }
 0x3b1   : > { %v1113_v30 = vpack.c.bf16 %v1112_v26, %v1112_v26 }
 0x3b4   : > { %1890 = vmatmul.mubr.msk.bf16.vlgmr.msra.gmra.mrb[8].mxu0 %vm822_vm3, %v1001_v23  ;;  %v2004_v23 = vld [vmem:[%s2251_s0 + $0x8] sm:$0xff]  }
 0x3b5   : > { %1901 = vmatprep.mubr.msk.bf16.mxu0 %vm2068_vm1, %v2067_v2 }
 0x3d0   : > { %v1222_v25 = vpop.xlane.xlu1 %1221 }
 0x3d1   : > { %2019 = vrcp.f32 %v1222_v25 }
 0x3d4   : > { %v1115_v27 = vpop.permute.xlu1 %1114 }
 0x3d5   : > { %v1120_v28 = vsel %vm894_vm4, %v1115_v27, 0 }
 0x3d6   : > { %1900 = vmatpush3.bf16.msra.mxu0 %v1120_v28 }
 0x3d7   : > { %1911 = vmatprep.subr.bf16.mxu0 %v2067_v2 }
 0x3d9   : > { %1902 = vmatmul.mubr.msk.bf16.vlgmr.msra.gmra.mrb[12].mxu0 %vm822_vm3, %v1113_v30 }
 0x3da   : > { %1912 = vmatpush3.bf16.msra.mxu0 %v1232_v31  ;;  %1913 = vmatprep.mubr.msk.bf16.mxu0 %vm2068_vm1, %v2067_v2 }
 0x3db   : > { %v2020_v32 = vpop.eup %2019  ;;  %1925 = vmatprep.subr.bf16.mxu0 %v2067_v2 }
 0x3dc   : > { %v1224_v33 = vmul.f32 %v2020_v32, %v2012_v9 }
 0x3de   : > { %v1225_v34 = vpack.c.bf16 %v1224_v33, %v1224_v33 }
 0x3e1   : > { %1914 = vmatmul.mubr.msk.bf16.vlgmr.msra.gmra.mrb[16].mxu0 %vm822_vm3, %v1225_v34 }
 0x3e2   : > { %1929 = vmatprep.mubr.msk.bf16.mxu0 %vm2068_vm1, %v2067_v2  ;;  %1926 = vmatpush3.bf16.msra.mxu0 %v2001_v12 }
 0x3e3   : > { %1927 = vmatprep.subr.bf16.mxu0 %v2067_v2 }
 0x3e6   : > { %1928 = vmatpush3.bf16.msra.mxu0 %v2002_v13 }
 0x47f   : > { %v932_v35 = vpop.f32.mrb[4].mxu0 }
 0x480   : > { %v1879_v36 = vpop.f32.mrb[5].mxu0 }
 0x481   : > { %v935_v37 = vpop.f32.mrb[6].mxu0 }
 0x482   : > { %v1880_v38 = vpop.f32.mrb[7].mxu0 }
 0x487   : > { %v1044_v39 = vpop.f32.mrb[8].mxu0 }
 0x488   : > { %1275 = vrot.lane.b32.xlu1 %v1044_v39, %s2080_s4  ;;  %v1891_v40 = vpop.f32.mrb[9].mxu0 }
 0x489   : > { %v1047_v41 = vpop.f32.mrb[10].mxu0 }
 0x48a   : > { %v1892_v42 = vpop.f32.mrb[11].mxu0 }
 0x4ac   : > { %v1156_v45 = vpop.f32.mrb[12].mxu0 }
 0x4ad   : > { %1279 = vrot.lane.b32.xlu0 %v1156_v45, %s2081_s6  ;;  %v1903_v46 = vpop.f32.mrb[13].mxu0 }
 0x4ae   : > { %v1159_v47 = vpop.f32.mrb[14].mxu0 }
 0x4af   : > { %v1904_v48 = vpop.f32.mrb[15].mxu0 }
 0x4b0   : > { %v1822_v48 = vld [vmem:[%s727_s17] ss:$0 sm:$0xff]  ;;  %s2503_s17 = sld [smem:[#allocation18_spill]] (!%p1824_p8) }
 0x4b4   : > { %v1268_v49 = vpop.f32.mrb[16].mxu0 }
 0x4b5   : > { %1283 = vrot.lane.b32.xlu1 %v1268_v49, %s2082_s8  ;;  %v1915_v50 = vpop.f32.mrb[17].mxu0 }
 0x4b6   : > { %v1271_v51 = vpop.f32.mrb[18].mxu0  ;;  %v1823_v50 = vld [vmem:[%s730_s7] ss:$0 sm:$0xff] }
 0x4b7   : > { %v1916_v52 = vpop.f32.mrb[19].mxu0 }
 0x4fa   : > { %v1276_v53 = vpop.permute.xlu1 %1275 }
 0x4fb   : > { %v1286_v55 = vsel %vm822_vm3, %v932_v35, %v1276_v53 }
 0x51f   : > { %v1280_v54 = vpop.permute.xlu0 %1279 }
 0x520   : > { %v1288_v56 = vsel %vm1287_vm5, %v1286_v55, %v1280_v54 }
 0x527   : > { %v1284_v57 = vpop.permute.xlu1 %1283 }
 0x528   : > { %v1290_v58 = vsel %vm1289_vm6, %v1288_v56, %v1284_v57 }
 0x529   : > { %v1291_v59 = vpack.c.bf16 %v1290_v58, %v1290_v58 }
 0x52b   : > { %1922 = vmatmul.mubr.msk.bf16.vlgmr.msra.gmra.mrb[16].mxu1 %vm769_vm2, %v1291_v59 }
 0x52c   : > { %1937 = vmatprep.mubr.msk.bf16.mxu1 %vm2068_vm1, %v2067_v2  ;;  %1934 = vmatpush3.bf16.msra.mxu1 %v2003_v11 }
 0x52d   : > { %1935 = vmatprep.subr.bf16.mxu1 %v2067_v2  ;;  %v1818_v2 = vld [vmem:[%s724_s19] ss:$0 sm:$0xff] }
 0x530   : > { %1936 = vmatpush3.bf16.msra.mxu1 %v2004_v23 }
 0x5fe   : > { %v1347_v61 = vpop.f32.mrb[16].mxu1 }
 0x5ff   : > { %v1348_v62 = vadd.f32 %v1808_v60, %v1347_v61  ;;  %v1923_v63 = vpop.f32.mrb[17].mxu1 }
 0x600   : > { %v1350_v0 = vpop.f32.mrb[18].mxu1  ;;  %v1825_v63 = vld [vmem:[%s2503_s17] ss:$0 sm:$0xff] (!%p1824_p8) }
 0x601   : > { %v1924_v1 = vpop.f32.mrb[19].mxu1  ;;  %v1353_v3 = vadd.f32 %v1348_v62, %v2276_v4 }
 0x602   : > { %v1826_v1 = vld [vmem:[%s2504_s27] ss:$0 sm:$0xff] (!%p1824_p8) }
 0x603   : > { %v1356_v5 = vsel %vm769_vm2, %v1353_v3, 0.0 }
 0x604   : > { %1357 = vadd.xlane.f32.xlu0 %v1356_v5 }
 0x691   : > { %v1358_v6 = vpop.xlane.xlu0 %1357 }
 0x692   : > { %v1360_v7 = vmul.f32 0.03125, %v1358_v6 }
 0x694   : > { %v1361_v8 = vsub.f32 %v1353_v3, %v1360_v7 }
 0x696   : > { %v1362_v9 = vmul.f32 %v1361_v8, %v1361_v8 }
 0x698   : > { %v1363_v10 = vsel %vm769_vm2, %v1362_v9, 0.0 }
 0x699   : > { %1364 = vadd.xlane.f32.xlu1 %v1363_v10 }
 0x726   : > { %v1365_v4 = vpop.xlane.xlu1 %1364 }
 0x727   : > { %v1366_v14 = vmul.f32 0.03125, %v1365_v4 }
 0x729   : > { %v1367_v15 = vadd.f32 1e-05, %v1366_v14 }
 0x72b   : > { %2021 = vrsqrt.f32 %v1367_v15 }
 0x735   : > { %v2022_v16 = vpop.eup %2021 }
 0x736   : > { %v1369_v18 = vmul.f32 %v2022_v16, %v1361_v8 }
 0x738   : > { %v1376_v20 = vmul.f32 %v1812_v17, %v1369_v18 }
 0x73a   : > { %v1383_v21 = vadd.f32 %v1813_v19, %v1376_v20 }
 0x73c   : > { %v1384_v22 = vpack.c.bf16 %v1383_v21, %v1383_v21 }
 0x73e   : > { %1930 = vmatmul.mubr.msk.bf16.vlgmr.msra.gmra.mrb[20].mxu0 %vm769_vm2, %v1384_v22 }
 0x811   : > { %v1445_v25 = vpop.f32.mrb[20].mxu0 }
 0x812   : > { %v1446_v26 = vadd.f32 %v1814_v24, %v1445_v25  ;;  %v1931_v27 = vpop.f32.mrb[21].mxu0 }
 0x813   : > { %v1448_v28 = vpop.f32.mrb[22].mxu0 }
 0x814   : > { %v1451_v29 = vmax.f32 %v1446_v26, 0.0  ;;  %v1932_v30 = vpop.f32.mrb[23].mxu0 }
 0x816   : > { %v1452_v31 = vpack.c.bf16 %v1451_v29, %v1451_v29 }
 0x818   : > { %1938 = vmatmul.mubr.msk.bf16.vlgmr.msra.gmra.mrb[20].mxu1 %vm769_vm2, %v1452_v31 }
 0x8eb   : > { %v1513_v32 = vpop.f32.mrb[20].mxu1 }
 0x8ec   : > { %v1514_v33 = vadd.f32 %v1818_v2, %v1513_v32  ;;  %v1939_v34 = vpop.f32.mrb[21].mxu1 }
 0x8ed   : > { %v1516_v35 = vpop.f32.mrb[22].mxu1 }
 0x8ee   : > { %v1940_v36 = vpop.f32.mrb[23].mxu1  ;;  %v1519_v37 = vadd.f32 %v1514_v33, %v1383_v21 }
 0x8f0   : > { %v1522_v38 = vsel %vm769_vm2, %v1519_v37, 0.0 }
 0x8f1   : > { %1523 = vadd.xlane.f32.xlu0 %v1522_v38 }
 0x97e   : > { %v1524_v39 = vpop.xlane.xlu0 %1523 }
 0x97f   : > { %v1525_v40 = vmul.f32 0.03125, %v1524_v39 }
 0x981   : > { %v1526_v41 = vsub.f32 %v1519_v37, %v1525_v40 }
 0x983   : > { %v1527_v42 = vmul.f32 %v1526_v41, %v1526_v41 }
 0x985   : > { %v1528_v43 = vsel %vm769_vm2, %v1527_v42, 0.0 }
 0x986   : > { %1529 = vadd.xlane.f32.xlu0 %v1528_v43 }
 0xa13   : > { %v1530_v44 = vpop.xlane.xlu0 %1529 }
 0xa14   : > { %v1531_v45 = vmul.f32 0.03125, %v1530_v44 }
 0xa16   : > { %v1532_v46 = vadd.f32 1e-05, %v1531_v45 }
 0xa18   : > { %2023 = vrsqrt.f32 %v1532_v46 }
 0xa22   : > { %v2024_v47 = vpop.eup %2023 }
 0xa23   : > { %v1534_v49 = vmul.f32 %v2024_v47, %v1526_v41  ;;  %1553 = sbr.rel (%p1824_p8) target bundleno = 2917 (0xb65), region = 92 }
 0xa25   : > { %v1541_v51 = vmul.f32 %v1822_v48, %v1534_v49 }
 0xa27   : > { %v1548_v52 = vadd.f32 %v1823_v50, %v1541_v51 }
 0xa29   : > { %1549 = vst.msk [vmem:[#allocation2] sm:$0xff] %vm769_vm2, %v1548_v52  ;;  %v1556_v53 = vsel (!%p1824_p8), %vm769_vm2, %v1548_v52, 0.0 }
 0xa2a   : > { %1557 = vadd.xlane.f32.xlu0 %v1556_v53 }
 0xab7   : > { %v1558_v54 = vpop.xlane.xlu0 %1557 }
 0xab8   : > { %v1559_v55 = vmul.f32 0.03125, %v1558_v54 }
 0xaba   : > { %v1560_v56 = vsub.f32 %v1548_v52, %v1559_v55 }
 0xabc   : > { %v1561_v57 = vmul.f32 %v1560_v56, %v1560_v56 }
 0xabe   : > { %v1562_v58 = vsel %vm769_vm2, %v1561_v57, 0.0 }
 0xabf   : > { %1563 = vadd.xlane.f32.xlu0 %v1562_v58 }
 0xb4c   : > { %v1564_v59 = vpop.xlane.xlu0 %1563 }
 0xb4d   : > { %v1565_v60 = vmul.f32 0.03125, %v1564_v59 }
 0xb4f   : > { %v1566_v61 = vadd.f32 1e-05, %v1565_v60 }
 0xb51   : > { %2025 = vrsqrt.f32 %v1566_v61 }
 0xb5b   : > { %v2026_v62 = vpop.eup %2025 }
 0xb5c   : > { %v1568_v0 = vmul.f32 %v2026_v62, %v1560_v56 }
 0xb5e   : > { %v1575_v3 = vmul.f32 %v1825_v63, %v1568_v0 }
 0xb60   : > { %v1582_v5 = vadd.f32 %v1826_v1, %v1575_v3 }
 0xb62   : > { %v1583_v6 = vpack.c.bf16 %v1582_v5, %v1582_v5 }
 0xb64   : > { %1585 = vst.msk [vmem:[%s2269_s9] sm:$0xf] %vm1584_vm7, %v1583_v6 }
 0xb65 PF: > { %s2505_s24 = sld [smem:[#allocation6_spill]]  ;;  %s2506_s21 = sld [smem:[#allocation4_spill]] }
 0xb66   : > { %s2507_s22 = sld [smem:[#allocation5_spill]]  ;;  %s2508_s23 = sld [smem:[#allocation7_spill]] }
 0xb6b   : > { %s26_s25 = sadd.s32 1, %s2505_s24   ;;  %s2509_s24 = sld [smem:[#allocation8_spill]] }
 0xb6c   : > { %p23_p9 = scmp.ge.s32.totalorder %s26_s25, 6  }
 0xb6e   :  { %25 = sbr.rel (!%p23_p9) target bundleno = 13 (0xd), region = 161 }

// kernel: transformer_forward.4
= control target key start
LH: loop header
LB: loop body
LE: loop exit
PB: predicated region body
PF: predicated region fallthrough
CT: control target
= control target key end

     0   :  { %s3613_s27 = smov 0   ;;  %s3619_s28 = smov 0   ;;  %s4080_s0 = inlined_call_operand.vmem [shape: f32[2,8,32], index: 0, kind: input, shape index: {}]   ;;  %s4081_s1 = inlined_call_operand.vmem [shape: bf16[2,8,32], index: 1, kind: input, shape index: {}]   ;;  %s4082_s2 = inlined_call_operand.vmem [shape: f32[2,1,8], index: 2, kind: input, shape index: {}]   ;;  %s4083_s3 = inlined_call_operand.vmem [shape: f32[2,1,8], index: 3, kind: input, shape index: {}]   ;;  %s4084_s4 = inlined_call_operand.vmem [shape: bf16[2,32,96], index: 4, kind: input, shape index: {}]   ;;  %s4085_s5 = inlined_call_operand.vmem [shape: f32[2,1,96], index: 5, kind: input, shape index: {}]   ;;  %s4086_s6 = inlined_call_operand.vmem [shape: bf16[2,32,32], index: 6, kind: input, shape index: {}]   ;;  %s4087_s7 = inlined_call_operand.vmem [shape: f32[2,1,32], index: 7, kind: input, shape index: {}]   ;;  %s4088_s8 = inlined_call_operand.vmem [shape: f32[2,1,32], index: 8, kind: input, shape index: {}]   ;;  %s4089_s9 = inlined_call_operand.vmem [shape: f32[2,1,32], index: 9, kind: input, shape index: {}]   ;;  %s4090_s10 = inlined_call_operand.vmem [shape: bf16[2,32,32], index: 10, kind: input, shape index: {}]   ;;  %s4091_s11 = inlined_call_operand.vmem [shape: f32[2,1,32], index: 11, kind: input, shape index: {}]   ;;  %s4092_s12 = inlined_call_operand.vmem [shape: bf16[2,32,64], index: 12, kind: input, shape index: {}]   ;;  %s4093_s13 = inlined_call_operand.vmem [shape: f32[2,1,64], index: 13, kind: input, shape index: {}]   ;;  %s4094_s14 = inlined_call_operand.vmem [shape: bf16[2,32,32], index: 14, kind: input, shape index: {}]   ;;  %s4095_s15 = inlined_call_operand.vmem [shape: f32[2,1,32], index: 15, kind: input, shape index: {}]   ;;  %s4096_s16 = inlined_call_operand.vmem [shape: f32[2,1,32], index: 16, kind: input, shape index: {}]   ;;  %s4097_s17 = inlined_call_operand.vmem [shape: f32[2,1,32], index: 17, kind: input, shape index: {}]   ;;  %s4098_s18 = inlined_call_operand.vmem [shape: bf16[2,32,32], index: 18, kind: input, shape index: {}]   ;;  %s4099_s19 = inlined_call_operand.vmem [shape: f32[2,1,32], index: 19, kind: input, shape index: {}]   ;;  %s4100_s20 = inlined_call_operand.vmem [shape: bf16[2,32,32], index: 20, kind: input, shape index: {}]   ;;  %s4101_s21 = inlined_call_operand.vmem [shape: f32[2,1,32], index: 21, kind: input, shape index: {}]   ;;  %s4102_s22 = inlined_call_operand.vmem [shape: f32[2,1,32], index: 22, kind: input, shape index: {}]   ;;  %s4103_s23 = inlined_call_operand.vmem [shape: f32[2,1,32], index: 23, kind: input, shape index: {}]   ;;  %s4104_s24 = inlined_call_operand.vmem [shape: f32[1,32], index: 24, kind: input, shape index: {}]   ;;  %s4105_s25 = inlined_call_operand.vmem [shape: f32[1,32], index: 25, kind: input, shape index: {}]   ;;  %s4106_s26 = inlined_call_operand.vmem [shape: bf16[2,8,32], index: 26, kind: output, shape index: {}]  }
   0x1   :  { %4116 = sst [smem:[#allocation14_spill]] %s4080_s0 }
   0x2   :  { %4117 = sst [smem:[#allocation15_spill]] %s4081_s1 }
   0x3   :  { %4118 = sst [smem:[#allocation16_spill]] %s4082_s2 }
   0x4   :  { %4119 = sst [smem:[#allocation17_spill]] %s4083_s3  ;;  %s3615_s3 = smov 0  }
   0x5   :  { %4120 = sst [smem:[#allocation18_spill]] %s4084_s4 }
   0x6   :  { %4121 = sst [smem:[#allocation19_spill]] %s4085_s5 }
   0x7   :  { %4122 = sst [smem:[#allocation20_spill]] %s4086_s6 }
   0x8   :  { %4123 = sst [smem:[#allocation21_spill]] %s4087_s7  ;;  %s3617_s7 = smov 0  }
   0x9   :  { %4124 = sst [smem:[#allocation22_spill]] %s4088_s8  ;;  %s3621_s8 = smov 0  }
   0xa   :  { %4125 = sst [smem:[#allocation23_spill]] %s4089_s9 }
   0xb   :  { %4126 = sst [smem:[#allocation24_spill]] %s4090_s10 }
   0xc   :  { %4127 = sst [smem:[#allocation25_spill]] %s4092_s12 }
   0xd   :  { %4128 = sst [smem:[#allocation26_spill]] %s4094_s14 }
   0xe   :  { %4129 = sst [smem:[#allocation27_spill]] %s4096_s16 }
   0xf   :  { %4130 = sst [smem:[#allocation28_spill]] %s4097_s17 }
  0x10   :  { %4131 = sst [smem:[#allocation29_spill]] %s4098_s18 }
  0x11   :  { %4132 = sst [smem:[#allocation30_spill]] %s4100_s20 }
  0x12   :  { %4133 = sst [smem:[#allocation31_spill]] %s4101_s21 }
  0x13   :  { %4134 = sst [smem:[#allocation32_spill]] %s4102_s22 }
  0x14   :  { %4135 = sst [smem:[#allocation33_spill]] %s4103_s23 }
  0x15   :  { %4136 = sst [smem:[#allocation34_spill]] %s4104_s24 }
  0x16   :  { %4137 = sst [smem:[#allocation35_spill]] %s4105_s25 }
  0x17   :  { %4138 = sst [smem:[#allocation36_spill]] %s4106_s26 }
  0x18 LB: > { %4139 = sst [smem:[#allocation3_spill]] %s3444_s27  ;;  %s45_s4 = sadd.s32 1, %s3452_s7  ;;  %s3460_s8 = sphi %s3621_s8, %s36_s8   ;;  %s3456_s28 = sphi %s3619_s28, %s4207_s28   ;;  %s3452_s7 = sphi %s3617_s7, %s4206_s7   ;;  %s3448_s3 = sphi %s3615_s3, %s4205_s3   ;;  %s3444_s27 = sphi %s3613_s27, %s4204_s27  }
  0x19   : > { %4140 = sst [smem:[#allocation4_spill]] %s3452_s7  ;;  %s48_s29 = sadd.s32 1, %s3456_s28 }
  0x1a   : > { %4141 = sst [smem:[#allocation5_spill]] %s3456_s28  ;;  %p46_p0 = scmp.ge.s32.totalorder %s45_s4, 2 }
  0x1b   : > { %4142 = sst [smem:[#allocation6_spill]] %s3460_s8  ;;  %p3024_p1 = scmp.ge.s32.totalorder %s3460_s8, 1 }
  0x1c   : > { %p922_p2 = scmp.lt.s32.totalorder %s3460_s8, 5  ;;  %s4209_s4 = smov (%p46_p0, %s45_s4), 0 }
  0x1d   : > { %4143 = sst [smem:[#allocation7_spill]] %s4209_s4  ;;  %s4211_s29 = smov (!%p46_p0, %s48_s29), %s3456_s28 }
  0x1e   : > { %p923_p3 = pnand %p3024_p1, %p922_p2  ;;  %p50_p4 = scmp.ge.s32.totalorder %s4211_s29, 2 }
  0x20   : > { %s4213_s29 = smov (%p50_p4, %s4211_s29), 0  ;;  %926 = sbr.rel (%p923_p3) target bundleno = 4687 (0x124f), region = 124 }
  0x21   : > { %4144 = sst [smem:[#allocation8_spill]] %s4213_s29 }
  0x27   : > { %p1074_p5 = scmp.lt.s32.totalorder %s3448_s3, 1  ;;  %p1088_p6 = scmp.lt.s32.totalorder %s3444_s27, 1 }
  0x28   : > { %s4146_s10 = sld [smem:[#allocation14_spill]]  ;;  %s4147_s4 = sld [smem:[#allocation15_spill]] }
  0x29   : > { %s4215_s3 = smov (!%p1074_p5, %s3448_s3), 1  ;;  %s4154_s8 = sld [smem:[#allocation20_spill]] }
  0x2a   : > { %4145 = sst [smem:[#allocation9_spill]] %s4215_s3  ;;  %s3025_s9 = sshll.u32 %s4215_s3, 3 }
  0x2b   : > { %s3649_s0 = scalar_select %p1088_p6, %s3444_s27, 1 }
  0x2c   : > { %s3026_s30 = sshll.u32 %s4215_s3, 2  ;;  %s4160_s12 = sld [smem:[#allocation25_spill]] }
  0x2d   : > { %s3100_s21 = sshll.u32 %s3649_s0, 4  ;;  %s4161_s14 = sld [smem:[#allocation26_spill]] }
  0x2e   : > { %s1077_s6 = scalar_lea.vmem %s4146_s10, %s3025_s9  ;;  %s3659_s28 = scalar_lea.vmem %s4147_s4, %s3026_s30 }
  0x2f   : > { %4148 = sst [smem:[#allocation10_spill]] %s3659_s28  ;;  %s4152_s4 = sld [smem:[#allocation18_spill]] }
  0x30   : > { %s3682_s25 = scalar_lea.vmem %s4154_s8, %s3100_s21  ;;  %s4159_s28 = sld [smem:[#allocation24_spill]] }
  0x31   : > { %4155 = sst [smem:[#allocation12_spill]] %s3682_s25  ;;  %s4164_s18 = sld [smem:[#allocation29_spill]] }
  0x32   : > { %s3708_s22 = scalar_lea.vmem %s4160_s12, %s3100_s21  ;;  %s4167_s26 = sld [smem:[#allocation31_spill]] }
  0x33   : > { %s3717_s10 = scalar_lea.vmem %s4161_s14, %s3100_s21  ;;  %s4170_s29 = sld [smem:[#allocation36_spill]] }
  0x34   : > { %s4171_s12 = sld [smem:[#allocation3_spill]] }
  0x35   : > { %s3677_s1 = scalar_lea.vmem %s4152_s4, %s3100_s21  ;;  %s4168_s4 = sld [smem:[#allocation32_spill]] }
  0x36   : > { %4153 = sst [smem:[#allocation11_spill]] %s3677_s1  ;;  %s3699_s7 = scalar_lea.vmem %s4159_s28, %s3100_s21 }
  0x37   : > { %s3734_s20 = scalar_lea.vmem %s4164_s18, %s3100_s21  ;;  %s4166_s1 = sld [smem:[#allocation30_spill]] }
  0x38   : > { %4165 = sst [smem:[#allocation13_spill]] %s3734_s20  ;;  %s1155_s14 = scalar_lea.vmem %s4167_s26, %s3649_s0 }
  0x39   : > { %s4169_s18 = sld [smem:[#allocation33_spill]]  ;;  %s3760_s2 = scalar_lea.vmem %s4170_s29, %s3026_s30 }
  0x3a   : > { %p3042_p7 = scmp.ne.s32.totalorder %s4171_s12, 0 }
  0x3b   : > { %s1158_s17 = scalar_lea.vmem %s4168_s4, %s3649_s0  ;;  %v1171_v0 = vld [vmem:[%s1077_s6] sm:$0xff] (!%p3042_p7)  ;;  %vm1172_vm0 = vcmask (!%p3042_p7), 261120  }
  0x3c   : > { %1170 = sbr.rel (%p3042_p7) target bundleno = 67 (0x43), region = 128  ;;  %1173 = vst.msk [vmem:[#allocation2] sm:$0xff] (!%p3042_p7), %vm1172_vm0, %v1171_v0 }
  0x3d   : > { %s3743_s28 = scalar_lea.vmem %s4166_s1, %s3100_s21 }
  0x3f   : > { %s1161_s16 = scalar_lea.vmem %s4169_s18, %s3649_s0 }
  0x43 PF: > { %s4172_s21 = sld [smem:[#allocation11_spill]]  ;;  %v3462_v2 = vmov 0.0   ;;  %vm3463_vm1 = vmmov 0   ;;  %v3769_v4 = vld [vmem:[#allocation2] sm:$0xff]  ;;  %vm1215_vm2 = vcmask 261120   ;;  %s4173_s6 = sld [smem:[#allocation19_spill]]  ;;  %v1176_v24 = vlaneseq }
  0x44   : > { %3160 = vmatprep.subr.bf16.mxu0 %v3462_v2  ;;  %3168 = vmatprep.subr.bf16.mxu1 %v3462_v2  ;;  %v1191_v5 = vpack.c.bf16 %v3769_v4, %v3769_v4  ;;  %s3464_s26 = smov 120   ;;  %s3465_s20 = smov 96   ;;  %vm1268_vm3 = vcmask 64512   ;;  %vm1334_vm5 = vcmask 1043456   ;;  %vm1727_vm6 = vcmask 130048  }
  0x45   : > { %3164 = vmatprep.mubr.msk.bf16.mxu0 %vm3463_vm1, %v3462_v2  ;;  %3170 = vmatprep.mubr.msk.bf16.mxu1 %vm3463_vm1, %v3462_v2  ;;  %s3466_s3 = smov 80   ;;  %s3467_s1 = smov 88   ;;  %v1177_v25 = vshrl.u32 %v1176_v24, 7  ;;  %v1179_v26 = vand.u32 127, %v1176_v24  ;;  %vm1729_vm7 = vcmask 195584  }
  0x46   : > { %s3468_s25 = smov 72   ;;  %s3469_s8 = smov 112  }
  0x47   : > { %s3470_s27 = smov 104   ;;  %s4175_s23 = sld [smem:[#allocation9_spill]]  ;;  %vm1180_vm4 = vcmp.gt.s32.totalorder %v1179_v26, %v1177_v25 }
  0x48   : > { %v1181_v27 = vsel %vm1180_vm4, -1e+30, %v3462_v2  ;;  %s4176_s5 = sld [smem:[#allocation16_spill]]  ;;  %s3471_s12 = smov 56  }
  0x49   : > { %v3368_v1 = vld [vmem:[%s4172_s21] sm:$0xff]   ;;  %v3369_v3 = vld [vmem:[%s4172_s21 + $0x8] sm:$0xff]   ;;  %s4174_s4 = scalar_lea.vmem %s4173_s6, %s3649_s0  ;;  %s3472_s21 = smov 64  }
  0x4a   : > { %3161 = vmatpush3.bf16.msra.mxu0 %v3368_v1  ;;  %v3044_v6 = vld [vmem:[%s4174_s4] ss:$0 sm:$0xff]  ;;  %s3473_s18 = smov 40   ;;  %s3474_s30 = smov 48  }
  0x4b   : > { %3162 = vmatprep.subr.bf16.mxu0 %v3462_v2  ;;  %s4178_s6 = sld [smem:[#allocation12_spill]]  ;;  %s3475_s4 = smov 8  }
  0x4c   : > { %s3476_s9 = smov 16   ;;  %s3477_s24 = smov 24  }
  0x4e   : > { %3163 = vmatpush3.bf16.msra.mxu0 %v3369_v3  ;;  %s4177_s29 = scalar_lea.vmem %s4176_s5, %s4175_s23 }
  0x4f   : > { %3174 = vmatprep.subr.bf16.mxu0 %v3462_v2  ;;  %v3043_v28 = vld [vmem:[%s4177_s29] ss:$0 sm:$0xff]  ;;  %s4187_s29 = scalar_lea.vmem %s4091_s11, %s3649_s0 }
  0x50   : > { %v1189_v29 = vadd.f32 %v3043_v28, %v1181_v27 }
  0x51   : > { %3165 = vmatmul.mubr.msk.bf16.vlgmr.msra.gmra.mrb[0].mxu0 %vm1215_vm2, %v1191_v5 }
  0x52   : > { %3176 = vmatprep.mubr.msk.bf16.mxu0 %vm3463_vm1, %v3462_v2 }
 0x124   : > { %v1253_v7 = vpop.f32.mrb[0].mxu0 }
 0x125   : > { %v1254_v8 = vadd.f32 %v3044_v6, %v1253_v7  ;;  %v3166_v9 = vpop.f32.mrb[1].mxu0 }
 0x126   : > { %v1256_v10 = vpop.f32.mrb[2].mxu0 }
 0x127   : > { %v3785_v11 = vpack.c.bf16 %v1254_v8, %v1254_v8  ;;  %v3167_v12 = vpop.f32.mrb[3].mxu0 }
 0x129   : > { %1378 = vrot.lane.b32.xlu1 %v3785_v11, %s3464_s26  ;;  %1266 = vrot.lane.b32.xlu0 %v3785_v11, %s3465_s20 }
 0x12d   : > { %1492 = vrot.lane.b32.xlu1 %v3785_v11, %s3466_s3  ;;  %1380 = vrot.lane.b32.xlu0 %v3785_v11, %s3467_s1 }
 0x131   : > { %1604 = vrot.lane.b32.xlu1 %v3785_v11, %s3468_s25  ;;  %1490 = vrot.lane.b32.xlu0 %v3785_v11, %s3469_s8 }
 0x135   : > { %1602 = vrot.lane.b32.xlu0 %v3785_v11, %s3470_s27 }
 0x19b   : > { %v1267_v13 = vpop.permute.xlu0 %1266  ;;  %v1379_v16 = vpop.permute.xlu1 %1378 }
 0x19c   : > { %v1273_v14 = vsel %vm1268_vm3, %v1267_v13, 0 }
 0x19d   : > { %3169 = vmatpush3.bf16.xpose.msra.mxu1 %v1273_v14 }
 0x19e   : > { %3180 = vmatprep.subr.bf16.mxu1 %v3462_v2 }
 0x19f   : > { %v1381_v15 = vpop.permute.xlu0 %1380  ;;  %v1493_v18 = vpop.permute.xlu1 %1492 }
 0x1a0   : > { %v1386_v17 = vsel %vm1268_vm3, %v1381_v15, 0  ;;  %v1498_v19 = vsel %vm1268_vm3, %v1493_v18, 0 }
 0x1a3   : > { %v1605_v20 = vpop.permute.xlu1 %1604  ;;  %v1491_v21 = vpop.permute.xlu0 %1490 }
 0x1a4   : > { %3171 = vmatmul.mubr.msk.bf16.vlgmr.msra.gmra.mrb[0].mxu1 %vm1268_vm3, %v3785_v11  ;;  %v1610_v22 = vsel %vm1268_vm3, %v1605_v20, 0 }
 0x1a5   : > { %3181 = vmatpush3.bf16.xpose.msra.mxu1 %v1386_v17  ;;  %3182 = vmatprep.mubr.msk.bf16.mxu1 %vm3463_vm1, %v3462_v2 }
 0x1a6   : > { %3192 = vmatprep.subr.bf16.mxu1 %v3462_v2 }
 0x1a7   : > { %v1603_v23 = vpop.permute.xlu0 %1602 }
 0x1ac   : > { %3183 = vmatmul.mubr.msk.bf16.vlgmr.msra.gmra.mrb[4].mxu1 %vm1268_vm3, %v1379_v16 }
 0x1ad   : > { %3193 = vmatpush3.bf16.xpose.msra.mxu1 %v1498_v19  ;;  %3194 = vmatprep.mubr.msk.bf16.mxu1 %vm3463_vm1, %v3462_v2 }
 0x1ae   : > { %3204 = vmatprep.subr.bf16.mxu1 %v3462_v2 }
 0x1b4   : > { %3195 = vmatmul.mubr.msk.bf16.vlgmr.msra.gmra.mrb[8].mxu1 %vm1268_vm3, %v1491_v21 }
 0x1b5   : > { %3205 = vmatpush3.bf16.xpose.msra.mxu1 %v1610_v22  ;;  %3206 = vmatprep.mubr.msk.bf16.mxu1 %vm3463_vm1, %v3462_v2 }
 0x1b6   : > { %3216 = vmatprep.subr.bf16.mxu1 %v3462_v2 }
 0x1bc   : > { %3207 = vmatmul.mubr.msk.bf16.vlgmr.msra.gmra.mrb[12].mxu1 %vm1268_vm3, %v1603_v23 }
 0x1bd   : > { %3220 = vmatprep.mubr.msk.bf16.mxu1 %vm3463_vm1, %v3462_v2 }
 0x277   : > { %v1309_v30 = vpop.f32.mrb[0].mxu1 }
 0x278   : > { %v1315_v31 = vmul.f32 0.35355338, %v1309_v30  ;;  %v3172_v32 = vpop.f32.mrb[1].mxu1 }
 0x279   : > { %v1312_v33 = vpop.f32.mrb[2].mxu1 }
 0x27a   : > { %v3173_v34 = vpop.f32.mrb[3].mxu1  ;;  %v1316_v35 = vadd.f32 %v1315_v31, %v1189_v29 }
 0x27c   : > { %v1317_v36 = vsel %vm1268_vm3, %v1316_v35, -inf }
 0x27d   : > { %1318 = vmax.xlane.f32.xlu1 %v1317_v36 }
 0x27f   : > { %v1422_v37 = vpop.f32.mrb[4].mxu1 }
 0x280   : > { %v1428_v38 = vmul.f32 0.35355338, %v1422_v37  ;;  %v3184_v39 = vpop.f32.mrb[5].mxu1 }
 0x281   : > { %v1425_v40 = vpop.f32.mrb[6].mxu1 }
 0x282   : > { %v3185_v41 = vpop.f32.mrb[7].mxu1  ;;  %v1429_v42 = vadd.f32 %v1428_v38, %v1189_v29 }
 0x284   : > { %v1430_v43 = vsel %vm1268_vm3, %v1429_v42, -inf }
 0x285   : > { %1431 = vmax.xlane.f32.xlu0 %v1430_v43 }
 0x287   : > { %v1534_v44 = vpop.f32.mrb[8].mxu1 }
 0x288   : > { %v1540_v45 = vmul.f32 0.35355338, %v1534_v44  ;;  %v3196_v46 = vpop.f32.mrb[9].mxu1 }
 0x289   : > { %v1537_v47 = vpop.f32.mrb[10].mxu1 }
 0x28a   : > { %v3197_v48 = vpop.f32.mrb[11].mxu1  ;;  %v1541_v49 = vadd.f32 %v1540_v45, %v1189_v29 }
 0x28b   : > { %v3370_v48 = vld [vmem:[%s4178_s6] sm:$0xff]  }
 0x28c   : > { %v1542_v50 = vsel %vm1268_vm3, %v1541_v49, -inf  ;;  %3217 = vmatpush3.bf16.msra.mxu1 %v3370_v48 }
 0x28d   : > { %1543 = vmax.xlane.f32.xlu0 %v1542_v50  ;;  %3218 = vmatprep.subr.bf16.mxu1 %v3462_v2 }
 0x28f   : > { %v1646_v51 = vpop.f32.mrb[12].mxu1 }
 0x290   : > { %v1652_v52 = vmul.f32 0.35355338, %v1646_v51  ;;  %v3208_v53 = vpop.f32.mrb[13].mxu1 }
 0x291   : > { %v1649_v54 = vpop.f32.mrb[14].mxu1 }
 0x292   : > { %v3209_v55 = vpop.f32.mrb[15].mxu1  ;;  %v1653_v56 = vadd.f32 %v1652_v52, %v1189_v29 }
 0x294   : > { %v1654_v57 = vsel %vm1268_vm3, %v1653_v56, -inf }
 0x295   : > { %1655 = vmax.xlane.f32.xlu1 %v1654_v57 }
 0x30a   : > { %v1319_v58 = vpop.xlane.xlu1 %1318 }
 0x30b   : > { %v1320_v59 = vsub.f32 %v1316_v35, %v1319_v58 }
 0x30d   : > { %v1321_v60 = vmul.f32 1.442695, %v1320_v59 }
 0x30f   : > { %3382 = vpow2.f32 %v1321_v60 }
 0x312   : > { %v1432_v61 = vpop.xlane.xlu0 %1431 }
 0x313   : > { %v1433_v62 = vsub.f32 %v1429_v42, %v1432_v61 }
 0x315   : > { %v1434_v63 = vmul.f32 1.442695, %v1433_v62 }
 0x317   : > { %3384 = vpow2.f32 %v1434_v63 }
 0x319   : > { %v3383_v0 = vpop.eup %3382 }
 0x31a   : > { %v1544_v1 = vpop.xlane.xlu0 %1543  ;;  %v1323_v3 = vsel %vm1268_vm3, %v3383_v0, 0.0 }
 0x31b   : > { %v1545_v5 = vsub.f32 %v1541_v49, %v1544_v1  ;;  %1324 = vadd.xlane.f32.xlu0 %v1323_v3  ;;  %v3371_v49 = vld [vmem:[%s4178_s6 + $0x8] sm:$0xff]   ;;  %s4182_s6 = sld [smem:[#allocation22_spill]] }
 0x31c   : > { %3219 = vmatpush3.bf16.msra.mxu1 %v3371_v49 }
 0x31d   : > { %v1546_v6 = vmul.f32 1.442695, %v1545_v5  ;;  %3232 = vmatprep.subr.bf16.mxu1 %v3462_v2 }
 0x31f   : > { %3386 = vpow2.f32 %v1546_v6 }
 0x321   : > { %v3385_v7 = vpop.eup %3384  ;;  %s4183_s5 = scalar_lea.vmem %s4182_s6, %s3649_s0  ;;  %s4196_s6 = scalar_lea.vmem %s4099_s19, %s3649_s0 }
 0x322   : > { %v1436_v8 = vsel %vm1268_vm3, %v3385_v7, 0.0  ;;  %v1656_v12 = vpop.xlane.xlu1 %1655 }
 0x323   : > { %1437 = vadd.xlane.f32.xlu1 %v1436_v8  ;;  %v1657_v13 = vsub.f32 %v1653_v56, %v1656_v12 }
 0x325   : > { %v1658_v14 = vmul.f32 1.442695, %v1657_v13 }
 0x327   : > { %3388 = vpow2.f32 %v1658_v14 }
 0x329   : > { %v3387_v9 = vpop.eup %3386 }
 0x32a   : > { %v1548_v10 = vsel %vm1268_vm3, %v3387_v9, 0.0 }
 0x32b   : > { %1549 = vadd.xlane.f32.xlu0 %v1548_v10 }
 0x331   : > { %v3389_v15 = vpop.eup %3388 }
 0x332   : > { %v1660_v16 = vsel %vm1268_vm3, %v3389_v15, 0.0 }
 0x334   : > { %1442 = vrot.lane.b32.xlu1 %v3785_v11, %s3471_s12  ;;  %s4179_s12 = sld [smem:[#allocation21_spill]] }
 0x341   : > { %1329 = vrot.lane.b32.xlu0 %v3785_v11, %s3472_s21  ;;  %s4180_s21 = scalar_lea.vmem %s4179_s12, %s3649_s0 }
 0x342   : > { %v3056_v1 = vld [vmem:[%s4180_s21] ss:$0 sm:$0xff]  ;;  %s4184_s21 = sld [smem:[#allocation23_spill]] }
 0x345   : > { %1666 = vrot.lane.b32.xlu0 %v3785_v11, %s3473_s18  ;;  %s4181_s18 = sld [smem:[#allocation10_spill]] }
 0x358   : > { %1661 = vadd.xlane.f32.xlu1 %v1660_v16 }
 0x369   : > { %1554 = vrot.lane.b32.xlu1 %v3785_v11, %s3474_s30  ;;  %s4186_s30 = scalar_lea.vmem %s4093_s13, %s3649_s0 }
 0x3a8   : > { %v1325_v17 = vpop.xlane.xlu0 %1324 }
 0x3a9   : > { %3390 = vrcp.f32 %v1325_v17  ;;  %v3372_v17 = vld [vmem:[%s3708_s22] sm:$0xff]  }
 0x3b0   : > { %v1438_v18 = vpop.xlane.xlu1 %1437 }
 0x3b1   : > { %3392 = vrcp.f32 %v1438_v18  ;;  %v3373_v18 = vld [vmem:[%s3708_s22 + $0x8] sm:$0xff]  }
 0x3b3   : > { %v3391_v19 = vpop.eup %3390 }
 0x3b4   : > { %v1327_v21 = vmul.f32 %v3391_v19, %v3383_v0  ;;  %v1443_v24 = vpop.permute.xlu1 %1442  ;;  %v3374_v19 = vld [vmem:[%s3699_s7] sm:$0xff]  }
 0x3b5   : > { %v1448_v27 = vsel %vm1334_vm5, %v1443_v24, 0 }
 0x3b6   : > { %v1328_v25 = vpack.c.bf16 %v1327_v21, %v1327_v21 }
 0x3b8   : > { %v1550_v20 = vpop.xlane.xlu0 %1549 }
 0x3b9   : > { %3394 = vrcp.f32 %v1550_v20  ;;  %v3375_v20 = vld [vmem:[%s3699_s7 + $0x8] sm:$0xff]  }
 0x3bb   : > { %v3393_v26 = vpop.eup %3392 }
 0x3bc   : > { %v1330_v22 = vpop.permute.xlu0 %1329  ;;  %v1440_v11 = vmul.f32 %v3393_v26, %v3385_v7 }
 0x3bd   : > { %v1336_v23 = vsel %vm1334_vm5, %v1330_v22, 0 }
 0x3be   : > { %3175 = vmatpush3.bf16.msra.mxu0 %v1336_v23  ;;  %v1441_v28 = vpack.c.bf16 %v1440_v11, %v1440_v11 }
 0x3bf   : > { %3186 = vmatprep.subr.bf16.mxu0 %v3462_v2 }
 0x3c0   : > { %v1667_v34 = vpop.permute.xlu0 %1666 }
 0x3c1   : > { %3177 = vmatmul.mubr.msk.bf16.vlgmr.msra.gmra.mrb[4].mxu0 %vm1268_vm3, %v1328_v25  ;;  %v1672_v36 = vsel %vm1334_vm5, %v1667_v34, 0  ;;  %v3060_v25 = vld [vmem:[%s4183_s5] ss:$0 sm:$0xff] }
 0x3c2   : > { %3187 = vmatpush3.bf16.msra.mxu0 %v1448_v27  ;;  %3188 = vmatprep.mubr.msk.bf16.mxu0 %vm3463_vm1, %v3462_v2 }
 0x3c3   : > { %3198 = vmatprep.subr.bf16.mxu0 %v3462_v2  ;;  %v3395_v29 = vpop.eup %3394 }
 0x3c4   : > { %v1552_v31 = vmul.f32 %v3395_v29, %v3387_v9 }
 0x3c6   : > { %v1553_v35 = vpack.c.bf16 %v1552_v31, %v1552_v31 }
 0x3c9   : > { %3189 = vmatmul.mubr.msk.bf16.vlgmr.msra.gmra.mrb[8].mxu0 %vm1268_vm3, %v1441_v28 }
 0x3ca   : > { %3200 = vmatprep.mubr.msk.bf16.mxu0 %vm3463_vm1, %v3462_v2 }
 0x3e5   : > { %v1662_v30 = vpop.xlane.xlu1 %1661 }
 0x3e6   : > { %3396 = vrcp.f32 %v1662_v30  ;;  %v3066_v30 = vld [vmem:[%s4186_s30] ss:$0 sm:$0xff] }
 0x3e9   : > { %v1555_v32 = vpop.permute.xlu1 %1554 }
 0x3ea   : > { %v1560_v33 = vsel %vm1334_vm5, %v1555_v32, 0 }
 0x3eb   : > { %3199 = vmatpush3.bf16.msra.mxu0 %v1560_v33 }
 0x3ec   : > { %3210 = vmatprep.subr.bf16.mxu0 %v3462_v2 }
 0x3ee   : > { %3201 = vmatmul.mubr.msk.bf16.vlgmr.msra.gmra.mrb[12].mxu0 %vm1268_vm3, %v1553_v35 }
 0x3ef   : > { %3211 = vmatpush3.bf16.msra.mxu0 %v1672_v36  ;;  %3212 = vmatprep.mubr.msk.bf16.mxu0 %vm3463_vm1, %v3462_v2 }
 0x3f0   : > { %v3397_v37 = vpop.eup %3396  ;;  %3224 = vmatprep.subr.bf16.mxu0 %v3462_v2 }
 0x3f1   : > { %v1664_v38 = vmul.f32 %v3397_v37, %v3389_v15 }
 0x3f3   : > { %v1665_v39 = vpack.c.bf16 %v1664_v38, %v1664_v38  ;;  %v3062_v38 = vld [vmem:[%s4187_s29] ss:$0 sm:$0xff] }
 0x3f6   : > { %3213 = vmatmul.mubr.msk.bf16.vlgmr.msra.gmra.mrb[16].mxu0 %vm1268_vm3, %v1665_v39 }
 0x3f7   : > { %3228 = vmatprep.mubr.msk.bf16.mxu0 %vm3463_vm1, %v3462_v2  ;;  %3225 = vmatpush3.bf16.msra.mxu0 %v3374_v19 }
 0x3f8   : > { %3226 = vmatprep.subr.bf16.mxu0 %v3462_v2 }
 0x3fb   : > { %3227 = vmatpush3.bf16.msra.mxu0 %v3375_v20 }
 0x3fc   : > { %3240 = vmatprep.subr.bf16.mxu0 %v3462_v2 }
 0x494   : > { %v1372_v40 = vpop.f32.mrb[4].mxu0 }
 0x495   : > { %v3178_v41 = vpop.f32.mrb[5].mxu0 }
 0x496   : > { %v1375_v42 = vpop.f32.mrb[6].mxu0 }
 0x497   : > { %v3179_v43 = vpop.f32.mrb[7].mxu0 }
 0x49c   : > { %v1484_v44 = vpop.f32.mrb[8].mxu0 }
 0x49d   : > { %1715 = vrot.lane.b32.xlu1 %v1484_v44, %s3475_s4  ;;  %v3190_v45 = vpop.f32.mrb[9].mxu0 }
 0x49e   : > { %v1487_v46 = vpop.f32.mrb[10].mxu0 }
 0x49f   : > { %v3191_v47 = vpop.f32.mrb[11].mxu0 }
 0x4c1   : > { %v1596_v50 = vpop.f32.mrb[12].mxu0 }
 0x4c2   : > { %1719 = vrot.lane.b32.xlu0 %v1596_v50, %s3476_s9  ;;  %v3202_v51 = vpop.f32.mrb[13].mxu0 }
 0x4c3   : > { %v1599_v52 = vpop.f32.mrb[14].mxu0 }
 0x4c4   : > { %v3203_v53 = vpop.f32.mrb[15].mxu0 }
 0x4c9   : > { %v1708_v54 = vpop.f32.mrb[16].mxu0 }
 0x4ca   : > { %1723 = vrot.lane.b32.xlu1 %v1708_v54, %s3477_s24  ;;  %v3214_v55 = vpop.f32.mrb[17].mxu0 }
 0x4cb   : > { %v1711_v56 = vpop.f32.mrb[18].mxu0 }
 0x4cc   : > { %v3215_v57 = vpop.f32.mrb[19].mxu0 }
 0x50f   : > { %v1716_v58 = vpop.permute.xlu1 %1715 }
 0x510   : > { %v1726_v60 = vsel %vm1268_vm3, %v1372_v40, %v1716_v58 }
 0x534   : > { %v1720_v59 = vpop.permute.xlu0 %1719 }
 0x535   : > { %v1728_v61 = vsel %vm1727_vm6, %v1726_v60, %v1720_v59 }
 0x53c   : > { %v1724_v62 = vpop.permute.xlu1 %1723 }
 0x53d   : > { %v1730_v63 = vsel %vm1729_vm7, %v1728_v61, %v1724_v62 }
 0x53e   : > { %v1731_v0 = vpack.c.bf16 %v1730_v63, %v1730_v63 }
 0x540   : > { %3221 = vmatmul.mubr.msk.bf16.vlgmr.msra.gmra.mrb[16].mxu1 %vm1215_vm2, %v1731_v0 }
 0x541   : > { %3236 = vmatprep.mubr.msk.bf16.mxu1 %vm3463_vm1, %v3462_v2  ;;  %3233 = vmatpush3.bf16.msra.mxu1 %v3372_v17 }
 0x542   : > { %3234 = vmatprep.subr.bf16.mxu1 %v3462_v2 }
 0x545   : > { %3235 = vmatpush3.bf16.msra.mxu1 %v3373_v18 }
 0x546   : > { %3246 = vmatprep.subr.bf16.mxu1 %v3462_v2 }
 0x613   : > { %v1787_v3 = vpop.f32.mrb[16].mxu1 }
 0x614   : > { %v1788_v5 = vadd.f32 %v3056_v1, %v1787_v3  ;;  %v3222_v6 = vpop.f32.mrb[17].mxu1 }
 0x615   : > { %v1790_v7 = vpop.f32.mrb[18].mxu1 }
 0x616   : > { %v3223_v8 = vpop.f32.mrb[19].mxu1  ;;  %v1793_v9 = vadd.f32 %v1788_v5, %v3769_v4  ;;  %v1175_v4 = vld [vmem:[%s4181_s18] sm:$0xf]  ;;  %s4185_s18 = scalar_lea.vmem %s4184_s21, %s3649_s0 }
 0x617   : > { %3237 = vmatmul.mubr.msk.bf16.vlgmr.msra.gmra.mrb[20].mxu1 %vm1215_vm2, %v1175_v4  ;;  %v3061_v27 = vld [vmem:[%s4185_s18] ss:$0 sm:$0xff]  ;;  %s4194_s18 = sld [smem:[#allocation28_spill]] }
 0x618   : > { %v1796_v10 = vsel %vm1215_vm2, %v1793_v9, 0.0  ;;  %3248 = vmatprep.mubr.msk.bf16.mxu1 %vm3463_vm1, %v3462_v2 }
 0x619   : > { %1797 = vadd.xlane.f32.xlu0 %v1796_v10 }
 0x61d   : > { %s4195_s7 = scalar_lea.vmem %s4194_s18, %s3649_s0 }
 0x6a6   : > { %v1798_v12 = vpop.xlane.xlu0 %1797 }
 0x6a7   : > { %v1800_v13 = vmul.f32 0.03125, %v1798_v12 }
 0x6a9   : > { %v1801_v14 = vsub.f32 %v1793_v9, %v1800_v13 }
 0x6ab   : > { %v1802_v15 = vmul.f32 %v1801_v14, %v1801_v14 }
 0x6ad   : > { %v1803_v16 = vsel %vm1215_vm2, %v1802_v15, 0.0 }
 0x6ae   : > { %1804 = vadd.xlane.f32.xlu1 %v1803_v16 }
 0x6ea   : > { %v1951_v31 = vpop.f32.mrb[20].mxu1 }
 0x6eb   : > { %v1952_v32 = vadd.f32 %v3066_v30, %v1951_v31  ;;  %v3238_v33 = vpop.f32.mrb[21].mxu1 }
 0x6ec   : > { %v1954_v34 = vpop.f32.mrb[22].mxu1 }
 0x6ed   : > { %v3915_v35 = vpack.c.bf16 %v1952_v32, %v1952_v32  ;;  %v3239_v36 = vpop.f32.mrb[23].mxu1 }
 0x6ef   : > { %2082 = vrot.lane.b32.xlu0 %v3915_v35, %s3464_s26  ;;  %v1968_v37 = vsel %vm1268_vm3, %v3915_v35, 0 }
 0x6f3   : > { %2194 = vrot.lane.b32.xlu0 %v3915_v35, %s3469_s8 }
 0x6f7   : > { %2306 = vrot.lane.b32.xlu0 %v3915_v35, %s3470_s27 }
 0x73b   : > { %v1805_v21 = vpop.xlane.xlu1 %1804 }
 0x73c   : > { %v1806_v22 = vmul.f32 0.03125, %v1805_v21 }
 0x73e   : > { %v1807_v23 = vadd.f32 1e-05, %v1806_v22 }
 0x740   : > { %3398 = vrsqrt.f32 %v1807_v23 }
 0x74a   : > { %v3399_v24 = vpop.eup %3398 }
 0x74b   : > { %v1809_v26 = vmul.f32 %v3399_v24, %v1801_v14 }
 0x74d   : > { %v1816_v11 = vmul.f32 %v3060_v25, %v1809_v26 }
 0x74f   : > { %v3903_v28 = vadd.f32 %v3061_v27, %v1816_v11 }
 0x751   : > { %v1824_v29 = vpack.c.bf16 %v3903_v28, %v3903_v28 }
 0x753   : > { %3229 = vmatmul.mubr.msk.bf16.vlgmr.msra.gmra.mrb[20].mxu0 %vm1215_vm2, %v1824_v29 }
 0x754   : > { %3242 = vmatprep.mubr.msk.bf16.mxu0 %vm3463_vm1, %v3462_v2  ;;  %3241 = vmatpush3.bf16.xpose.msra.mxu0 %v1968_v37 }
 0x755   : > { %3252 = vmatprep.subr.bf16.mxu0 %v3462_v2 }
 0x761   : > { %v2083_v43 = vpop.permute.xlu0 %2082 }
 0x762   : > { %v2088_v46 = vsel %vm1268_vm3, %v2083_v43, 0 }
 0x765   : > { %v2195_v47 = vpop.permute.xlu0 %2194 }
 0x766   : > { %v2200_v49 = vsel %vm1268_vm3, %v2195_v47, 0 }
 0x769   : > { %v2307_v50 = vpop.permute.xlu0 %2306 }
 0x76a   : > { %v2312_v52 = vsel %vm1268_vm3, %v2307_v50, 0 }
 0x826   : > { %v1885_v39 = vpop.f32.mrb[20].mxu0 }
 0x827   : > { %v1886_v40 = vadd.f32 %v3062_v38, %v1885_v39  ;;  %v3230_v41 = vpop.f32.mrb[21].mxu0 }
 0x828   : > { %v1888_v42 = vpop.f32.mrb[22].mxu0 }
 0x829   : > { %v1962_v44 = vpack.c.bf16 %v1886_v40, %v1886_v40  ;;  %v3231_v45 = vpop.f32.mrb[23].mxu0 }
 0x82b   : > { %2080 = vrot.lane.b32.xlu1 %v1962_v44, %s3464_s26  ;;  %3243 = vmatmul.mubr.msk.bf16.vlgmr.msra.gmra.mrb[24].mxu0 %vm1268_vm3, %v1962_v44 }
 0x82c   : > { %3253 = vmatpush3.bf16.xpose.msra.mxu0 %v2088_v46  ;;  %3254 = vmatprep.mubr.msk.bf16.mxu0 %vm3463_vm1, %v3462_v2 }
 0x82d   : > { %3264 = vmatprep.subr.bf16.mxu0 %v3462_v2 }
 0x82f   : > { %2192 = vrot.lane.b32.xlu1 %v1962_v44, %s3469_s8 }
 0x833   : > { %2304 = vrot.lane.b32.xlu1 %v1962_v44, %s3470_s27  ;;  %s4188_s27 = sld [smem:[#allocation17_spill]] }
 0x839   : > { %s4189_s12 = scalar_lea.vmem %s4188_s27, %s4175_s23 }
 0x83a   : > { %v3071_v55 = vld [vmem:[%s4189_s12] ss:$0 sm:$0xff] }
 0x89d   : > { %v2081_v48 = vpop.permute.xlu1 %2080 }
 0x89e   : > { %3255 = vmatmul.mubr.msk.bf16.vlgmr.msra.gmra.mrb[28].mxu0 %vm1268_vm3, %v2081_v48 }
 0x89f   : > { %3265 = vmatpush3.bf16.xpose.msra.mxu0 %v2200_v49  ;;  %3266 = vmatprep.mubr.msk.bf16.mxu0 %vm3463_vm1, %v3462_v2 }
 0x8a0   : > { %3276 = vmatprep.subr.bf16.mxu0 %v3462_v2 }
 0x8a1   : > { %v2193_v51 = vpop.permute.xlu1 %2192 }
 0x8a5   : > { %v2305_v53 = vpop.permute.xlu1 %2304 }
 0x8a6   : > { %3267 = vmatmul.mubr.msk.bf16.vlgmr.msra.gmra.mrb[32].mxu0 %vm1268_vm3, %v2193_v51 }
 0x8a7   : > { %3277 = vmatpush3.bf16.xpose.msra.mxu0 %v2312_v52  ;;  %3278 = vmatprep.mubr.msk.bf16.mxu0 %vm3463_vm1, %v3462_v2 }
 0x8a8   : > { %3288 = vmatprep.subr.bf16.mxu0 %v3462_v2 }
 0x8ae   : > { %3279 = vmatmul.mubr.msk.bf16.vlgmr.msra.gmra.mrb[36].mxu0 %vm1268_vm3, %v2305_v53 }
 0x8af   : > { %3292 = vmatprep.mubr.msk.bf16.mxu0 %vm3463_vm1, %v3462_v2 }
 0x8fe   : > { %v2004_v54 = vpop.f32.mrb[24].mxu0 }
 0x8ff   : > { %v2010_v56 = vmul.f32 0.35355338, %v2004_v54  ;;  %v3244_v57 = vpop.f32.mrb[25].mxu0 }
 0x900   : > { %v2007_v58 = vpop.f32.mrb[26].mxu0 }
 0x901   : > { %v3245_v59 = vpop.f32.mrb[27].mxu0  ;;  %v2017_v60 = vadd.f32 %v3071_v55, %v2010_v56 }
 0x903   : > { %v2018_v61 = vsel %vm1268_vm3, %v2017_v60, -inf }
 0x904   : > { %2019 = vmax.xlane.f32.xlu0 %v2018_v61 }
 0x971   : > { %v2124_v62 = vpop.f32.mrb[28].mxu0 }
 0x972   : > { %v2130_v63 = vmul.f32 0.35355338, %v2124_v62  ;;  %v3256_v0 = vpop.f32.mrb[29].mxu0 }
 0x973   : > { %v2127_v1 = vpop.f32.mrb[30].mxu0 }
 0x974   : > { %v3257_v3 = vpop.f32.mrb[31].mxu0  ;;  %v2131_v5 = vadd.f32 %v3071_v55, %v2130_v63 }
 0x976   : > { %v2132_v6 = vsel %vm1268_vm3, %v2131_v5, -inf }
 0x977   : > { %2133 = vmax.xlane.f32.xlu1 %v2132_v6 }
 0x979   : > { %v2236_v7 = vpop.f32.mrb[32].mxu0 }
 0x97a   : > { %v2242_v8 = vmul.f32 0.35355338, %v2236_v7  ;;  %v3268_v9 = vpop.f32.mrb[33].mxu0  ;;  %v3376_v7 = vld [vmem:[%s3717_s10] sm:$0xff]  }
 0x97b   : > { %v2239_v10 = vpop.f32.mrb[34].mxu0  ;;  %3289 = vmatpush3.bf16.msra.mxu0 %v3376_v7 }
 0x97c   : > { %v3269_v12 = vpop.f32.mrb[35].mxu0  ;;  %v2243_v13 = vadd.f32 %v3071_v55, %v2242_v8  ;;  %3290 = vmatprep.subr.bf16.mxu0 %v3462_v2 }
 0x97e   : > { %v2244_v14 = vsel %vm1268_vm3, %v2243_v13, -inf }
 0x97f   : > { %2245 = vmax.xlane.f32.xlu0 %v2244_v14 }
 0x981   : > { %v2348_v15 = vpop.f32.mrb[36].mxu0 }
 0x982   : > { %v2354_v16 = vmul.f32 0.35355338, %v2348_v15  ;;  %v3280_v17 = vpop.f32.mrb[37].mxu0 }
 0x983   : > { %v2351_v18 = vpop.f32.mrb[38].mxu0 }
 0x984   : > { %v3281_v4 = vpop.f32.mrb[39].mxu0  ;;  %v2355_v19 = vadd.f32 %v3071_v55, %v2354_v16 }
 0x986   : > { %v2356_v20 = vsel %vm1268_vm3, %v2355_v19, -inf }
 0x987   : > { %2357 = vmax.xlane.f32.xlu0 %v2356_v20 }
 0x991   : > { %v2020_v21 = vpop.xlane.xlu0 %2019 }
 0x992   : > { %v2021_v22 = vsub.f32 %v2017_v60, %v2020_v21 }
 0x994   : > { %v2022_v23 = vmul.f32 1.442695, %v2021_v22 }
 0x996   : > { %3400 = vpow2.f32 %v2022_v23 }
 0x9a0   : > { %v3401_v24 = vpop.eup %3400 }
 0x9a1   : > { %v2024_v25 = vsel %vm1268_vm3, %v3401_v24, 0.0 }
 0x9a2   : > { %2025 = vadd.xlane.f32.xlu1 %v2024_v25 }
 0x9b3   : > { %2031 = vrot.lane.b32.xlu1 %v3915_v35, %s3465_s20  ;;  %s4200_s20 = sld [smem:[#allocation3_spill]] }
 0x9b9   : > { %p3095_p8 = scmp.ne.s32.totalorder %s4200_s20, 1 }
 0x9ba   : > { %vm2723_vm8 = vcmask (!%p3095_p8), 257024  }
 0xa04   : > { %v2134_v26 = vpop.xlane.xlu1 %2133 }
 0xa05   : > { %v2135_v27 = vsub.f32 %v2131_v5, %v2134_v26 }
 0xa07   : > { %v2136_v11 = vmul.f32 1.442695, %v2135_v27 }
 0xa09   : > { %3402 = vpow2.f32 %v2136_v11 }
 0xa0c   : > { %v2246_v29 = vpop.xlane.xlu0 %2245 }
 0xa0d   : > { %v2247_v30 = vsub.f32 %v2243_v13, %v2246_v29  ;;  %v3377_v13 = vld [vmem:[%s3717_s10 + $0x8] sm:$0xff]  }
 0xa0e   : > { %3291 = vmatpush3.bf16.msra.mxu0 %v3377_v13 }
 0xa0f   : > { %v2248_v31 = vmul.f32 1.442695, %v2247_v30  ;;  %3304 = vmatprep.subr.bf16.mxu0 %v3462_v2 }
 0xa11   : > { %3404 = vpow2.f32 %v2248_v31 }
 0xa13   : > { %v3403_v32 = vpop.eup %3402 }
 0xa14   : > { %v2358_v33 = vpop.xlane.xlu0 %2357  ;;  %v2138_v34 = vsel %vm1268_vm3, %v3403_v32, 0.0 }
 0xa15   : > { %v2359_v36 = vsub.f32 %v2355_v19, %v2358_v33  ;;  %2139 = vadd.xlane.f32.xlu0 %v2138_v34 }
 0xa17   : > { %v2360_v37 = vmul.f32 1.442695, %v2359_v36 }
 0xa19   : > { %3406 = vpow2.f32 %v2360_v37 }
 0xa1b   : > { %v3405_v38 = vpop.eup %3404 }
 0xa1c   : > { %v2250_v39 = vsel %vm1268_vm3, %v3405_v38, 0.0 }
 0xa1d   : > { %2251 = vadd.xlane.f32.xlu1 %v2250_v39 }
 0xa23   : > { %v3407_v40 = vpop.eup %3406 }
 0xa24   : > { %v2362_v41 = vsel %vm1268_vm3, %v3407_v40, 0.0 }
 0xa25   : > { %2363 = vadd.xlane.f32.xlu0 %v2362_v41 }
 0xa2e   : > { %2256 = vrot.lane.b32.xlu1 %v3915_v35, %s3466_s3  ;;  %s4190_s3 = scalar_lea.vmem %s4095_s15, %s3649_s0 }
 0xa2f   : > { %v2026_v42 = vpop.xlane.xlu1 %2025  ;;  %v3079_v11 = vld [vmem:[%s4190_s3] ss:$0 sm:$0xff] }
 0xa30   : > { %3408 = vrcp.f32 %v2026_v42 }
 0xa32   : > { %2368 = vrot.lane.b32.xlu1 %v3915_v35, %s3468_s25  ;;  %s4202_s25 = sld [smem:[#allocation35_spill]] (!%p3095_p8) }
 0xa33   : > { %v2032_v43 = vpop.permute.xlu1 %2031 }
 0xa34   : > { %v2037_v44 = vsel %vm1334_vm5, %v2032_v43, 0 }
 0xa35   : > { %3247 = vmatpush3.bf16.msra.mxu1 %v2037_v44 }
 0xa36   : > { %3258 = vmatprep.subr.bf16.mxu1 %v3462_v2 }
 0xa3a   : > { %v3409_v45 = vpop.eup %3408 }
 0xa3b   : > { %v2028_v46 = vmul.f32 %v3409_v45, %v3401_v24  ;;  %2144 = vrot.lane.b32.xlu0 %v3915_v35, %s3467_s1  ;;  %s4191_s1 = sld [smem:[#allocation13_spill]] }
 0xa3d   : > { %v2029_v47 = vpack.c.bf16 %v2028_v46, %v2028_v46 }
 0xa3f   : > { %3249 = vmatmul.mubr.msk.bf16.vlgmr.msra.gmra.mrb[24].mxu1 %vm1268_vm3, %v2029_v47 }
 0xa40   : > { %3260 = vmatprep.mubr.msk.bf16.mxu1 %vm3463_vm1, %v3462_v2 }
 0xa41   : > { %v3378_v42 = vld [vmem:[%s4191_s1] sm:$0xff]   ;;  %v3379_v43 = vld [vmem:[%s4191_s1 + $0x8] sm:$0xff]  }
 0xaa2   : > { %v2140_v48 = vpop.xlane.xlu0 %2139 }
 0xaa3   : > { %3410 = vrcp.f32 %v2140_v48 }
 0xaaa   : > { %v2252_v49 = vpop.xlane.xlu1 %2251 }
 0xaab   : > { %3412 = vrcp.f32 %v2252_v49  ;;  %v3084_v49 = vld [vmem:[%s4195_s7] ss:$0 sm:$0xff] }
 0xaad   : > { %v3411_v50 = vpop.eup %3410 }
 0xaae   : > { %v2142_v52 = vmul.f32 %v3411_v50, %v3403_v32  ;;  %v2257_v55 = vpop.permute.xlu1 %2256 }
 0xaaf   : > { %v2262_v57 = vsel %vm1334_vm5, %v2257_v55, 0  ;;  %v3085_v55 = vld [vmem:[%s4196_s6] ss:$0 sm:$0xff] }
 0xab0   : > { %v2143_v35 = vpack.c.bf16 %v2142_v52, %v2142_v52 }
 0xab2   : > { %v2364_v51 = vpop.xlane.xlu0 %2363  ;;  %v2369_v59 = vpop.permute.xlu1 %2368 }
 0xab3   : > { %3414 = vrcp.f32 %v2364_v51  ;;  %v2374_v62 = vsel %vm1334_vm5, %v2369_v59, 0 }
 0xab5   : > { %v3413_v56 = vpop.eup %3412 }
 0xab6   : > { %v2145_v53 = vpop.permute.xlu0 %2144  ;;  %v2254_v58 = vmul.f32 %v3413_v56, %v3405_v38 }
 0xab7   : > { %v2150_v54 = vsel %vm1334_vm5, %v2145_v53, 0  ;;  %v3380_v53 = vld [vmem:[%s3743_s28] sm:$0xff]  }
 0xab8   : > { %3259 = vmatpush3.bf16.msra.mxu1 %v2150_v54  ;;  %v2255_v60 = vpack.c.bf16 %v2254_v58, %v2254_v58  ;;  %v3381_v54 = vld [vmem:[%s3743_s28 + $0x8] sm:$0xff]  }
 0xab9   : > { %3270 = vmatprep.subr.bf16.mxu1 %v3462_v2 }
 0xabb   : > { %3261 = vmatmul.mubr.msk.bf16.vlgmr.msra.gmra.mrb[28].mxu1 %vm1268_vm3, %v2143_v35 }
 0xabc   : > { %3271 = vmatpush3.bf16.msra.mxu1 %v2262_v57  ;;  %3272 = vmatprep.mubr.msk.bf16.mxu1 %vm3463_vm1, %v3462_v2 }
 0xabd   : > { %3282 = vmatprep.subr.bf16.mxu1 %v3462_v2  ;;  %v3415_v61 = vpop.eup %3414 }
 0xabe   : > { %v2366_v63 = vmul.f32 %v3415_v61, %v3407_v40 }
 0xac0   : > { %v2367_v0 = vpack.c.bf16 %v2366_v63, %v2366_v63 }
 0xac3   : > { %3273 = vmatmul.mubr.msk.bf16.vlgmr.msra.gmra.mrb[32].mxu1 %vm1268_vm3, %v2255_v60 }
 0xac4   : > { %3283 = vmatpush3.bf16.msra.mxu1 %v2374_v62  ;;  %3284 = vmatprep.mubr.msk.bf16.mxu1 %vm3463_vm1, %v3462_v2 }
 0xac5   : > { %3296 = vmatprep.subr.bf16.mxu1 %v3462_v2 }
 0xacb   : > { %3285 = vmatmul.mubr.msk.bf16.vlgmr.msra.gmra.mrb[36].mxu1 %vm1268_vm3, %v2367_v0 }
 0xacc   : > { %3300 = vmatprep.mubr.msk.bf16.mxu1 %vm3463_vm1, %v3462_v2  ;;  %3297 = vmatpush3.bf16.msra.mxu1 %v3378_v42 }
 0xacd   : > { %3298 = vmatprep.subr.bf16.mxu1 %v3462_v2 }
 0xad0   : > { %3299 = vmatpush3.bf16.msra.mxu1 %v3379_v43 }
 0xb12   : > { %v2073_v1 = vpop.f32.mrb[24].mxu1 }
 0xb13   : > { %v3250_v3 = vpop.f32.mrb[25].mxu1 }
 0xb14   : > { %v2076_v5 = vpop.f32.mrb[26].mxu1 }
 0xb15   : > { %v3251_v6 = vpop.f32.mrb[27].mxu1 }
 0xb8e   : > { %v2186_v8 = vpop.f32.mrb[28].mxu1 }
 0xb8f   : > { %2417 = vrot.lane.b32.xlu0 %v2186_v8, %s3475_s4  ;;  %v3262_v9 = vpop.f32.mrb[29].mxu1  ;;  %s4192_s4 = sld [smem:[#allocation27_spill]] }
 0xb90   : > { %v2189_v10 = vpop.f32.mrb[30].mxu1 }
 0xb91   : > { %v3263_v12 = vpop.f32.mrb[31].mxu1 }
 0xb96   : > { %v2298_v14 = vpop.f32.mrb[32].mxu1 }
 0xb97   : > { %2421 = vrot.lane.b32.xlu1 %v2298_v14, %s3476_s9  ;;  %v3274_v15 = vpop.f32.mrb[33].mxu1  ;;  %s4193_s9 = scalar_lea.vmem %s4192_s4, %s3649_s0  ;;  %s4201_s0 = sld [smem:[#allocation34_spill]] (!%p3095_p8) }
 0xb98   : > { %v2301_v16 = vpop.f32.mrb[34].mxu1  ;;  %v3083_v47 = vld [vmem:[%s4193_s9] ss:$0 sm:$0xff] }
 0xb99   : > { %v3275_v17 = vpop.f32.mrb[35].mxu1 }
 0xb9a   : > { %v3093_v17 = vld [vmem:[%s1158_s17] ss:$0 sm:$0xff] }
 0xb9e   : > { %v2410_v18 = vpop.f32.mrb[36].mxu1 }
 0xb9f   : > { %2425 = vrot.lane.b32.xlu0 %v2410_v18, %s3477_s24  ;;  %v3286_v4 = vpop.f32.mrb[37].mxu1 }
 0xba0   : > { %v2413_v19 = vpop.f32.mrb[38].mxu1  ;;  %v3094_v4 = vld [vmem:[%s1161_s16] ss:$0 sm:$0xff] }
 0xba1   : > { %v3287_v20 = vpop.f32.mrb[39].mxu1 }
 0xc01   : > { %v2418_v21 = vpop.permute.xlu0 %2417 }
 0xc02   : > { %v2428_v23 = vsel %vm1268_vm3, %v2073_v1, %v2418_v21 }
 0xc09   : > { %v2422_v22 = vpop.permute.xlu1 %2421 }
 0xc0a   : > { %v2429_v24 = vsel %vm1727_vm6, %v2428_v23, %v2422_v22 }
 0xc11   : > { %v2426_v25 = vpop.permute.xlu0 %2425 }
 0xc12   : > { %v2430_v26 = vsel %vm1729_vm7, %v2429_v24, %v2426_v25 }
 0xc13   : > { %v2431_v27 = vpack.c.bf16 %v2430_v26, %v2430_v26 }
 0xc15   : > { %3293 = vmatmul.mubr.msk.bf16.vlgmr.msra.gmra.mrb[40].mxu0 %vm1215_vm2, %v2431_v27 }
 0xc16   : > { %3308 = vmatprep.mubr.msk.bf16.mxu0 %vm3463_vm1, %v3462_v2  ;;  %3305 = vmatpush3.bf16.msra.mxu0 %v3380_v53 }
 0xc17   : > { %3306 = vmatprep.subr.bf16.mxu0 %v3462_v2  ;;  %v3089_v2 = vld [vmem:[%s1155_s14] ss:$0 sm:$0xff] }
 0xc1a   : > { %3307 = vmatpush3.bf16.msra.mxu0 %v3381_v54 }
 0xce8   : > { %v2487_v29 = vpop.f32.mrb[40].mxu0 }
 0xce9   : > { %v2488_v30 = vadd.f32 %v3079_v11, %v2487_v29  ;;  %v3294_v31 = vpop.f32.mrb[41].mxu0 }
 0xcea   : > { %v2490_v32 = vpop.f32.mrb[42].mxu0  ;;  %v3096_v31 = vld [vmem:[%s4201_s0] ss:$0 sm:$0xff] (!%p3095_p8) }
 0xceb   : > { %v3295_v33 = vpop.f32.mrb[43].mxu0  ;;  %v2493_v34 = vadd.f32 %v2488_v30, %v3903_v28 }
 0xcec   : > { %v3097_v33 = vld [vmem:[%s4202_s25] ss:$0 sm:$0xff] (!%p3095_p8) }
 0xced   : > { %v2496_v36 = vsel %vm1215_vm2, %v2493_v34, 0.0 }
 0xcee   : > { %2497 = vadd.xlane.f32.xlu1 %v2496_v36 }
 0xd7b   : > { %v2498_v37 = vpop.xlane.xlu1 %2497 }
 0xd7c   : > { %v2499_v38 = vmul.f32 0.03125, %v2498_v37 }
 0xd7e   : > { %v2500_v39 = vsub.f32 %v2493_v34, %v2499_v38 }
 0xd80   : > { %v2501_v40 = vmul.f32 %v2500_v39, %v2500_v39 }
 0xd82   : > { %v2502_v41 = vsel %vm1215_vm2, %v2501_v40, 0.0 }
 0xd83   : > { %2503 = vadd.xlane.f32.xlu0 %v2502_v41 }
 0xe10   : > { %v2504_v28 = vpop.xlane.xlu0 %2503 }
 0xe11   : > { %v2505_v44 = vmul.f32 0.03125, %v2504_v28 }
 0xe13   : > { %v2506_v45 = vadd.f32 1e-05, %v2505_v44 }
 0xe15   : > { %3416 = vrsqrt.f32 %v2506_v45 }
 0xe1f   : > { %v3417_v46 = vpop.eup %3416 }
 0xe20   : > { %v2508_v48 = vmul.f32 %v3417_v46, %v2500_v39 }
 0xe22   : > { %v2515_v50 = vmul.f32 %v3083_v47, %v2508_v48 }
 0xe24   : > { %v2522_v51 = vadd.f32 %v3084_v49, %v2515_v50 }
 0xe26   : > { %v2523_v52 = vpack.c.bf16 %v2522_v51, %v2522_v51 }
 0xe28   : > { %3301 = vmatmul.mubr.msk.bf16.vlgmr.msra.gmra.mrb[40].mxu1 %vm1215_vm2, %v2523_v52 }
 0xefb   : > { %v2584_v35 = vpop.f32.mrb[40].mxu1 }
 0xefc   : > { %v2585_v56 = vadd.f32 %v3085_v55, %v2584_v35  ;;  %v3302_v57 = vpop.f32.mrb[41].mxu1 }
 0xefd   : > { %v2587_v58 = vpop.f32.mrb[42].mxu1 }
 0xefe   : > { %v2590_v59 = vmax.f32 %v2585_v56, 0.0  ;;  %v3303_v60 = vpop.f32.mrb[43].mxu1 }
 0xf00   : > { %v2591_v61 = vpack.c.bf16 %v2590_v59, %v2590_v59 }
 0xf02   : > { %3309 = vmatmul.mubr.msk.bf16.vlgmr.msra.gmra.mrb[44].mxu0 %vm1215_vm2, %v2591_v61 }
 0xfd5   : > { %v2652_v62 = vpop.f32.mrb[44].mxu0 }
 0xfd6   : > { %v2653_v63 = vadd.f32 %v3089_v2, %v2652_v62  ;;  %v3310_v0 = vpop.f32.mrb[45].mxu0 }
 0xfd7   : > { %v2655_v1 = vpop.f32.mrb[46].mxu0 }
 0xfd8   : > { %v3311_v3 = vpop.f32.mrb[47].mxu0  ;;  %v2658_v5 = vadd.f32 %v2653_v63, %v2522_v51 }
 0xfda   : > { %v2661_v6 = vsel %vm1215_vm2, %v2658_v5, 0.0 }
 0xfdb   : > { %2662 = vadd.xlane.f32.xlu0 %v2661_v6 }
0x1068   : > { %v2663_v7 = vpop.xlane.xlu0 %2662 }
0x1069   : > { %v2664_v8 = vmul.f32 0.03125, %v2663_v7 }
0x106b   : > { %v2665_v9 = vsub.f32 %v2658_v5, %v2664_v8 }
0x106d   : > { %v2666_v10 = vmul.f32 %v2665_v9, %v2665_v9 }
0x106f   : > { %v2667_v12 = vsel %vm1215_vm2, %v2666_v10, 0.0 }
0x1070   : > { %2668 = vadd.xlane.f32.xlu1 %v2667_v12 }
0x10fd   : > { %v2669_v13 = vpop.xlane.xlu1 %2668 }
0x10fe   : > { %v2670_v14 = vmul.f32 0.03125, %v2669_v13 }
0x1100   : > { %v2671_v15 = vadd.f32 1e-05, %v2670_v14 }
0x1102   : > { %3418 = vrsqrt.f32 %v2671_v15 }
0x110c   : > { %v3419_v16 = vpop.eup %3418 }
0x110d   : > { %v2673_v18 = vmul.f32 %v3419_v16, %v2665_v9  ;;  %2692 = sbr.rel (%p3095_p8) target bundleno = 4687 (0x124f), region = 132 }
0x110f   : > { %v2680_v19 = vmul.f32 %v3093_v17, %v2673_v18 }
0x1111   : > { %v2687_v20 = vadd.f32 %v3094_v4, %v2680_v19 }
0x1113   : > { %2688 = vst.msk [vmem:[#allocation2] sm:$0xff] %vm1215_vm2, %v2687_v20  ;;  %v2695_v21 = vsel (!%p3095_p8), %vm1215_vm2, %v2687_v20, 0.0 }
0x1114   : > { %2696 = vadd.xlane.f32.xlu0 %v2695_v21 }
0x11a1   : > { %v2697_v22 = vpop.xlane.xlu0 %2696 }
0x11a2   : > { %v2698_v23 = vmul.f32 0.03125, %v2697_v22 }
0x11a4   : > { %v2699_v24 = vsub.f32 %v2687_v20, %v2698_v23 }
0x11a6   : > { %v2700_v25 = vmul.f32 %v2699_v24, %v2699_v24 }
0x11a8   : > { %v2701_v26 = vsel %vm1215_vm2, %v2700_v25, 0.0 }
0x11a9   : > { %2702 = vadd.xlane.f32.xlu0 %v2701_v26 }
0x1236   : > { %v2703_v27 = vpop.xlane.xlu0 %2702 }
0x1237   : > { %v2704_v11 = vmul.f32 0.03125, %v2703_v27 }
0x1239   : > { %v2705_v29 = vadd.f32 1e-05, %v2704_v11 }
0x123b   : > { %3420 = vrsqrt.f32 %v2705_v29 }
0x1245   : > { %v3421_v30 = vpop.eup %3420 }
0x1246   : > { %v2707_v32 = vmul.f32 %v3421_v30, %v2699_v24 }
0x1248   : > { %v2714_v34 = vmul.f32 %v3096_v31, %v2707_v32 }
0x124a   : > { %v2721_v36 = vadd.f32 %v3097_v33, %v2714_v34 }
0x124c   : > { %v2722_v37 = vpack.c.bf16 %v2721_v36, %v2721_v36 }
0x124e   : > { %2724 = vst.msk [vmem:[%s3760_s2] sm:$0xf] %vm2723_vm8, %v2722_v37 }
0x124f PF: > { %s4203_s23 = sld [smem:[#allocation6_spill]]  ;;  %s4204_s27 = sld [smem:[#allocation4_spill]] }
0x1250   : > { %s4205_s3 = sld [smem:[#allocation5_spill]]  ;;  %s4206_s7 = sld [smem:[#allocation7_spill]] }
0x1251   : > { %s4207_s28 = sld [smem:[#allocation8_spill]] }
0x1255   : > { %s36_s8 = sadd.s32 1, %s4203_s23  }
0x1256   : > { %p33_p9 = scmp.ge.s32.totalorder %s36_s8, 6  }
0x1258   :  { %35 = sbr.rel (!%p33_p9) target bundleno = 24 (0x18), region = 231 }

</bundles_post_ra>
